<compile_context>
chip_gen: v7x
topology: tpu7x:2x2x1
jax: 0.10.0
libtpu: 0.0.40
codegen_flags: <defaults>
</compile_context>

<pallas_src>
import jax
import jax.numpy as jnp
from jax import lax
from jax.experimental import pallas as pl
from jax.experimental.pallas import tpu as pltpu

LANE = 128


def _round_up(x, m):
    return (x + m - 1) // m * m


def _fold_bn(gamma, beta, mean, var, eps):
    scale = gamma / jnp.sqrt(var + eps)
    bias = beta - mean * scale
    return scale, bias


def _pick_strip(h):
    # Strip height: a multiple of 8 keeps dynamic row offsets sublane-aligned.
    # Fall back to a single strip when H is not a multiple of 8.
    if h % 8 == 0 and h > 8:
        return 8
    return h


def _make_kernel(H, W, S, Cin, Cmid, Cout, cin_p, cmid_p, cout_p):
    n_strips = H // S

    def kernel(x_ref, w1_ref, s1_ref, b1_ref, w2_ref, s2_ref, b2_ref, o_ref,
               xpad_ref, mpad_ref):
        s = pl.program_id(1)
        r0 = s * S                       # first output row of this strip
        if S % 8 == 0:
            r0 = pl.multiple_of(r0, 8)

        # ---- stage x rows [r0-2, r0+S+2) into a zero-padded bf16 scratch ----
        # Full-buffer zero: strip-sized bf16, << the 9x tap-read traffic, and
        # uniformly covers boundary rows / halo columns for every strip.
        xpad_ref[...] = jnp.zeros_like(xpad_ref)

        def copy_rows(gstart, lstart, nrows):
            v = x_ref[0, pl.ds(gstart, nrows), :, :].astype(jnp.bfloat16)
            if cin_p != Cin:             # channel tail padded in-kernel (no HBM pad pass)
                v = jnp.concatenate(
                    [v, jnp.zeros((nrows, W, cin_p - Cin), jnp.bfloat16)],
                    axis=-1)
            xpad_ref[lstart:lstart + nrows, 1:W + 1, :] = v

        if n_strips == 1:
            copy_rows(0, 2, H)
        else:
            @pl.when(s == 0)
            def _():
                copy_rows(0, 2, S + 2)

            @pl.when(s == n_strips - 1)
            def _():
                copy_rows(r0 - 2, 0, S + 2)

            if n_strips > 2:
                @pl.when(jnp.logical_and(s > 0, s < n_strips - 1))
                def _():
                    copy_rows(r0 - 2, 0, S + 4)

        # ---- conv1: 9 accumulated MXU dots on shifted xpad slices ------------
        # (no im2col buffer; computes out1 rows [r0-1, r0+S+1) incl. conv2 halo)
        acc1 = jnp.zeros(((S + 2) * W, cmid_p), jnp.float32)
        for dy in range(3):
            for dx in range(3):
                tap = xpad_ref[dy:dy + S + 2, dx:dx + W, :].reshape(
                    (S + 2) * W, cin_p)
                acc1 = acc1 + jnp.dot(tap, w1_ref[dy * 3 + dx],
                                      preferred_element_type=jnp.float32)

        # bn1 (folded scale/bias) + relu; rows outside the image (conv2's
        # spatial zero padding) are forced to exactly zero.
        out1 = jnp.maximum(acc1 * s1_ref[...] + b1_ref[...], 0.0)
        out1 = out1.reshape(S + 2, W, cmid_p)
        gl = r0 - 1 + lax.broadcasted_iota(jnp.int32, (S + 2, 1, 1), 0)
        out1 = jnp.where(jnp.logical_and(gl >= 0, gl < H), out1, 0.0)

        # mpad: only the two halo columns need zeroing (all rows / all lanes of
        # the interior are overwritten; padded lanes are already exactly zero).
        zcol = jnp.zeros((S + 2, 1, cmid_p), jnp.bfloat16)
        mpad_ref[:, 0:1, :] = zcol
        mpad_ref[:, W + 1:W + 2, :] = zcol
        mpad_ref[:, 1:W + 1, :] = out1.astype(jnp.bfloat16)

        # ---- conv2: 9 accumulated MXU dots on shifted mpad slices ------------
        acc2 = jnp.zeros((S * W, cout_p), jnp.float32)
        for dy in range(3):
            for dx in range(3):
                tap = mpad_ref[dy:dy + S, dx:dx + W, :].reshape(S * W, cmid_p)
                acc2 = acc2 + jnp.dot(tap, w2_ref[dy * 3 + dx],
                                      preferred_element_type=jnp.float32)

        # ---- bn2 + identity residual (NO final relu, per BasicBlockNoRelu) ---
        # Residual is read only here (not kept live across the convs).
        res = x_ref[0, pl.ds(r0, S), :, :].reshape(S * W, Cout)
        out2 = acc2[:, :Cout] * s2_ref[...] + b2_ref[...] + res
        o_ref[...] = out2.reshape(1, S, W, Cout).astype(o_ref.dtype)

    return kernel


def basic_block_no_relu_nhwc(x, w1, bn1_params, w2, bn2_params, eps=1e-5,
                             *, strip=None, out_dtype=jnp.float32):
    """Fused LUCIR BasicBlockNoRelu (stride=1, downsample=None, eval-mode BN).

    x: (N, H, W, Cin) float32 (NHWC).  w1: (3,3,Cin,Cmid), w2: (3,3,Cmid,Cout) HWIO.
    bn*_params: (gamma, beta, running_mean, running_var).
    No activation-sized HBM passes happen outside the kernel; chain blocks
    through this entry point to keep a persistent NHWC layout.
    """
    N, H, W, Cin = x.shape
    Cmid, Cout = w1.shape[3], w2.shape[3]
    assert w1.shape[:3] == (3, 3, Cin) and w2.shape[:3] == (3, 3, Cmid)
    assert Cout == Cin, "identity residual requires Cout == Cin"

    S = strip or _pick_strip(H)
    assert H % S == 0 and (H // S == 1 or S + 2 <= H)
    n_strips = H // S

    cin_p = _round_up(Cin, LANE)
    cmid_p = _round_up(Cmid, LANE)
    cout_p = _round_up(Cout, LANE)

    s1, b1 = _fold_bn(*bn1_params, eps)
    s2, b2 = _fold_bn(*bn2_params, eps)

    def prep_w(w, cp_in, cp_out):   # HWIO -> (9, cp_in, cp_out) bf16, zero-padded
        w = jnp.pad(w, ((0, 0), (0, 0),
                        (0, cp_in - w.shape[2]), (0, cp_out - w.shape[3])))
        return w.reshape(9, cp_in, cp_out).astype(jnp.bfloat16)

    w1r = prep_w(w1, cin_p, cmid_p)
    w2r = prep_w(w2, cmid_p, cout_p)
    # bn1 scale/bias padded to the lane-padded intermediate width (zero tail
    # keeps padded lanes exactly zero through relu); bn2 stays true-width since
    # the output is emitted with its true channel count.
    s1p = jnp.pad(s1, (0, cmid_p - Cmid)).reshape(1, cmid_p).astype(jnp.float32)
    b1p = jnp.pad(b1, (0, cmid_p - Cmid)).reshape(1, cmid_p).astype(jnp.float32)
    s2p = s2.reshape(1, Cout).astype(jnp.float32)
    b2p = b2.reshape(1, Cout).astype(jnp.float32)

    kernel = _make_kernel(H, W, S, Cin, Cmid, Cout, cin_p, cmid_p, cout_p)

    # Per-shape VMEM budget: double-buffered blocks + scratches + accumulators
    # + materialized tap slices, with 4x headroom; capped at v7x's 64 MiB.
    out_bytes = jnp.dtype(out_dtype).itemsize
    est = (2 * H * W * Cin * 4 +
           2 * S * W * Cout * out_bytes +
           2 * 9 * (cin_p * cmid_p + cmid_p * cout_p) * 2 +
           (S + 4) * (W + 2) * cin_p * 2 +
           (S + 2) * (W + 2) * cmid_p * 2 +
           (S + 2) * W * cmid_p * 4 + S * W * cout_p * 4 +
           2 * (S + 2) * W * max(cin_p, cmid_p) * 2)
    vmem_limit = int(min(max(4 * est, 32 * 1024 * 1024), 64 * 1024 * 1024))

    # Note: w/scale/bias specs could use pipeline_mode=pl.Buffered(1) to avoid
    # double-buffering grid-invariant operands; left at the default for safety.
    out = pl.pallas_call(
        kernel,
        out_shape=jax.ShapeDtypeStruct((N, H, W, Cout), out_dtype),
        grid_spec=pltpu.PrefetchScalarGridSpec(
            num_scalar_prefetch=0,
            grid=(N, n_strips),
            in_specs=[
                # Full image resident across the strip axis (same block index),
                # so the 2-row conv halo needs no extra DMA.
                pl.BlockSpec((1, H, W, Cin), lambda n, s: (n, 0, 0, 0)),
                pl.BlockSpec((9, cin_p, cmid_p), lambda n, s: (0, 0, 0)),
                pl.BlockSpec((1, cmid_p), lambda n, s: (0, 0)),
                pl.BlockSpec((1, cmid_p), lambda n, s: (0, 0)),
                pl.BlockSpec((9, cmid_p, cout_p), lambda n, s: (0, 0, 0)),
                pl.BlockSpec((1, Cout), lambda n, s: (0, 0)),
                pl.BlockSpec((1, Cout), lambda n, s: (0, 0)),
            ],
            out_specs=pl.BlockSpec((1, S, W, Cout), lambda n, s: (n, s, 0, 0)),
            scratch_shapes=[
                pltpu.VMEM((S + 4, W + 2, cin_p), jnp.bfloat16),   # padded x strip
                pltpu.VMEM((S + 2, W + 2, cmid_p), jnp.bfloat16),  # padded relu(bn1)
            ],
        ),
        compiler_params=pltpu.CompilerParams(
            dimension_semantics=("parallel", "parallel"),
            vmem_limit_bytes=vmem_limit,
        ),
    )(x, w1r, s1p, b1p, w2r, s2p, b2p)
    return out


def basic_block_no_relu(x_nchw, w1, bn1_params, w2, bn2_params, eps=1e-5,
                        *, strip=None, out_dtype=jnp.float32):
    """NCHW compatibility wrapper (matches the PyTorch module's layout).
    For chained blocks call basic_block_no_relu_nhwc directly to avoid the
    two layout transposes."""
    x = jnp.transpose(x_nchw, (0, 2, 3, 1))
    out = basic_block_no_relu_nhwc(x, w1, bn1_params, w2, bn2_params, eps,
                                   strip=strip, out_dtype=out_dtype)
    return jnp.transpose(out, (0, 3, 1, 2))


# ------------------------- pure-JAX reference (for checking) -----------------
def _conv3x3_ref(x_nhwc, w_hwio):
    return lax.conv_general_dilated(
        x_nhwc, w_hwio, window_strides=(1, 1), padding="SAME",
        dimension_numbers=("NHWC", "HWIO", "NHWC"))


def basic_block_no_relu_ref(x_nchw, w1, bn1_params, w2, bn2_params, eps=1e-5):
    x = jnp.transpose(x_nchw, (0, 2, 3, 1))
    s1, b1 = _fold_bn(*bn1_params, eps)
    s2, b2 = _fold_bn(*bn2_params, eps)
    out = jnp.maximum(_conv3x3_ref(x, w1) * s1 + b1, 0.0)
    out = _conv3x3_ref(out, w2) * s2 + b2
    out = out + x
    return jnp.transpose(out, (0, 3, 1, 2))


if __name__ == "__main__":
    key = jax.random.PRNGKey(0)
    ks = jax.random.split(key, 12)

    N, C, H, W = 2, 4, 16, 16  # small ResNet-style block: Cin = Cmid = Cout = 4

    x = jax.random.normal(ks[0], (N, C, H, W), jnp.float32)

    w1 = 0.2 * jax.random.normal(ks[1], (3, 3, C, C), jnp.float32)
    w2 = 0.2 * jax.random.normal(ks[2], (3, 3, C, C), jnp.float32)

    bn1 = (1.0 + 0.1 * jax.random.normal(ks[3], (C,), jnp.float32),   # gamma
           0.1 * jax.random.normal(ks[4], (C,), jnp.float32),          # beta
           0.1 * jax.random.normal(ks[5], (C,), jnp.float32),          # running_mean
           0.5 + jax.random.uniform(ks[6], (C,), jnp.float32))         # running_var
    bn2 = (1.0 + 0.1 * jax.random.normal(ks[7], (C,), jnp.float32),
           0.1 * jax.random.normal(ks[8], (C,), jnp.float32),
           0.1 * jax.random.normal(ks[9], (C,), jnp.float32),
           0.5 + jax.random.uniform(ks[10], (C,), jnp.float32))

    out = basic_block_no_relu(x, w1, bn1, w2, bn2)
    out = jax.block_until_ready(out)

    ref = jax.block_until_ready(basic_block_no_relu_ref(x, w1, bn1, w2, bn2))
    assert out.shape == (N, C, H, W)
    # bf16 MXU operands with f32 accumulation -> slightly looser tolerance.
    assert jnp.allclose(out, ref, rtol=2e-2, atol=3e-2), (
        float(jnp.max(jnp.abs(out - ref))))

    print("KERNEL_OK")
</pallas_src>

<mosaic_0001>
module attributes {stable_mosaic.version = 11 : i64} {
  func.func @kernel(%arg0: i32, %arg1: i32, %arg2: memref<1x16x16x4xf32, #tpu.memory_space<vmem>>, %arg3: memref<9x128x128xbf16, #tpu.memory_space<vmem>>, %arg4: memref<1x128xf32, #tpu.memory_space<vmem>>, %arg5: memref<1x128xf32, #tpu.memory_space<vmem>>, %arg6: memref<9x128x128xbf16, #tpu.memory_space<vmem>>, %arg7: memref<1x4xf32, #tpu.memory_space<vmem>>, %arg8: memref<1x4xf32, #tpu.memory_space<vmem>>, %arg9: memref<1x8x16x4xf32, #tpu.memory_space<vmem>>, %arg10: memref<12x18x128xbf16, #tpu.memory_space<vmem>>, %arg11: memref<10x18x128xbf16, #tpu.memory_space<vmem>>) attributes {dimension_semantics = [#tpu.dimension_semantics<parallel>, #tpu.dimension_semantics<parallel>], iteration_bounds = array<i64: 2, 2>, scalar_prefetch = 0 : i64, scratch_operands = 2 : i64, tpu.core_type = #tpu.core_type<tc>, window_params = [{transform_indices = @transform_0, window_bounds = array<i64: 1, 16, 16, 4>}, {pipeline_mode = #tpu.pipeline_mode<synchronous>, transform_indices = @transform_1, window_bounds = array<i64: 9, 128, 128>}, {pipeline_mode = #tpu.pipeline_mode<synchronous>, transform_indices = @transform_2, window_bounds = array<i64: 1, 128>}, {pipeline_mode = #tpu.pipeline_mode<synchronous>, transform_indices = @transform_3, window_bounds = array<i64: 1, 128>}, {pipeline_mode = #tpu.pipeline_mode<synchronous>, transform_indices = @transform_4, window_bounds = array<i64: 9, 128, 128>}, {pipeline_mode = #tpu.pipeline_mode<synchronous>, transform_indices = @transform_5, window_bounds = array<i64: 1, 4>}, {pipeline_mode = #tpu.pipeline_mode<synchronous>, transform_indices = @transform_6, window_bounds = array<i64: 1, 4>}, {transform_indices = @transform_7, window_bounds = array<i64: 1, 8, 16, 4>}]} {
    %c8_i32 = arith.constant 8 : i32
    %0 = arith.muli %arg1, %c8_i32 : i32
    %1 = tpu.assume_multiple %0, 8 : i32
    %cst = arith.constant 0.000000e+00 : bf16
    %2 = vector.broadcast %cst : bf16 to vector<12x18x128xbf16>
    %c0 = arith.constant 0 : index
    %c0_0 = arith.constant 0 : index
    %c0_1 = arith.constant 0 : index
    %3 = vector.load %arg10[%c0, %c0_0, %c0_1] : memref<12x18x128xbf16, #tpu.memory_space<vmem>>, vector<12x18x128xbf16>
    tpu.vector_store %arg10[%c0, %c0_0, %c0_1], %2 {strides = array<i32>} : memref<12x18x128xbf16, #tpu.memory_space<vmem>>, vector<12x18x128xbf16>,
    %c0_i32 = arith.constant 0 : i32
    %4 = arith.cmpi eq, %arg1, %c0_i32 : i32
    %5 = arith.extui %4 : i1 to i32
    %c0_i32_2 = arith.constant 0 : i32
    %6 = arith.cmpi ne, %5, %c0_i32_2 : i32
    scf.if %6 {
      %c0_152 = arith.constant 0 : index
      %c0_153 = arith.constant 0 : index
      %c0_154 = arith.constant 0 : index
      %c0_155 = arith.constant 0 : index
      %161 = vector.load %arg2[%c0_152, %c0_153, %c0_154, %c0_155] : memref<1x16x16x4xf32, #tpu.memory_space<vmem>>, vector<1x10x16x4xf32>
      %162 = vector.shape_cast %161 : vector<1x10x16x4xf32> to vector<10x16x4xf32>
      %163 = arith.truncf %162 : vector<10x16x4xf32> to vector<10x16x4xbf16>
      %cst_156 = arith.constant 0.000000e+00 : bf16
      %164 = vector.broadcast %cst_156 : bf16 to vector<10x16x124xbf16>
      %165 = tpu.concatenate %163, %164 in 2 : vector<10x16x4xbf16>, vector<10x16x124xbf16> -> vector<10x16x128xbf16>
      %c2_157 = arith.constant 2 : index
      %c1_158 = arith.constant 1 : index
      %c0_159 = arith.constant 0 : index
      %166 = vector.load %arg10[%c2_157, %c1_158, %c0_159] : memref<12x18x128xbf16, #tpu.memory_space<vmem>>, vector<10x16x128xbf16>
      tpu.vector_store %arg10[%c2_157, %c1_158, %c0_159], %165 {strides = array<i32>} : memref<12x18x128xbf16, #tpu.memory_space<vmem>>, vector<10x16x128xbf16>,
    } else {
    }
    %c1_i32 = arith.constant 1 : i32
    %7 = arith.cmpi eq, %arg1, %c1_i32 : i32
    %8 = arith.extui %7 : i1 to i32
    %c0_i32_3 = arith.constant 0 : i32
    %9 = arith.cmpi ne, %8, %c0_i32_3 : i32
    scf.if %9 {
      %c2_i32 = arith.constant 2 : i32
      %161 = arith.subi %1, %c2_i32 : i32
      %c0_152 = arith.constant 0 : index
      %162 = arith.index_cast %161 : i32 to index
      %c0_153 = arith.constant 0 : index
      %c0_154 = arith.constant 0 : index
      %163 = vector.load %arg2[%c0_152, %162, %c0_153, %c0_154] : memref<1x16x16x4xf32, #tpu.memory_space<vmem>>, vector<1x10x16x4xf32>
      %164 = vector.shape_cast %163 : vector<1x10x16x4xf32> to vector<10x16x4xf32>
      %165 = arith.truncf %164 : vector<10x16x4xf32> to vector<10x16x4xbf16>
      %cst_155 = arith.constant 0.000000e+00 : bf16
      %166 = vector.broadcast %cst_155 : bf16 to vector<10x16x124xbf16>
      %167 = tpu.concatenate %165, %166 in 2 : vector<10x16x4xbf16>, vector<10x16x124xbf16> -> vector<10x16x128xbf16>
      %c0_156 = arith.constant 0 : index
      %c1_157 = arith.constant 1 : index
      %c0_158 = arith.constant 0 : index
      %168 = vector.load %arg10[%c0_156, %c1_157, %c0_158] : memref<12x18x128xbf16, #tpu.memory_space<vmem>>, vector<10x16x128xbf16>
      tpu.vector_store %arg10[%c0_156, %c1_157, %c0_158], %167 {strides = array<i32>} : memref<12x18x128xbf16, #tpu.memory_space<vmem>>, vector<10x16x128xbf16>,
    } else {
    }
    %cst_4 = arith.constant 0.000000e+00 : f32
    %10 = vector.broadcast %cst_4 : f32 to vector<160x128xf32>
    %c0_5 = arith.constant 0 : index
    %c0_6 = arith.constant 0 : index
    %c0_7 = arith.constant 0 : index
    %11 = vector.load %arg10[%c0_5, %c0_6, %c0_7] : memref<12x18x128xbf16, #tpu.memory_space<vmem>>, vector<10x16x128xbf16>
    %12 = vector.shape_cast %11 : vector<10x16x128xbf16> to vector<160x128xbf16>
    %c0_8 = arith.constant 0 : index
    %c0_9 = arith.constant 0 : index
    %c0_10 = arith.constant 0 : index
    %13 = vector.load %arg3[%c0_8, %c0_9, %c0_10] : memref<9x128x128xbf16, #tpu.memory_space<vmem>>, vector<1x128x128xbf16>
    %14 = vector.shape_cast %13 : vector<1x128x128xbf16> to vector<128x128xbf16>
    %cst_11 = arith.constant dense<0.000000e+00> : vector<160x128xf32>
    %15 = tpu.matmul %12, %14, %cst_11 {dimension_numbers = #tpu.dot_dimension_numbers<[1], [0], [0], [1], [0, 0, 1, 1], [], []>} : vector<160x128xbf16>, vector<128x128xbf16>, vector<160x128xf32> -> vector<160x128xf32>
    %16 = arith.addf %10, %15 : vector<160x128xf32>
    %c0_12 = arith.constant 0 : index
    %c1 = arith.constant 1 : index
    %c0_13 = arith.constant 0 : index
    %17 = vector.load %arg10[%c0_12, %c1, %c0_13] : memref<12x18x128xbf16, #tpu.memory_space<vmem>>, vector<10x16x128xbf16>
    %18 = vector.shape_cast %17 : vector<10x16x128xbf16> to vector<160x128xbf16>
    %c1_14 = arith.constant 1 : index
    %c0_15 = arith.constant 0 : index
    %c0_16 = arith.constant 0 : index
    %19 = vector.load %arg3[%c1_14, %c0_15, %c0_16] : memref<9x128x128xbf16, #tpu.memory_space<vmem>>, vector<1x128x128xbf16>
    %20 = vector.shape_cast %19 : vector<1x128x128xbf16> to vector<128x128xbf16>
    %cst_17 = arith.constant dense<0.000000e+00> : vector<160x128xf32>
    %21 = tpu.matmul %18, %20, %cst_17 {dimension_numbers = #tpu.dot_dimension_numbers<[1], [0], [0], [1], [0, 0, 1, 1], [], []>} : vector<160x128xbf16>, vector<128x128xbf16>, vector<160x128xf32> -> vector<160x128xf32>
    %22 = arith.addf %16, %21 : vector<160x128xf32>
    %c0_18 = arith.constant 0 : index
    %c2 = arith.constant 2 : index
    %c0_19 = arith.constant 0 : index
    %23 = vector.load %arg10[%c0_18, %c2, %c0_19] : memref<12x18x128xbf16, #tpu.memory_space<vmem>>, vector<10x16x128xbf16>
    %24 = vector.shape_cast %23 : vector<10x16x128xbf16> to vector<160x128xbf16>
    %c2_20 = arith.constant 2 : index
    %c0_21 = arith.constant 0 : index
    %c0_22 = arith.constant 0 : index
    %25 = vector.load %arg3[%c2_20, %c0_21, %c0_22] : memref<9x128x128xbf16, #tpu.memory_space<vmem>>, vector<1x128x128xbf16>
    %26 = vector.shape_cast %25 : vector<1x128x128xbf16> to vector<128x128xbf16>
    %cst_23 = arith.constant dense<0.000000e+00> : vector<160x128xf32>
    %27 = tpu.matmul %24, %26, %cst_23 {dimension_numbers = #tpu.dot_dimension_numbers<[1], [0], [0], [1], [0, 0, 1, 1], [], []>} : vector<160x128xbf16>, vector<128x128xbf16>, vector<160x128xf32> -> vector<160x128xf32>
    %28 = arith.addf %22, %27 : vector<160x128xf32>
    %c1_24 = arith.constant 1 : index
    %c0_25 = arith.constant 0 : index
    %c0_26 = arith.constant 0 : index
    %29 = vector.load %arg10[%c1_24, %c0_25, %c0_26] : memref<12x18x128xbf16, #tpu.memory_space<vmem>>, vector<10x16x128xbf16>
    %30 = vector.shape_cast %29 : vector<10x16x128xbf16> to vector<160x128xbf16>
    %c3 = arith.constant 3 : index
    %c0_27 = arith.constant 0 : index
    %c0_28 = arith.constant 0 : index
    %31 = vector.load %arg3[%c3, %c0_27, %c0_28] : memref<9x128x128xbf16, #tpu.memory_space<vmem>>, vector<1x128x128xbf16>
    %32 = vector.shape_cast %31 : vector<1x128x128xbf16> to vector<128x128xbf16>
    %cst_29 = arith.constant dense<0.000000e+00> : vector<160x128xf32>
    %33 = tpu.matmul %30, %32, %cst_29 {dimension_numbers = #tpu.dot_dimension_numbers<[1], [0], [0], [1], [0, 0, 1, 1], [], []>} : vector<160x128xbf16>, vector<128x128xbf16>, vector<160x128xf32> -> vector<160x128xf32>
    %34 = arith.addf %28, %33 : vector<160x128xf32>
    %c1_30 = arith.constant 1 : index
    %c1_31 = arith.constant 1 : index
    %c0_32 = arith.constant 0 : index
    %35 = vector.load %arg10[%c1_30, %c1_31, %c0_32] : memref<12x18x128xbf16, #tpu.memory_space<vmem>>, vector<10x16x128xbf16>
    %36 = vector.shape_cast %35 : vector<10x16x128xbf16> to vector<160x128xbf16>
    %c4 = arith.constant 4 : index
    %c0_33 = arith.constant 0 : index
    %c0_34 = arith.constant 0 : index
    %37 = vector.load %arg3[%c4, %c0_33, %c0_34] : memref<9x128x128xbf16, #tpu.memory_space<vmem>>, vector<1x128x128xbf16>
    %38 = vector.shape_cast %37 : vector<1x128x128xbf16> to vector<128x128xbf16>
    %cst_35 = arith.constant dense<0.000000e+00> : vector<160x128xf32>
    %39 = tpu.matmul %36, %38, %cst_35 {dimension_numbers = #tpu.dot_dimension_numbers<[1], [0], [0], [1], [0, 0, 1, 1], [], []>} : vector<160x128xbf16>, vector<128x128xbf16>, vector<160x128xf32> -> vector<160x128xf32>
    %40 = arith.addf %34, %39 : vector<160x128xf32>
    %c1_36 = arith.constant 1 : index
    %c2_37 = arith.constant 2 : index
    %c0_38 = arith.constant 0 : index
    %41 = vector.load %arg10[%c1_36, %c2_37, %c0_38] : memref<12x18x128xbf16, #tpu.memory_space<vmem>>, vector<10x16x128xbf16>
    %42 = vector.shape_cast %41 : vector<10x16x128xbf16> to vector<160x128xbf16>
    %c5 = arith.constant 5 : index
    %c0_39 = arith.constant 0 : index
    %c0_40 = arith.constant 0 : index
    %43 = vector.load %arg3[%c5, %c0_39, %c0_40] : memref<9x128x128xbf16, #tpu.memory_space<vmem>>, vector<1x128x128xbf16>
    %44 = vector.shape_cast %43 : vector<1x128x128xbf16> to vector<128x128xbf16>
    %cst_41 = arith.constant dense<0.000000e+00> : vector<160x128xf32>
    %45 = tpu.matmul %42, %44, %cst_41 {dimension_numbers = #tpu.dot_dimension_numbers<[1], [0], [0], [1], [0, 0, 1, 1], [], []>} : vector<160x128xbf16>, vector<128x128xbf16>, vector<160x128xf32> -> vector<160x128xf32>
    %46 = arith.addf %40, %45 : vector<160x128xf32>
    %c2_42 = arith.constant 2 : index
    %c0_43 = arith.constant 0 : index
    %c0_44 = arith.constant 0 : index
    %47 = vector.load %arg10[%c2_42, %c0_43, %c0_44] : memref<12x18x128xbf16, #tpu.memory_space<vmem>>, vector<10x16x128xbf16>
    %48 = vector.shape_cast %47 : vector<10x16x128xbf16> to vector<160x128xbf16>
    %c6 = arith.constant 6 : index
    %c0_45 = arith.constant 0 : index
    %c0_46 = arith.constant 0 : index
    %49 = vector.load %arg3[%c6, %c0_45, %c0_46] : memref<9x128x128xbf16, #tpu.memory_space<vmem>>, vector<1x128x128xbf16>
    %50 = vector.shape_cast %49 : vector<1x128x128xbf16> to vector<128x128xbf16>
    %cst_47 = arith.constant dense<0.000000e+00> : vector<160x128xf32>
    %51 = tpu.matmul %48, %50, %cst_47 {dimension_numbers = #tpu.dot_dimension_numbers<[1], [0], [0], [1], [0, 0, 1, 1], [], []>} : vector<160x128xbf16>, vector<128x128xbf16>, vector<160x128xf32> -> vector<160x128xf32>
    %52 = arith.addf %46, %51 : vector<160x128xf32>
    %c2_48 = arith.constant 2 : index
    %c1_49 = arith.constant 1 : index
    %c0_50 = arith.constant 0 : index
    %53 = vector.load %arg10[%c2_48, %c1_49, %c0_50] : memref<12x18x128xbf16, #tpu.memory_space<vmem>>, vector<10x16x128xbf16>
    %54 = vector.shape_cast %53 : vector<10x16x128xbf16> to vector<160x128xbf16>
    %c7 = arith.constant 7 : index
    %c0_51 = arith.constant 0 : index
    %c0_52 = arith.constant 0 : index
    %55 = vector.load %arg3[%c7, %c0_51, %c0_52] : memref<9x128x128xbf16, #tpu.memory_space<vmem>>, vector<1x128x128xbf16>
    %56 = vector.shape_cast %55 : vector<1x128x128xbf16> to vector<128x128xbf16>
    %cst_53 = arith.constant dense<0.000000e+00> : vector<160x128xf32>
    %57 = tpu.matmul %54, %56, %cst_53 {dimension_numbers = #tpu.dot_dimension_numbers<[1], [0], [0], [1], [0, 0, 1, 1], [], []>} : vector<160x128xbf16>, vector<128x128xbf16>, vector<160x128xf32> -> vector<160x128xf32>
    %58 = arith.addf %52, %57 : vector<160x128xf32>
    %c2_54 = arith.constant 2 : index
    %c2_55 = arith.constant 2 : index
    %c0_56 = arith.constant 0 : index
    %59 = vector.load %arg10[%c2_54, %c2_55, %c0_56] : memref<12x18x128xbf16, #tpu.memory_space<vmem>>, vector<10x16x128xbf16>
    %60 = vector.shape_cast %59 : vector<10x16x128xbf16> to vector<160x128xbf16>
    %c8 = arith.constant 8 : index
    %c0_57 = arith.constant 0 : index
    %c0_58 = arith.constant 0 : index
    %61 = vector.load %arg3[%c8, %c0_57, %c0_58] : memref<9x128x128xbf16, #tpu.memory_space<vmem>>, vector<1x128x128xbf16>
    %62 = vector.shape_cast %61 : vector<1x128x128xbf16> to vector<128x128xbf16>
    %cst_59 = arith.constant dense<0.000000e+00> : vector<160x128xf32>
    %63 = tpu.matmul %60, %62, %cst_59 {dimension_numbers = #tpu.dot_dimension_numbers<[1], [0], [0], [1], [0, 0, 1, 1], [], []>} : vector<160x128xbf16>, vector<128x128xbf16>, vector<160x128xf32> -> vector<160x128xf32>
    %64 = arith.addf %58, %63 : vector<160x128xf32>
    %c0_60 = arith.constant 0 : index
    %c0_61 = arith.constant 0 : index
    %65 = vector.load %arg4[%c0_60, %c0_61] : memref<1x128xf32, #tpu.memory_space<vmem>>, vector<1x128xf32>
    %66 = vector.broadcast %65 : vector<1x128xf32> to vector<160x128xf32>
    %67 = arith.mulf %64, %66 : vector<160x128xf32>
    %c0_62 = arith.constant 0 : index
    %c0_63 = arith.constant 0 : index
    %68 = vector.load %arg5[%c0_62, %c0_63] : memref<1x128xf32, #tpu.memory_space<vmem>>, vector<1x128xf32>
    %69 = vector.broadcast %68 : vector<1x128xf32> to vector<160x128xf32>
    %70 = arith.addf %67, %69 : vector<160x128xf32>
    %cst_64 = arith.constant 0.000000e+00 : f32
    %71 = vector.broadcast %cst_64 : f32 to vector<160x128xf32>
    %72 = arith.maximumf %70, %71 : vector<160x128xf32>
    %73 = vector.shape_cast %72 : vector<160x128xf32> to vector<10x16x128xf32>
    %c1_i32_65 = arith.constant 1 : i32
    %74 = arith.subi %1, %c1_i32_65 : i32
    %75 = tpu.iota {dimensions = array<i32: 0>} : vector<10x1x1xi32>
    %76 = vector.broadcast %74 : i32 to vector<10x1x1xi32>
    %77 = arith.addi %76, %75 : vector<10x1x1xi32>
    %c0_i32_66 = arith.constant 0 : i32
    %78 = vector.broadcast %c0_i32_66 : i32 to vector<10x1x1xi32>
    %79 = arith.cmpi sge, %77, %78 : vector<10x1x1xi32>
    %c16_i32 = arith.constant 16 : i32
    %80 = vector.broadcast %c16_i32 : i32 to vector<10x1x1xi32>
    %81 = arith.cmpi slt, %77, %80 : vector<10x1x1xi32>
    %82 = arith.andi %79, %81 : vector<10x1x1xi1>
    %cst_67 = arith.constant 0.000000e+00 : f32
    %83 = vector.shape_cast %82 : vector<10x1x1xi1> to vector<10x1x1xi1>
    %84 = vector.broadcast %83 : vector<10x1x1xi1> to vector<10x16x128xi1>
    %85 = vector.broadcast %cst_67 : f32 to vector<10x16x128xf32>
    %86 = arith.select %84, %73, %85 : vector<10x16x128xi1>, vector<10x16x128xf32>
    %cst_68 = arith.constant 0.000000e+00 : bf16
    %87 = vector.broadcast %cst_68 : bf16 to vector<10x1x128xbf16>
    %c0_69 = arith.constant 0 : index
    %c0_70 = arith.constant 0 : index
    %c0_71 = arith.constant 0 : index
    %88 = vector.load %arg11[%c0_69, %c0_70, %c0_71] : memref<10x18x128xbf16, #tpu.memory_space<vmem>>, vector<10x1x128xbf16>
    tpu.vector_store %arg11[%c0_69, %c0_70, %c0_71], %87 {strides = array<i32>} : memref<10x18x128xbf16, #tpu.memory_space<vmem>>, vector<10x1x128xbf16>,
    %c0_72 = arith.constant 0 : index
    %c17 = arith.constant 17 : index
    %c0_73 = arith.constant 0 : index
    %89 = vector.load %arg11[%c0_72, %c17, %c0_73] : memref<10x18x128xbf16, #tpu.memory_space<vmem>>, vector<10x1x128xbf16>
    tpu.vector_store %arg11[%c0_72, %c17, %c0_73], %87 {strides = array<i32>} : memref<10x18x128xbf16, #tpu.memory_space<vmem>>, vector<10x1x128xbf16>,
    %90 = arith.truncf %86 : vector<10x16x128xf32> to vector<10x16x128xbf16>
    %c0_74 = arith.constant 0 : index
    %c1_75 = arith.constant 1 : index
    %c0_76 = arith.constant 0 : index
    %91 = vector.load %arg11[%c0_74, %c1_75, %c0_76] : memref<10x18x128xbf16, #tpu.memory_space<vmem>>, vector<10x16x128xbf16>
    tpu.vector_store %arg11[%c0_74, %c1_75, %c0_76], %90 {strides = array<i32>} : memref<10x18x128xbf16, #tpu.memory_space<vmem>>, vector<10x16x128xbf16>,
    %cst_77 = arith.constant 0.000000e+00 : f32
    %92 = vector.broadcast %cst_77 : f32 to vector<128x128xf32>
    %c0_78 = arith.constant 0 : index
    %c0_79 = arith.constant 0 : index
    %c0_80 = arith.constant 0 : index
    %93 = vector.load %arg11[%c0_78, %c0_79, %c0_80] : memref<10x18x128xbf16, #tpu.memory_space<vmem>>, vector<8x16x128xbf16>
    %94 = vector.shape_cast %93 : vector<8x16x128xbf16> to vector<128x128xbf16>
    %c0_81 = arith.constant 0 : index
    %c0_82 = arith.constant 0 : index
    %c0_83 = arith.constant 0 : index
    %95 = vector.load %arg6[%c0_81, %c0_82, %c0_83] : memref<9x128x128xbf16, #tpu.memory_space<vmem>>, vector<1x128x128xbf16>
    %96 = vector.shape_cast %95 : vector<1x128x128xbf16> to vector<128x128xbf16>
    %cst_84 = arith.constant dense<0.000000e+00> : vector<128x128xf32>
    %97 = tpu.matmul %94, %96, %cst_84 {dimension_numbers = #tpu.dot_dimension_numbers<[1], [0], [0], [1], [0, 0, 1, 1], [], []>} : vector<128x128xbf16>, vector<128x128xbf16>, vector<128x128xf32> -> vector<128x128xf32>
    %98 = arith.addf %92, %97 : vector<128x128xf32>
    %c0_85 = arith.constant 0 : index
    %c1_86 = arith.constant 1 : index
    %c0_87 = arith.constant 0 : index
    %99 = vector.load %arg11[%c0_85, %c1_86, %c0_87] : memref<10x18x128xbf16, #tpu.memory_space<vmem>>, vector<8x16x128xbf16>
    %100 = vector.shape_cast %99 : vector<8x16x128xbf16> to vector<128x128xbf16>
    %c1_88 = arith.constant 1 : index
    %c0_89 = arith.constant 0 : index
    %c0_90 = arith.constant 0 : index
    %101 = vector.load %arg6[%c1_88, %c0_89, %c0_90] : memref<9x128x128xbf16, #tpu.memory_space<vmem>>, vector<1x128x128xbf16>
    %102 = vector.shape_cast %101 : vector<1x128x128xbf16> to vector<128x128xbf16>
    %cst_91 = arith.constant dense<0.000000e+00> : vector<128x128xf32>
    %103 = tpu.matmul %100, %102, %cst_91 {dimension_numbers = #tpu.dot_dimension_numbers<[1], [0], [0], [1], [0, 0, 1, 1], [], []>} : vector<128x128xbf16>, vector<128x128xbf16>, vector<128x128xf32> -> vector<128x128xf32>
    %104 = arith.addf %98, %103 : vector<128x128xf32>
    %c0_92 = arith.constant 0 : index
    %c2_93 = arith.constant 2 : index
    %c0_94 = arith.constant 0 : index
    %105 = vector.load %arg11[%c0_92, %c2_93, %c0_94] : memref<10x18x128xbf16, #tpu.memory_space<vmem>>, vector<8x16x128xbf16>
    %106 = vector.shape_cast %105 : vector<8x16x128xbf16> to vector<128x128xbf16>
    %c2_95 = arith.constant 2 : index
    %c0_96 = arith.constant 0 : index
    %c0_97 = arith.constant 0 : index
    %107 = vector.load %arg6[%c2_95, %c0_96, %c0_97] : memref<9x128x128xbf16, #tpu.memory_space<vmem>>, vector<1x128x128xbf16>
    %108 = vector.shape_cast %107 : vector<1x128x128xbf16> to vector<128x128xbf16>
    %cst_98 = arith.constant dense<0.000000e+00> : vector<128x128xf32>
    %109 = tpu.matmul %106, %108, %cst_98 {dimension_numbers = #tpu.dot_dimension_numbers<[1], [0], [0], [1], [0, 0, 1, 1], [], []>} : vector<128x128xbf16>, vector<128x128xbf16>, vector<128x128xf32> -> vector<128x128xf32>
    %110 = arith.addf %104, %109 : vector<128x128xf32>
    %c1_99 = arith.constant 1 : index
    %c0_100 = arith.constant 0 : index
    %c0_101 = arith.constant 0 : index
    %111 = vector.load %arg11[%c1_99, %c0_100, %c0_101] : memref<10x18x128xbf16, #tpu.memory_space<vmem>>, vector<8x16x128xbf16>
    %112 = vector.shape_cast %111 : vector<8x16x128xbf16> to vector<128x128xbf16>
    %c3_102 = arith.constant 3 : index
    %c0_103 = arith.constant 0 : index
    %c0_104 = arith.constant 0 : index
    %113 = vector.load %arg6[%c3_102, %c0_103, %c0_104] : memref<9x128x128xbf16, #tpu.memory_space<vmem>>, vector<1x128x128xbf16>
    %114 = vector.shape_cast %113 : vector<1x128x128xbf16> to vector<128x128xbf16>
    %cst_105 = arith.constant dense<0.000000e+00> : vector<128x128xf32>
    %115 = tpu.matmul %112, %114, %cst_105 {dimension_numbers = #tpu.dot_dimension_numbers<[1], [0], [0], [1], [0, 0, 1, 1], [], []>} : vector<128x128xbf16>, vector<128x128xbf16>, vector<128x128xf32> -> vector<128x128xf32>
    %116 = arith.addf %110, %115 : vector<128x128xf32>
    %c1_106 = arith.constant 1 : index
    %c1_107 = arith.constant 1 : index
    %c0_108 = arith.constant 0 : index
    %117 = vector.load %arg11[%c1_106, %c1_107, %c0_108] : memref<10x18x128xbf16, #tpu.memory_space<vmem>>, vector<8x16x128xbf16>
    %118 = vector.shape_cast %117 : vector<8x16x128xbf16> to vector<128x128xbf16>
    %c4_109 = arith.constant 4 : index
    %c0_110 = arith.constant 0 : index
    %c0_111 = arith.constant 0 : index
    %119 = vector.load %arg6[%c4_109, %c0_110, %c0_111] : memref<9x128x128xbf16, #tpu.memory_space<vmem>>, vector<1x128x128xbf16>
    %120 = vector.shape_cast %119 : vector<1x128x128xbf16> to vector<128x128xbf16>
    %cst_112 = arith.constant dense<0.000000e+00> : vector<128x128xf32>
    %121 = tpu.matmul %118, %120, %cst_112 {dimension_numbers = #tpu.dot_dimension_numbers<[1], [0], [0], [1], [0, 0, 1, 1], [], []>} : vector<128x128xbf16>, vector<128x128xbf16>, vector<128x128xf32> -> vector<128x128xf32>
    %122 = arith.addf %116, %121 : vector<128x128xf32>
    %c1_113 = arith.constant 1 : index
    %c2_114 = arith.constant 2 : index
    %c0_115 = arith.constant 0 : index
    %123 = vector.load %arg11[%c1_113, %c2_114, %c0_115] : memref<10x18x128xbf16, #tpu.memory_space<vmem>>, vector<8x16x128xbf16>
    %124 = vector.shape_cast %123 : vector<8x16x128xbf16> to vector<128x128xbf16>
    %c5_116 = arith.constant 5 : index
    %c0_117 = arith.constant 0 : index
    %c0_118 = arith.constant 0 : index
    %125 = vector.load %arg6[%c5_116, %c0_117, %c0_118] : memref<9x128x128xbf16, #tpu.memory_space<vmem>>, vector<1x128x128xbf16>
    %126 = vector.shape_cast %125 : vector<1x128x128xbf16> to vector<128x128xbf16>
    %cst_119 = arith.constant dense<0.000000e+00> : vector<128x128xf32>
    %127 = tpu.matmul %124, %126, %cst_119 {dimension_numbers = #tpu.dot_dimension_numbers<[1], [0], [0], [1], [0, 0, 1, 1], [], []>} : vector<128x128xbf16>, vector<128x128xbf16>, vector<128x128xf32> -> vector<128x128xf32>
    %128 = arith.addf %122, %127 : vector<128x128xf32>
    %c2_120 = arith.constant 2 : index
    %c0_121 = arith.constant 0 : index
    %c0_122 = arith.constant 0 : index
    %129 = vector.load %arg11[%c2_120, %c0_121, %c0_122] : memref<10x18x128xbf16, #tpu.memory_space<vmem>>, vector<8x16x128xbf16>
    %130 = vector.shape_cast %129 : vector<8x16x128xbf16> to vector<128x128xbf16>
    %c6_123 = arith.constant 6 : index
    %c0_124 = arith.constant 0 : index
    %c0_125 = arith.constant 0 : index
    %131 = vector.load %arg6[%c6_123, %c0_124, %c0_125] : memref<9x128x128xbf16, #tpu.memory_space<vmem>>, vector<1x128x128xbf16>
    %132 = vector.shape_cast %131 : vector<1x128x128xbf16> to vector<128x128xbf16>
    %cst_126 = arith.constant dense<0.000000e+00> : vector<128x128xf32>
    %133 = tpu.matmul %130, %132, %cst_126 {dimension_numbers = #tpu.dot_dimension_numbers<[1], [0], [0], [1], [0, 0, 1, 1], [], []>} : vector<128x128xbf16>, vector<128x128xbf16>, vector<128x128xf32> -> vector<128x128xf32>
    %134 = arith.addf %128, %133 : vector<128x128xf32>
    %c2_127 = arith.constant 2 : index
    %c1_128 = arith.constant 1 : index
    %c0_129 = arith.constant 0 : index
    %135 = vector.load %arg11[%c2_127, %c1_128, %c0_129] : memref<10x18x128xbf16, #tpu.memory_space<vmem>>, vector<8x16x128xbf16>
    %136 = vector.shape_cast %135 : vector<8x16x128xbf16> to vector<128x128xbf16>
    %c7_130 = arith.constant 7 : index
    %c0_131 = arith.constant 0 : index
    %c0_132 = arith.constant 0 : index
    %137 = vector.load %arg6[%c7_130, %c0_131, %c0_132] : memref<9x128x128xbf16, #tpu.memory_space<vmem>>, vector<1x128x128xbf16>
    %138 = vector.shape_cast %137 : vector<1x128x128xbf16> to vector<128x128xbf16>
    %cst_133 = arith.constant dense<0.000000e+00> : vector<128x128xf32>
    %139 = tpu.matmul %136, %138, %cst_133 {dimension_numbers = #tpu.dot_dimension_numbers<[1], [0], [0], [1], [0, 0, 1, 1], [], []>} : vector<128x128xbf16>, vector<128x128xbf16>, vector<128x128xf32> -> vector<128x128xf32>
    %140 = arith.addf %134, %139 : vector<128x128xf32>
    %c2_134 = arith.constant 2 : index
    %c2_135 = arith.constant 2 : index
    %c0_136 = arith.constant 0 : index
    %141 = vector.load %arg11[%c2_134, %c2_135, %c0_136] : memref<10x18x128xbf16, #tpu.memory_space<vmem>>, vector<8x16x128xbf16>
    %142 = vector.shape_cast %141 : vector<8x16x128xbf16> to vector<128x128xbf16>
    %c8_137 = arith.constant 8 : index
    %c0_138 = arith.constant 0 : index
    %c0_139 = arith.constant 0 : index
    %143 = vector.load %arg6[%c8_137, %c0_138, %c0_139] : memref<9x128x128xbf16, #tpu.memory_space<vmem>>, vector<1x128x128xbf16>
    %144 = vector.shape_cast %143 : vector<1x128x128xbf16> to vector<128x128xbf16>
    %cst_140 = arith.constant dense<0.000000e+00> : vector<128x128xf32>
    %145 = tpu.matmul %142, %144, %cst_140 {dimension_numbers = #tpu.dot_dimension_numbers<[1], [0], [0], [1], [0, 0, 1, 1], [], []>} : vector<128x128xbf16>, vector<128x128xbf16>, vector<128x128xf32> -> vector<128x128xf32>
    %146 = arith.addf %140, %145 : vector<128x128xf32>
    %c0_141 = arith.constant 0 : index
    %147 = arith.index_cast %1 : i32 to index
    %c0_142 = arith.constant 0 : index
    %c0_143 = arith.constant 0 : index
    %148 = vector.load %arg2[%c0_141, %147, %c0_142, %c0_143] : memref<1x16x16x4xf32, #tpu.memory_space<vmem>>, vector<1x8x16x4xf32>
    %149 = vector.shape_cast %148 : vector<1x8x16x4xf32> to vector<8x16x4xf32>
    %150 = vector.shape_cast %149 : vector<8x16x4xf32> to vector<128x4xf32>
    %151 = vector.extract_strided_slice %146 {offsets = [0, 0], sizes = [128, 4], strides = [1, 1]} : vector<128x128xf32> to vector<128x4xf32>
    %c0_144 = arith.constant 0 : index
    %c0_145 = arith.constant 0 : index
    %152 = vector.load %arg7[%c0_144, %c0_145] : memref<1x4xf32, #tpu.memory_space<vmem>>, vector<1x4xf32>
    %153 = vector.broadcast %152 : vector<1x4xf32> to vector<128x4xf32>
    %154 = arith.mulf %151, %153 : vector<128x4xf32>
    %c0_146 = arith.constant 0 : index
    %c0_147 = arith.constant 0 : index
    %155 = vector.load %arg8[%c0_146, %c0_147] : memref<1x4xf32, #tpu.memory_space<vmem>>, vector<1x4xf32>
    %156 = vector.broadcast %155 : vector<1x4xf32> to vector<128x4xf32>
    %157 = arith.addf %154, %156 : vector<128x4xf32>
    %158 = arith.addf %157, %150 : vector<128x4xf32>
    %159 = vector.shape_cast %158 : vector<128x4xf32> to vector<1x8x16x4xf32>
    %c0_148 = arith.constant 0 : index
    %c0_149 = arith.constant 0 : index
    %c0_150 = arith.constant 0 : index
    %c0_151 = arith.constant 0 : index
    %160 = vector.load %arg9[%c0_148, %c0_149, %c0_150, %c0_151] : memref<1x8x16x4xf32, #tpu.memory_space<vmem>>, vector<1x8x16x4xf32>
    tpu.vector_store %arg9[%c0_148, %c0_149, %c0_150, %c0_151], %159 {strides = array<i32>} : memref<1x8x16x4xf32, #tpu.memory_space<vmem>>, vector<1x8x16x4xf32>,
    return
  }
  func.func @transform_0(%arg0: i32, %arg1: i32) -> (i32, i32, i32, i32) {
    %c0_i32 = arith.constant 0 : i32
    %c0_i32_0 = arith.constant 0 : i32
    %c0_i32_1 = arith.constant 0 : i32
    %c0_i32_2 = arith.constant 0 : i32
    return %arg0, %c0_i32, %c0_i32_0, %c0_i32_1 : i32, i32, i32, i32
  }
  func.func @transform_1(%arg0: i32, %arg1: i32) -> (i32, i32, i32) {
    %c0_i32 = arith.constant 0 : i32
    %c0_i32_0 = arith.constant 0 : i32
    %c0_i32_1 = arith.constant 0 : i32
    %c0_i32_2 = arith.constant 0 : i32
    return %c0_i32, %c0_i32_0, %c0_i32_1 : i32, i32, i32
  }
  func.func @transform_2(%arg0: i32, %arg1: i32) -> (i32, i32) {
    %c0_i32 = arith.constant 0 : i32
    %c0_i32_0 = arith.constant 0 : i32
    %c0_i32_1 = arith.constant 0 : i32
    return %c0_i32, %c0_i32_0 : i32, i32
  }
  func.func @transform_3(%arg0: i32, %arg1: i32) -> (i32, i32) {
    %c0_i32 = arith.constant 0 : i32
    %c0_i32_0 = arith.constant 0 : i32
    %c0_i32_1 = arith.constant 0 : i32
    return %c0_i32, %c0_i32_0 : i32, i32
  }
  func.func @transform_4(%arg0: i32, %arg1: i32) -> (i32, i32, i32) {
    %c0_i32 = arith.constant 0 : i32
    %c0_i32_0 = arith.constant 0 : i32
    %c0_i32_1 = arith.constant 0 : i32
    %c0_i32_2 = arith.constant 0 : i32
    return %c0_i32, %c0_i32_0, %c0_i32_1 : i32, i32, i32
  }
  func.func @transform_5(%arg0: i32, %arg1: i32) -> (i32, i32) {
    %c0_i32 = arith.constant 0 : i32
    %c0_i32_0 = arith.constant 0 : i32
    %c0_i32_1 = arith.constant 0 : i32
    return %c0_i32, %c0_i32_0 : i32, i32
  }
  func.func @transform_6(%arg0: i32, %arg1: i32) -> (i32, i32) {
    %c0_i32 = arith.constant 0 : i32
    %c0_i32_0 = arith.constant 0 : i32
    %c0_i32_1 = arith.constant 0 : i32
    return %c0_i32, %c0_i32_0 : i32, i32
  }
  func.func @transform_7(%arg0: i32, %arg1: i32) -> (i32, i32, i32, i32) {
    %c0_i32 = arith.constant 0 : i32
    %c0_i32_0 = arith.constant 0 : i32
    %c0_i32_1 = arith.constant 0 : i32
    return %arg0, %arg1, %c0_i32, %c0_i32_0 : i32, i32, i32, i32
  }
}

</mosaic_0001>

<bundles_post_ra>
// kernel: tpu_custom_call.1
= control target key start
LH: loop header
LB: loop body
LE: loop exit
PB: predicated region body
PF: predicated region fallthrough
CT: control target
= control target key end

     0   :  { %12 = vsyncpa [#allocation5], 0  ;;  %s10262_s24 = smov 0   ;;  %s10264_s25 = smov 0   ;;  %s12792_s0 = inlined_call_operand.vmem [shape: f32[2,16,16,4], index: 0, kind: input, shape index: {}]   ;;  %s12793_s1 = inlined_call_operand.vmem [shape: bf16[9,128,128], index: 1, kind: input, shape index: {}]   ;;  %s12794_s2 = inlined_call_operand.vmem [shape: f32[1,128], index: 2, kind: input, shape index: {}]   ;;  %s12795_s3 = inlined_call_operand.vmem [shape: f32[1,128], index: 3, kind: input, shape index: {}]   ;;  %s12796_s4 = inlined_call_operand.hbm [shape: bf16[9,128,128], index: 4, kind: input, shape index: {}]   ;;  %s12797_s5 = inlined_call_operand.vmem [shape: f32[1,4], index: 5, kind: input, shape index: {}]   ;;  %s12798_s6 = inlined_call_operand.vmem [shape: f32[1,4], index: 6, kind: input, shape index: {}]   ;;  %s12799_s7 = inlined_call_operand.vmem [shape: f32[2,16,16,4], index: 7, kind: output, shape index: {}]  }
   0x1   :  { %s10266_s26 = smov 0   ;;  %s10268_s27 = smov 0  }
   0x2   :  { %s10270_s28 = smov 0  }
   0x3 LB: > { %s8068_s29 = sadd.s32 4294967295, %s10216_s28   ;;  %s27_s30 = sadd.s32 1, %s10208_s26  ;;  %s10216_s28 = sphi %s10270_s28, %s18_s28   ;;  %s10212_s27 = sphi %s10268_s27, %s12913_s27   ;;  %s10208_s26 = sphi %s10266_s26, %s12912_s26   ;;  %s10204_s25 = sphi %s10264_s25, %s12911_s25   ;;  %s10200_s24 = sphi %s10262_s24, %s12910_s24  }
   0x4   : > { %p28_p0 = scmp.ge.s32.totalorder %s27_s30, 2  ;;  %s30_s8 = sadd.s32 1, %s10212_s27 }
   0x5   : > { %p8070_p1 = scmp.ge.s32.totalorder %s10216_s28, 1  ;;  %p215_p2 = scmp.lt.s32.totalorder %s10216_s28, 5 }
   0x6   : > { %s12915_s30 = smov (%p28_p0, %s27_s30), 0  ;;  %s12917_s8 = smov (!%p28_p0, %s30_s8), %s10212_s27 }
   0x7   : > { %p10295_p3 = pnand %p8070_p1, %p215_p2  ;;  %p32_p4 = scmp.ge.s32.totalorder %s12917_s8, 2 }
   0x8   : > { %p10299_p5 = scmp.eq.s32.totalorder %s8068_s29, 0  ;;  %s10218_s11 = smov [#allocation4]  }
   0x9   : > { %s12811_s9 = scalar_select %p10295_p3, 1, 0 }
   0xa   : > { %s12812_s10 = scalar_select %p10299_p5, 1, 0 }
   0xb   : > { %p9874_p6 = pneg %p10295_p3  ;;  %s12919_s8 = smov (%p32_p4, %s12917_s8), 0 }
   0xc   : > { %s236_s12 = sshll.u32 %s10218_s11, 4  ;;  %s10146_s16 = scalar_lea.hbm %s12796_s4, 9216  ;;  %s237_s12 = int_to_ptr.vmem [resolvable:$true] %s236_s12 }
   0xd   : > { %p10309_p7 = pnand %p10299_p5, %p9874_p6  ;;  %p10147_p8 = scmp.ne.s32.totalorder %s12796_s4, %s10146_s16 }
   0xe   : > { %p10153_p12 = scmp.lt.u32.totalorder %s10146_s16, %s12796_s4 }
   0xf   : > { %p10148_p9 = pneg %p10309_p7 }
  0x11   : > { %p10149_p10 = pnand %p10148_p9, %p10147_p8 }
  0x13   : > { %p10150_p11 = pneg %p10149_p10 }
  0x15   : > { %p10155_p13 = pnand %p10153_p12, %p10150_p11 }
  0x17   : > { %10158 = shalt.err (!%p10155_p13)
}
  0x18   : > { %s10159_s21 = scalar_lea.vmem %s237_s12, 9216  ;;  %p10167_p4 = scmp.lt.s32.totalorder %s237_s12, %s237_s12 }
  0x19   : > { %p10160_p0 = scmp.ne.s32.totalorder %s237_s12, %s10159_s21  ;;  %p10168_p6 = scmp.lt.s32.totalorder %s10159_s21, %s10159_s21 }
  0x1b   : > { %p10162_p1 = pnand %p10160_p0, %p10148_p9  ;;  %p10169_p5 = por %p10168_p6, %p10167_p4 }
  0x1d   : > { %p10163_p2 = pneg %p10162_p1 }
  0x1f   : > { %p10170_p3 = pnand %p10169_p5, %p10163_p2 }
  0x21   : > { %10173 = shalt.err (!%p10170_p3)
}
  0x22   : > { %s10219_s22 = smov 64   ;;  %s10220_s23 = smov 4  }
  0x23   : > { %9877 = dma.hbm_to_vmem [thread:$0]  (!%p10309_p7), %s12796_s4, 9216, %s237_s12, [#allocation5], %s10219_s22, %s10219_s22, %s10220_s23  }
  0x24   : > { %p12814_p8 = scmp.ne.s32.totalorder %s12811_s9, 0 }
  0x26   : > { %266 = sbr.rel (%p12814_p8) target bundleno = 1276 (0x4fc), region = 48 }
  0x2d   : > { %p12815_p10 = scmp.ne.s32.totalorder %s12812_s10, 0 }
  0x2f   : > { %10195 = dma.done.wait (%p12815_p10), [#allocation5], 9216  }
  0x30   : > { %10197 = vsyncadd (%p12815_p10), [#allocation5], 4294958080  ;;  %p303_p3 = scmp.lt.s32.totalorder %s10204_s25, 1  ;;  %s10337_s14 = sshll.u32 %s10200_s24, 3  ;;  %v10221_v0 = vmov 0  }
  0x31   : > { %p311_p5 = scmp.lt.s32.totalorder %s10337_s14, 15  ;;  %321 = vst [vmem:[#allocation2] sm:$0xf] %v10221_v0  ;;  %322 = vst [vmem:[#allocation2 + $0x4] sm:$0xf] %v10221_v0  ;;  %p8082_p7 = scmp.ne.s32.totalorder %s10200_s24, 0 }
  0x32   : > { %323 = vst [vmem:[#allocation2 + $0x8] sm:$0x1] %v10221_v0  ;;  %324 = vst [vmem:[#allocation2 + $0xc] sm:$0xf] %v10221_v0  ;;  %s12921_s25 = smov (!%p303_p3, %s10204_s25), 1  ;;  %vm391_vm0 = vcmask (!%p8082_p7), 31744  }
  0x33   : > { %325 = vst [vmem:[#allocation2 + $0x10] sm:$0xf] %v10221_v0  ;;  %326 = vst [vmem:[#allocation2 + $0x14] sm:$0x1] %v10221_v0  ;;  %s312_s9 = scalar_select %p311_p5, %s10337_s14, 15 }
  0x34   : > { %327 = vst [vmem:[#allocation2 + $0x18] sm:$0xf] %v10221_v0  ;;  %328 = vst [vmem:[#allocation2 + $0x1c] sm:$0xf] %v10221_v0  ;;  %s8642_s10 = sshll.u32 %s12921_s25, 8  ;;  %s8079_s12 = sshll.u32 %s12921_s25, 5 }
  0x35   : > { %329 = vst [vmem:[#allocation2 + $0x20] sm:$0x1] %v10221_v0  ;;  %330 = vst [vmem:[#allocation2 + $0x24] sm:$0xf] %v10221_v0  ;;  %s10349_s16 = scalar_lea.vmem %s12792_s0, %s8642_s10  ;;  %s8078_s17 = sshll.u32 %s312_s9, 1  ;;  %vm667_vm1 = vcmask (!%p8082_p7), 1043456  }
  0x36   : > { %331 = vst [vmem:[#allocation2 + $0x28] sm:$0xf] %v10221_v0  ;;  %332 = vst [vmem:[#allocation2 + $0x2c] sm:$0x1] %v10221_v0  ;;  %s315_s18 = sadd.s32 %s8079_s12, %s8078_s17  ;;  %v361_v1 = vld [vmem:[%s10349_s16] sm:$0xff] (!%p8082_p7)  ;;  %v362_v2 = vld [vmem:[%s10349_s16 + $0x8] sm:$0xff] (!%p8082_p7) }
  0x37   : > { %333 = vst [vmem:[#allocation2 + $0x30] sm:$0xf] %v10221_v0  ;;  %334 = vst [vmem:[#allocation2 + $0x34] sm:$0xf] %v10221_v0  ;;  %s8080_s19 = sshll.u32 %s315_s18, 3  ;;  %v381_v3 = vpack.c.bf16 (!%p8082_p7), %v362_v2, %v361_v1  ;;  %v363_v4 = vld [vmem:[%s10349_s16 + $0x10] sm:$0xff] (!%p8082_p7) }
  0x38   : > { %335 = vst [vmem:[#allocation2 + $0x38] sm:$0x1] %v10221_v0  ;;  %336 = vst [vmem:[#allocation2 + $0x3c] sm:$0xf] %v10221_v0  ;;  %s10354_s22 = scalar_lea.vmem %s12799_s7, %s8080_s19  ;;  %v364_v6 = vld [vmem:[%s10349_s16 + $0x18] sm:$0xff] (!%p8082_p7)  ;;  %v365_v10 = vld [vmem:[%s10349_s16 + $0x20] sm:$0xff] (!%p8082_p7) }
  0x39   : > { %337 = vst [vmem:[#allocation2 + $0x40] sm:$0xf] %v10221_v0  ;;  %338 = vst [vmem:[#allocation2 + $0x44] sm:$0x1] %v10221_v0  ;;  %v394_v5 = vsel (!%p8082_p7), %vm391_vm0, %v381_v3, 0  ;;  %v382_v9 = vpack.c.bf16 (!%p8082_p7), %v364_v6, %v363_v4  ;;  %v366_v11 = vld [vmem:[%s10349_s16 + $0x28] sm:$0xff] (!%p8082_p7) }
  0x3a   : > { %339 = vst [vmem:[#allocation2 + $0x48] sm:$0xf] %v10221_v0  ;;  %340 = vst [vmem:[#allocation2 + $0x4c] sm:$0xf] %v10221_v0  ;;  %v8083_v7 = vcombine.low (!%p8082_p7), %v394_v5, %v394_v5  ;;  %vm668_vm2 = vsmask.f32 (!%p8082_p7), 7938  ;;  %v8084_v8 = vcombine.high (!%p8082_p7), %v394_v5, %v394_v5  ;;  %v383_v12 = vpack.c.bf16 (!%p8082_p7), %v366_v11, %v365_v10 }
  0x3b   : > { %341 = vst [vmem:[#allocation2 + $0x50] sm:$0x1] %v10221_v0  ;;  %342 = vst [vmem:[#allocation2 + $0x54] sm:$0xf] %v10221_v0  ;;  %vm463_vm3 = vsmask.f32 (!%p8082_p7), 256 }
  0x3c   : > { %343 = vst [vmem:[#allocation2 + $0x58] sm:$0xf] %v10221_v0  ;;  %344 = vst [vmem:[#allocation2 + $0x5c] sm:$0x1] %v10221_v0  ;;  %360 = sbr.rel (%p8082_p7) target bundleno = 111 (0x6f), region = 56  ;;  %vm674_vm5 = vcmask (!%p8082_p7), 1040384  }
  0x3d   : > { %345 = vst [vmem:[#allocation2 + $0x60] sm:$0xf] %v10221_v0  ;;  %346 = vst [vmem:[#allocation2 + $0x64] sm:$0xf] %v10221_v0  ;;  %vm464_vm4 = vsmask.f32 (!%p8082_p7), 4368 }
  0x3e   : > { %347 = vst [vmem:[#allocation2 + $0x68] sm:$0x1] %v10221_v0  ;;  %348 = vst [vmem:[#allocation2 + $0x6c] sm:$0xf] %v10221_v0  ;;  %v367_v13 = vld [vmem:[%s10349_s16 + $0x30] sm:$0xff] (!%p8082_p7)  ;;  %v467_v14 = vshrl.u32 (!%p8082_p7), %v8083_v7, 16 }
  0x3f   : > { %349 = vst [vmem:[#allocation2 + $0x70] sm:$0xf] %v10221_v0  ;;  %350 = vst [vmem:[#allocation2 + $0x74] sm:$0x1] %v10221_v0  ;;  %v470_v15 = vshll.u32 (!%p8082_p7), %v8083_v7, 16  ;;  %v475_v16 = vshrl.u32 (!%p8082_p7), %v8084_v8, 16 }
  0x40   : > { %351 = vst [vmem:[#allocation2 + $0x78] sm:$0xf] %v10221_v0  ;;  %352 = vst [vmem:[#allocation2 + $0x7c] sm:$0xf] %v10221_v0  ;;  %v478_v17 = vshll.u32 (!%p8082_p7), %v8084_v8, 16  ;;  %v368_v18 = vld [vmem:[%s10349_s16 + $0x38] sm:$0xff] (!%p8082_p7) }
  0x41   : > { %353 = vst [vmem:[#allocation2 + $0x80] sm:$0x1] %v10221_v0  ;;  %354 = vst [vmem:[#allocation2 + $0x84] sm:$0xf] %v10221_v0  ;;  %v10367_v19 = vld [vmem:[%s10349_s16 + $0x40] sm:$0xff] (!%p8082_p7)  ;;  %v396_v21 = vsel (!%p8082_p7), %vm391_vm0, %v382_v9, 0  ;;  %v384_v23 = vpack.c.bf16 (!%p8082_p7), %v368_v18, %v367_v13 }
  0x42   : > { %355 = vst [vmem:[#allocation2 + $0x88] sm:$0xf] %v10221_v0  ;;  %356 = vst [vmem:[#allocation2 + $0x8c] sm:$0x1] %v10221_v0  ;;  %v398_v22 = vsel (!%p8082_p7), %vm391_vm0, %v383_v12, 0  ;;  %v469_v24 = vrot.slane (!%p8082_p7), %v467_v14, 7  ;;  %v8085_v27 = vcombine.low (!%p8082_p7), %v396_v21, %v396_v21  ;;  %v8086_v28 = vcombine.high (!%p8082_p7), %v396_v21, %v396_v21 }
  0x43   : > { %vm10371_vm6 = vmand %vm667_vm1, %vm668_vm2  ;;  %v477_v26 = vrot.slane %v475_v16, 7  ;;  %v370_v29 = vld [vmem:[%s10349_s16 + $0x48] sm:$0xff]  ;;  %v670_v30 = vld [vmem:[#allocation2 + $0x18] sm:$0xf]  ;;  %v8087_v33 = vcombine.low %v398_v22, %v398_v22  ;;  %v8088_v34 = vcombine.high %v398_v22, %v398_v22  ;;  %v400_v35 = vsel %vm391_vm0, %v384_v23, 0 }
  0x44   : > { %vm10379_vm7 = vmor %vm463_vm3, %vm464_vm4  ;;  %v676_v32 = vld [vmem:[#allocation2 + $0x20] sm:$0x1]  ;;  %v385_v36 = vpack.c.bf16 %v370_v29, %v10367_v19  ;;  %v472_v37 = vor.u32 %v470_v15, %v469_v24  ;;  %v473_v38 = vrot.slane %v469_v24, 4  ;;  %v484_v41 = vshrl.u32 %v8085_v27, 16  ;;  %v679_v53 = vld [vmem:[#allocation2 + $0x24] sm:$0xf] }
  0x45   : > { %vm10386_vm8 = vmand %vm674_vm5, %vm463_vm3  ;;  %v480_v39 = vor.u32 %v478_v17, %v477_v26  ;;  %v482_v40 = vrot.slane %v477_v26, 4  ;;  %v487_v42 = vshll.u32 %v8085_v27, 16  ;;  %v492_v43 = vshrl.u32 %v8086_v28, 16  ;;  %v683_v54 = vld [vmem:[#allocation2 + $0x2c] sm:$0x1]  ;;  %v371_v4 = vld [vmem:[%s10349_s16 + $0x50] sm:$0xff] }
  0x46   : > { %v495_v44 = vshll.u32 %v8086_v28, 16  ;;  %v671_v45 = vsel %vm10371_vm6, %v472_v37, %v670_v30  ;;  %v501_v48 = vshrl.u32 %v8087_v33, 16  ;;  %v486_v49 = vrot.slane %v484_v41, 7  ;;  %v686_v63 = vld [vmem:[#allocation2 + $0x30] sm:$0xf]  ;;  %v372_v5 = vld [vmem:[%s10349_s16 + $0x58] sm:$0xff] }
  0x47   : > { %v481_v46 = vsel %vm10379_vm7, %v473_v38, %v480_v39  ;;  %v677_v47 = vsel %vm10386_vm8, %v482_v40, %v676_v32  ;;  %672 = vst [vmem:[#allocation2 + $0x18] sm:$0xf] %v671_v45  ;;  %v494_v50 = vrot.slane %v492_v43, 7  ;;  %v504_v51 = vshll.u32 %v8087_v33, 16  ;;  %v690_v9 = vld [vmem:[#allocation2 + $0x38] sm:$0x1] }
  0x48   : > { %673 = vst [vmem:[#allocation2 + $0x1c] sm:$0xf] %v481_v46  ;;  %678 = vst [vmem:[#allocation2 + $0x20] sm:$0x1] %v677_v47  ;;  %v509_v52 = vshrl.u32 %v8088_v34, 16  ;;  %v503_v55 = vrot.slane %v501_v48, 7  ;;  %v8089_v57 = vcombine.low %v400_v35, %v400_v35  ;;  %v8090_v58 = vcombine.high %v400_v35, %v400_v35 }
  0x49   : > { %v512_v56 = vshll.u32 %v8088_v34, 16  ;;  %v489_v59 = vor.u32 %v487_v42, %v486_v49  ;;  %v490_v60 = vrot.slane %v486_v49, 4  ;;  %v497_v61 = vor.u32 %v495_v44, %v494_v50  ;;  %v693_v15 = vld [vmem:[#allocation2 + $0x3c] sm:$0xf]  ;;  %v373_v21 = vld [vmem:[%s10349_s16 + $0x60] sm:$0xff]  ;;  %v374_v22 = vld [vmem:[%s10349_s16 + $0x68] sm:$0xff] }
  0x4a   : > { %v499_v62 = vrot.slane %v494_v50, 4  ;;  %v506_v0 = vor.u32 %v504_v51, %v503_v55  ;;  %v507_v1 = vrot.slane %v503_v55, 4  ;;  %v511_v2 = vrot.slane %v509_v52, 7  ;;  %v697_v34 = vld [vmem:[#allocation2 + $0x44] sm:$0x1] }
  0x4b   : > { %v518_v3 = vshrl.u32 %v8089_v57, 16  ;;  %v680_v6 = vsel %vm10371_vm6, %v489_v59, %v679_v53  ;;  %v498_v7 = vsel %vm10379_vm7, %v490_v60, %v497_v61  ;;  %v521_v10 = vshll.u32 %v8089_v57, 16  ;;  %v700_v49 = vld [vmem:[#allocation2 + $0x48] sm:$0xf]  ;;  %v704_v52 = vld [vmem:[#allocation2 + $0x50] sm:$0x1] }
  0x4c   : > { %v684_v8 = vsel %vm10386_vm8, %v499_v62, %v683_v54  ;;  %681 = vst [vmem:[#allocation2 + $0x24] sm:$0xf] %v680_v6  ;;  %682 = vst [vmem:[#allocation2 + $0x28] sm:$0xf] %v498_v7  ;;  %v687_v11 = vsel %vm10371_vm6, %v506_v0, %v686_v63  ;;  %v514_v12 = vor.u32 %v512_v56, %v511_v2  ;;  %v516_v13 = vrot.slane %v511_v2, 4  ;;  %v375_v2 = vld [vmem:[%s10349_s16 + $0x70] sm:$0xff] }
  0x4d   : > { %685 = vst [vmem:[#allocation2 + $0x2c] sm:$0x1] %v684_v8  ;;  %v520_v14 = vrot.slane %v518_v3, 7  ;;  %688 = vst [vmem:[#allocation2 + $0x30] sm:$0xf] %v687_v11  ;;  %v526_v16 = vshrl.u32 %v8090_v58, 16  ;;  %v386_v19 = vpack.c.bf16 %v372_v5, %v371_v4  ;;  %v387_v37 = vpack.c.bf16 %v374_v22, %v373_v21 }
  0x4e   : > { %v529_v17 = vshll.u32 %v8090_v58, 16  ;;  %v402_v18 = vsel %vm391_vm0, %v385_v36, 0  ;;  %v515_v23 = vsel %vm10379_vm7, %v507_v1, %v514_v12  ;;  %v691_v24 = vsel %vm10386_vm8, %v516_v13, %v690_v9  ;;  %v707_v58 = vld [vmem:[#allocation2 + $0x54] sm:$0xf]  ;;  %v711_v60 = vld [vmem:[#allocation2 + $0x5c] sm:$0x1] }
  0x4f   : > { %v523_v26 = vor.u32 %v521_v10, %v520_v14  ;;  %v524_v27 = vrot.slane %v520_v14, 4  ;;  %689 = vst [vmem:[#allocation2 + $0x34] sm:$0xf] %v515_v23  ;;  %692 = vst [vmem:[#allocation2 + $0x38] sm:$0x1] %v691_v24  ;;  %v528_v28 = vrot.slane %v526_v16, 7  ;;  %v8091_v29 = vcombine.low %v402_v18, %v402_v18 }
  0x50   : > { %v8092_v30 = vcombine.high %v402_v18, %v402_v18  ;;  %v404_v32 = vsel %vm391_vm0, %v386_v19, 0  ;;  %v406_v55 = vsel %vm391_vm0, %v387_v37, 0  ;;  %v376_v3 = vld [vmem:[%s10349_s16 + $0x78] sm:$0xff]  ;;  %v377_v4 = vld [vmem:[%s10349_s16 + $0x80] sm:$0xff]  ;;  %v378_v9 = vld [vmem:[%s10349_s16 + $0x88] sm:$0xff] }
  0x51   : > { %v694_v33 = vsel %vm10371_vm6, %v523_v26, %v693_v15  ;;  %v8093_v35 = vcombine.low %v404_v32, %v404_v32  ;;  %v8094_v36 = vcombine.high %v404_v32, %v404_v32  ;;  %v531_v38 = vor.u32 %v529_v17, %v528_v28  ;;  %v379_v10 = vld [vmem:[%s10349_s16 + $0x90] sm:$0xff]  ;;  %v380_v11 = vld [vmem:[%s10349_s16 + $0x98] sm:$0xff]  ;;  %v714_v21 = vld [vmem:[#allocation2 + $0x60] sm:$0xf] }
  0x52   : > { %695 = vst [vmem:[#allocation2 + $0x3c] sm:$0xf] %v694_v33  ;;  %v533_v39 = vrot.slane %v528_v28, 4  ;;  %v535_v40 = vshrl.u32 %v8091_v29, 16  ;;  %v538_v41 = vshll.u32 %v8091_v29, 16  ;;  %v543_v42 = vshrl.u32 %v8092_v30, 16 }
  0x53   : > { %v546_v43 = vshll.u32 %v8092_v30, 16  ;;  %v552_v44 = vshrl.u32 %v8093_v35, 16  ;;  %v555_v45 = vshll.u32 %v8093_v35, 16  ;;  %v532_v46 = vsel %vm10379_vm7, %v524_v27, %v531_v38  ;;  %v718_v38 = vld [vmem:[#allocation2 + $0x68] sm:$0x1] }
  0x54   : > { %v698_v47 = vsel %vm10386_vm8, %v533_v39, %v697_v34  ;;  %v537_v48 = vrot.slane %v535_v40, 7  ;;  %v560_v50 = vshrl.u32 %v8094_v36, 16  ;;  %696 = vst [vmem:[#allocation2 + $0x40] sm:$0xf] %v532_v46  ;;  %v545_v51 = vrot.slane %v543_v42, 7 }
  0x55   : > { %699 = vst [vmem:[#allocation2 + $0x44] sm:$0x1] %v698_v47  ;;  %v554_v53 = vrot.slane %v552_v44, 7  ;;  %v563_v54 = vshll.u32 %v8094_v36, 16  ;;  %v8095_v61 = vcombine.low %v406_v55, %v406_v55  ;;  %v8096_v19 = vcombine.high %v406_v55, %v406_v55 }
  0x56   : > { %v540_v56 = vor.u32 %v538_v41, %v537_v48  ;;  %v541_v57 = vrot.slane %v537_v48, 4  ;;  %v562_v59 = vrot.slane %v560_v50, 7  ;;  %v548_v62 = vor.u32 %v546_v43, %v545_v51 }
  0x57   : > { %v550_v63 = vrot.slane %v545_v51, 4  ;;  %v557_v0 = vor.u32 %v555_v45, %v554_v53  ;;  %v558_v1 = vrot.slane %v554_v53, 4  ;;  %v569_v8 = vshrl.u32 %v8095_v61, 16 }
  0x58   : > { %v701_v5 = vsel %vm10371_vm6, %v540_v56, %v700_v49  ;;  %v565_v6 = vor.u32 %v563_v54, %v562_v59  ;;  %v567_v7 = vrot.slane %v562_v59, 4  ;;  %v549_v12 = vsel %vm10379_vm7, %v541_v57, %v548_v62  ;;  %v721_v54 = vld [vmem:[#allocation2 + $0x6c] sm:$0xf]  ;;  %v725_v57 = vld [vmem:[#allocation2 + $0x74] sm:$0x1] }
  0x59   : > { %702 = vst [vmem:[#allocation2 + $0x48] sm:$0xf] %v701_v5  ;;  %v705_v13 = vsel %vm10386_vm8, %v550_v63, %v704_v52  ;;  %v708_v14 = vsel %vm10371_vm6, %v557_v0, %v707_v58  ;;  %v572_v15 = vshll.u32 %v8095_v61, 16  ;;  %703 = vst [vmem:[#allocation2 + $0x4c] sm:$0xf] %v549_v12  ;;  %v571_v18 = vrot.slane %v569_v8, 7 }
  0x5a   : > { %706 = vst [vmem:[#allocation2 + $0x50] sm:$0x1] %v705_v13  ;;  %709 = vst [vmem:[#allocation2 + $0x54] sm:$0xf] %v708_v14  ;;  %v566_v16 = vsel %vm10379_vm7, %v558_v1, %v565_v6  ;;  %v712_v17 = vsel %vm10386_vm8, %v567_v7, %v711_v60  ;;  %v388_v22 = vpack.c.bf16 %v376_v3, %v375_v2  ;;  %v577_v27 = vshrl.u32 %v8096_v19, 16 }
  0x5b   : > { %710 = vst [vmem:[#allocation2 + $0x58] sm:$0xf] %v566_v16  ;;  %713 = vst [vmem:[#allocation2 + $0x5c] sm:$0x1] %v712_v17  ;;  %v389_v23 = vpack.c.bf16 %v378_v9, %v377_v4  ;;  %v390_v24 = vpack.c.bf16 %v380_v11, %v379_v10  ;;  %v574_v26 = vor.u32 %v572_v15, %v571_v18  ;;  %v580_v28 = vshll.u32 %v8096_v19, 16 }
  0x5c   : > { %v575_v29 = vrot.slane %v571_v18, 4  ;;  %v408_v30 = vsel %vm391_vm0, %v388_v22, 0  ;;  %v579_v35 = vrot.slane %v577_v27, 7  ;;  %v728_v63 = vld [vmem:[#allocation2 + $0x78] sm:$0xf] }
  0x5d   : > { %v410_v32 = vsel %vm391_vm0, %v389_v23, 0  ;;  %v412_v33 = vsel %vm391_vm0, %v390_v24, 0  ;;  %v715_v34 = vsel %vm10371_vm6, %v574_v26, %v714_v21  ;;  %v8097_v36 = vcombine.low %v408_v30, %v408_v30  ;;  %v732_v6 = vld [vmem:[#allocation2 + $0x80] sm:$0x1]  ;;  %v735_v14 = vld [vmem:[#allocation2 + $0x84] sm:$0xf] }
  0x5e   : > { %v8098_v37 = vcombine.high %v408_v30, %v408_v30  ;;  %716 = vst [vmem:[#allocation2 + $0x60] sm:$0xf] %v715_v34  ;;  %v8099_v39 = vcombine.low %v410_v32, %v410_v32  ;;  %v8100_v40 = vcombine.high %v410_v32, %v410_v32  ;;  %v8101_v41 = vcombine.low %v412_v33, %v412_v33  ;;  %v739_v24 = vld [vmem:[#allocation2 + $0x8c] sm:$0x1] }
  0x5f   : > { %v8102_v42 = vcombine.high %v412_v33, %v412_v33  ;;  %v582_v43 = vor.u32 %v580_v28, %v579_v35  ;;  %v584_v44 = vrot.slane %v579_v35, 4  ;;  %v586_v45 = vshrl.u32 %v8097_v36, 16 }
  0x60   : > { %v589_v46 = vshll.u32 %v8097_v36, 16  ;;  %v594_v47 = vshrl.u32 %v8098_v37, 16  ;;  %v597_v48 = vshll.u32 %v8098_v37, 16  ;;  %v603_v49 = vshrl.u32 %v8099_v39, 16 }
  0x61   : > { %v606_v50 = vshll.u32 %v8099_v39, 16  ;;  %v583_v51 = vsel %vm10379_vm7, %v575_v29, %v582_v43  ;;  %v719_v52 = vsel %vm10386_vm8, %v584_v44, %v718_v38  ;;  %v588_v53 = vrot.slane %v586_v45, 7 }
  0x62   : > { %v611_v55 = vshrl.u32 %v8100_v40, 16  ;;  %717 = vst [vmem:[#allocation2 + $0x64] sm:$0xf] %v583_v51  ;;  %720 = vst [vmem:[#allocation2 + $0x68] sm:$0x1] %v719_v52  ;;  %v596_v56 = vrot.slane %v594_v47, 7 }
  0x63   : > { %v605_v58 = vrot.slane %v603_v49, 7  ;;  %v614_v59 = vshll.u32 %v8100_v40, 16  ;;  %v620_v60 = vshrl.u32 %v8101_v41, 16  ;;  %v591_v61 = vor.u32 %v589_v46, %v588_v53 }
  0x64   : > { %v592_v62 = vrot.slane %v588_v53, 4  ;;  %v613_v0 = vrot.slane %v611_v55, 7  ;;  %v623_v1 = vshll.u32 %v8101_v41, 16  ;;  %v599_v2 = vor.u32 %v597_v48, %v596_v56 }
  0x65   : > { %v601_v3 = vrot.slane %v596_v56, 4  ;;  %v608_v4 = vor.u32 %v606_v50, %v605_v58  ;;  %v609_v5 = vrot.slane %v605_v58, 4  ;;  %v722_v7 = vsel %vm10371_vm6, %v591_v61, %v721_v54 }
  0x66   : > { %v616_v8 = vor.u32 %v614_v59, %v613_v0  ;;  %v618_v9 = vrot.slane %v613_v0, 4  ;;  %v622_v10 = vrot.slane %v620_v60, 7  ;;  %723 = vst [vmem:[#allocation2 + $0x6c] sm:$0xf] %v722_v7  ;;  %v600_v11 = vsel %vm10379_vm7, %v592_v62, %v599_v2 }
  0x67   : > { %v726_v12 = vsel %vm10386_vm8, %v601_v3, %v725_v57  ;;  %v729_v13 = vsel %vm10371_vm6, %v608_v4, %v728_v63  ;;  %v628_v15 = vshrl.u32 %v8102_v42, 16  ;;  %724 = vst [vmem:[#allocation2 + $0x70] sm:$0xf] %v600_v11  ;;  %v631_v22 = vshll.u32 %v8102_v42, 16 }
  0x68   : > { %727 = vst [vmem:[#allocation2 + $0x74] sm:$0x1] %v726_v12  ;;  %730 = vst [vmem:[#allocation2 + $0x78] sm:$0xf] %v729_v13  ;;  %v617_v16 = vsel %vm10379_vm7, %v609_v5, %v616_v8  ;;  %v733_v17 = vsel %vm10386_vm8, %v618_v9, %v732_v6  ;;  %v625_v18 = vor.u32 %v623_v1, %v622_v10  ;;  %v626_v19 = vrot.slane %v622_v10, 4 }
  0x69   : > { %731 = vst [vmem:[#allocation2 + $0x7c] sm:$0xf] %v617_v16  ;;  %734 = vst [vmem:[#allocation2 + $0x80] sm:$0x1] %v733_v17  ;;  %v630_v21 = vrot.slane %v628_v15, 7 }
  0x6a   : > { %v736_v23 = vsel %vm10371_vm6, %v625_v18, %v735_v14 }
  0x6b   : > { %737 = vst [vmem:[#allocation2 + $0x84] sm:$0xf] %v736_v23  ;;  %v633_v26 = vor.u32 %v631_v22, %v630_v21  ;;  %v635_v27 = vrot.slane %v630_v21, 4 }
  0x6d   : > { %v634_v28 = vsel %vm10379_vm7, %v626_v19, %v633_v26  ;;  %v740_v29 = vsel %vm10386_vm8, %v635_v27, %v739_v24 }
  0x6e   : > { %738 = vst [vmem:[#allocation2 + $0x88] sm:$0xf] %v634_v28  ;;  %741 = vst [vmem:[#allocation2 + $0x8c] sm:$0x1] %v740_v29 }
  0x6f PF: > { %p8103_p9 = scmp.ne.s32.totalorder %s10200_s24, 1 }
  0x70   : > { %s8104_s25 = sadd.s32 (!%p8103_p9), 4294967294, %s10337_s14  ;;  %vm779_vm9 = vcmask (!%p8103_p9), 31744   ;;  %vm1054_vm10 = vcmask (!%p8103_p9), 1043456   ;;  %vm1055_vm11 = vsmask.f32 (!%p8103_p9), 7938  ;;  %vm1061_vm13 = vcmask (!%p8103_p9), 1040384  }
  0x71   : > { %745 = sbr.rel (%p8103_p9) target bundleno = 165 (0xa5), region = 60  ;;  %s8105_s23 = sshll.u32 (!%p8103_p9), %s8104_s25, 4  ;;  %vm851_vm12 = vsmask.f32 (!%p8103_p9), 256  ;;  %vm852_vm14 = vsmask.f32 (!%p8103_p9), 4368  ;;  %vm10488_vm15 = vmand (!%p8103_p9), %vm1054_vm10, %vm1055_vm11 }
  0x72   : > { %s10471_s29 = scalar_lea.vmem (!%p8103_p9), %s10349_s16, %s8105_s23  ;;  %v1057_v59 = vld [vmem:[#allocation2] sm:$0xf] (!%p8103_p9)  ;;  %vm10494_vm0 = vmand (!%p8103_p9), %vm1061_vm13, %vm851_vm12  ;;  %v1063_v1 = vld [vmem:[#allocation2 + $0x8] sm:$0x1] (!%p8103_p9) }
  0x73   : > { %v749_v20 = vld [vmem:[%s10471_s29] sm:$0xff] (!%p8103_p9)  ;;  %v750_v25 = vld [vmem:[%s10471_s29 + $0x8] sm:$0xff] (!%p8103_p9)  ;;  %v751_v30 = vld [vmem:[%s10471_s29 + $0x10] sm:$0xff] (!%p8103_p9) }
  0x74   : > { %v769_v31 = vpack.c.bf16 (!%p8103_p9), %v750_v25, %v749_v20  ;;  %v752_v32 = vld [vmem:[%s10471_s29 + $0x18] sm:$0xff] (!%p8103_p9)  ;;  %v753_v34 = vld [vmem:[%s10471_s29 + $0x20] sm:$0xff] (!%p8103_p9)  ;;  %v754_v35 = vld [vmem:[%s10471_s29 + $0x28] sm:$0xff] (!%p8103_p9) }
  0x75   : > { %v770_v33 = vpack.c.bf16 (!%p8103_p9), %v752_v32, %v751_v30  ;;  %v771_v37 = vpack.c.bf16 (!%p8103_p9), %v754_v35, %v753_v34  ;;  %v755_v38 = vld [vmem:[%s10471_s29 + $0x30] sm:$0xff] (!%p8103_p9)  ;;  %v756_v39 = vld [vmem:[%s10471_s29 + $0x38] sm:$0xff] (!%p8103_p9)  ;;  %v757_v51 = vld [vmem:[%s10471_s29 + $0x40] sm:$0xff] (!%p8103_p9) }
  0x76   : > { %v782_v36 = vsel (!%p8103_p9), %vm779_vm9, %v769_v31, 0  ;;  %v772_v46 = vpack.c.bf16 (!%p8103_p9), %v756_v39, %v755_v38  ;;  %v758_v52 = vld [vmem:[%s10471_s29 + $0x48] sm:$0xff] (!%p8103_p9)  ;;  %vm10500_vm1 = vmor (!%p8103_p9), %vm851_vm12, %vm852_vm14  ;;  %v1070_v11 = vld [vmem:[#allocation2 + $0x14] sm:$0x1] (!%p8103_p9) }
  0x77   : > { %v8106_v40 = vcombine.low (!%p8103_p9), %v782_v36, %v782_v36  ;;  %v8107_v41 = vcombine.high (!%p8103_p9), %v782_v36, %v782_v36  ;;  %v784_v42 = vsel (!%p8103_p9), %vm779_vm9, %v770_v33, 0  ;;  %v786_v45 = vsel (!%p8103_p9), %vm779_vm9, %v771_v37, 0  ;;  %v1066_v10 = vld [vmem:[#allocation2 + $0xc] sm:$0xf] (!%p8103_p9)  ;;  %v759_v16 = vld [vmem:[%s10471_s29 + $0x50] sm:$0xff] (!%p8103_p9)  ;;  %v760_v22 = vld [vmem:[%s10471_s29 + $0x58] sm:$0xff] (!%p8103_p9) }
  0x78   : > { %v8108_v43 = vcombine.low %v784_v42, %v784_v42  ;;  %v8109_v44 = vcombine.high %v784_v42, %v784_v42  ;;  %v8110_v62 = vcombine.low %v786_v45, %v786_v45  ;;  %v8111_v63 = vcombine.high %v786_v45, %v786_v45  ;;  %v761_v23 = vld [vmem:[%s10471_s29 + $0x60] sm:$0xff]  ;;  %v762_v24 = vld [vmem:[%s10471_s29 + $0x68] sm:$0xff]  ;;  %v1073_v32 = vld [vmem:[#allocation2 + $0x18] sm:$0xf] }
  0x79   : > { %v855_v47 = vshrl.u32 %v8106_v40, 16  ;;  %v858_v48 = vshll.u32 %v8106_v40, 16  ;;  %v863_v49 = vshrl.u32 %v8107_v41, 16  ;;  %v866_v50 = vshll.u32 %v8107_v41, 16  ;;  %v1077_v41 = vld [vmem:[#allocation2 + $0x20] sm:$0x1] }
  0x7a   : > { %v872_v54 = vshrl.u32 %v8108_v43, 16  ;;  %v875_v55 = vshll.u32 %v8108_v43, 16  ;;  %v880_v56 = vshrl.u32 %v8109_v44, 16  ;;  %v883_v57 = vshll.u32 %v8109_v44, 16 }
  0x7b   : > { %v857_v58 = vrot.slane %v855_v47, 7  ;;  %v865_v60 = vrot.slane %v863_v49, 7  ;;  %v788_v4 = vsel %vm779_vm9, %v772_v46, 0  ;;  %v773_v5 = vpack.c.bf16 %v758_v52, %v757_v51 }
  0x7c   : > { %v874_v2 = vrot.slane %v872_v54, 7  ;;  %v882_v3 = vrot.slane %v880_v56, 7  ;;  %v889_v21 = vshrl.u32 %v8110_v62, 16  ;;  %v892_v29 = vshll.u32 %v8110_v62, 16 }
  0x7d   : > { %v860_v6 = vor.u32 %v858_v48, %v857_v58  ;;  %v861_v7 = vrot.slane %v857_v58, 4  ;;  %v868_v8 = vor.u32 %v866_v50, %v865_v60  ;;  %v870_v9 = vrot.slane %v865_v60, 4  ;;  %v1080_v50 = vld [vmem:[#allocation2 + $0x24] sm:$0xf]  ;;  %v1084_v60 = vld [vmem:[#allocation2 + $0x2c] sm:$0x1] }
  0x7e   : > { %v877_v12 = vor.u32 %v875_v55, %v874_v2  ;;  %v878_v13 = vrot.slane %v874_v2, 4  ;;  %v885_v14 = vor.u32 %v883_v57, %v882_v3  ;;  %v887_v15 = vrot.slane %v882_v3, 4  ;;  %v1087_v2 = vld [vmem:[#allocation2 + $0x30] sm:$0xf] }
  0x7f   : > { %v1058_v17 = vsel %vm10488_vm15, %v860_v6, %v1057_v59  ;;  %v869_v18 = vsel %vm10500_vm1, %v861_v7, %v868_v8  ;;  %v1064_v19 = vsel %vm10494_vm0, %v870_v9, %v1063_v1  ;;  %v891_v20 = vrot.slane %v889_v21, 7  ;;  %v764_v9 = vld [vmem:[%s10471_s29 + $0x78] sm:$0xff] }
  0x80   : > { %1059 = vst [vmem:[#allocation2] sm:$0xf] %v1058_v17  ;;  %1060 = vst [vmem:[#allocation2 + $0x4] sm:$0xf] %v869_v18  ;;  %v1067_v26 = vsel %vm10488_vm15, %v877_v12, %v1066_v10  ;;  %v886_v27 = vsel %vm10500_vm1, %v878_v13, %v885_v14  ;;  %v1071_v28 = vsel %vm10494_vm0, %v887_v15, %v1070_v11  ;;  %v897_v25 = vshrl.u32 %v8111_v63, 16  ;;  %v10535_v10 = vld [vmem:[%s10471_s29 + $0x80] sm:$0xff] }
  0x81   : > { %1065 = vst [vmem:[#allocation2 + $0x8] sm:$0x1] %v1064_v19  ;;  %1068 = vst [vmem:[#allocation2 + $0xc] sm:$0xf] %v1067_v26  ;;  %v900_v31 = vshll.u32 %v8111_v63, 16  ;;  %v8112_v30 = vcombine.low %v788_v4, %v788_v4  ;;  %v8113_v33 = vcombine.high %v788_v4, %v788_v4  ;;  %v790_v34 = vsel %vm779_vm9, %v773_v5, 0 }
  0x82   : > { %1069 = vst [vmem:[#allocation2 + $0x10] sm:$0xf] %v886_v27  ;;  %1072 = vst [vmem:[#allocation2 + $0x14] sm:$0x1] %v1071_v28  ;;  %v774_v35 = vpack.c.bf16 %v760_v22, %v759_v16  ;;  %v775_v36 = vpack.c.bf16 %v762_v24, %v761_v23  ;;  %v894_v37 = vor.u32 %v892_v29, %v891_v20  ;;  %v895_v38 = vrot.slane %v891_v20, 4  ;;  %v763_v4 = vld [vmem:[%s10471_s29 + $0x70] sm:$0xff] }
  0x83   : > { %v899_v39 = vrot.slane %v897_v25, 7  ;;  %v906_v40 = vshrl.u32 %v8112_v30, 16  ;;  %v909_v42 = vshll.u32 %v8112_v30, 16  ;;  %v914_v43 = vshrl.u32 %v8113_v33, 16  ;;  %v10538_v11 = vld [vmem:[%s10471_s29 + $0x88] sm:$0xff] }
  0x84   : > { %v917_v44 = vshll.u32 %v8113_v33, 16  ;;  %v8114_v45 = vcombine.low %v790_v34, %v790_v34  ;;  %v1074_v46 = vsel %vm10488_vm15, %v894_v37, %v1073_v32  ;;  %v8115_v55 = vcombine.high %v790_v34, %v790_v34  ;;  %v1091_v22 = vld [vmem:[#allocation2 + $0x38] sm:$0x1]  ;;  %v1094_v37 = vld [vmem:[#allocation2 + $0x3c] sm:$0xf] }
  0x85   : > { %v902_v47 = vor.u32 %v900_v31, %v899_v39  ;;  %v904_v48 = vrot.slane %v899_v39, 4  ;;  %v908_v49 = vrot.slane %v906_v40, 7  ;;  %1075 = vst [vmem:[#allocation2 + $0x18] sm:$0xf] %v1074_v46  ;;  %v916_v51 = vrot.slane %v914_v43, 7 }
  0x86   : > { %v923_v52 = vshrl.u32 %v8114_v45, 16  ;;  %v926_v54 = vshll.u32 %v8114_v45, 16  ;;  %v931_v3 = vshrl.u32 %v8115_v55, 16  ;;  %v934_v6 = vshll.u32 %v8115_v55, 16  ;;  %v1101_v45 = vld [vmem:[#allocation2 + $0x48] sm:$0xf] }
  0x87   : > { %v903_v56 = vsel %vm10500_vm1, %v895_v38, %v902_v47  ;;  %v1078_v57 = vsel %vm10494_vm0, %v904_v48, %v1077_v41  ;;  %v911_v58 = vor.u32 %v909_v42, %v908_v49  ;;  %v912_v59 = vrot.slane %v908_v49, 4 }
  0x88   : > { %1076 = vst [vmem:[#allocation2 + $0x1c] sm:$0xf] %v903_v56  ;;  %1079 = vst [vmem:[#allocation2 + $0x20] sm:$0x1] %v1078_v57  ;;  %v919_v62 = vor.u32 %v917_v44, %v916_v51  ;;  %v921_v63 = vrot.slane %v916_v51, 4  ;;  %v925_v1 = vrot.slane %v923_v52, 7  ;;  %v776_v24 = vpack.c.bf16 %v764_v9, %v763_v4 }
  0x89   : > { %v1081_v5 = vsel %vm10488_vm15, %v911_v58, %v1080_v50  ;;  %v792_v7 = vsel %vm779_vm9, %v774_v35, 0  ;;  %v794_v8 = vsel %vm779_vm9, %v775_v36, 0  ;;  %v933_v16 = vrot.slane %v931_v3, 7  ;;  %v1098_v44 = vld [vmem:[#allocation2 + $0x44] sm:$0x1]  ;;  %v767_v58 = vld [vmem:[%s10471_s29 + $0x90] sm:$0xff] }
  0x8a   : > { %1082 = vst [vmem:[#allocation2 + $0x24] sm:$0xf] %v1081_v5  ;;  %v920_v12 = vsel %vm10500_vm1, %v912_v59, %v919_v62  ;;  %v1085_v13 = vsel %vm10494_vm0, %v921_v63, %v1084_v60  ;;  %v928_v14 = vor.u32 %v926_v54, %v925_v1  ;;  %v929_v15 = vrot.slane %v925_v1, 4  ;;  %v1105_v52 = vld [vmem:[#allocation2 + $0x50] sm:$0x1]  ;;  %v768_v59 = vld [vmem:[%s10471_s29 + $0x98] sm:$0xff] }
  0x8b   : > { %1083 = vst [vmem:[#allocation2 + $0x28] sm:$0xf] %v920_v12  ;;  %1086 = vst [vmem:[#allocation2 + $0x2c] sm:$0x1] %v1085_v13  ;;  %v8116_v17 = vcombine.low %v792_v7, %v792_v7  ;;  %v8117_v18 = vcombine.high %v792_v7, %v792_v7  ;;  %v8118_v19 = vcombine.low %v794_v8, %v794_v8  ;;  %v938_v28 = vrot.slane %v933_v16, 4 }
  0x8c   : > { %v1088_v21 = vsel %vm10488_vm15, %v928_v14, %v1087_v2  ;;  %v8119_v23 = vcombine.high %v794_v8, %v794_v8  ;;  %v777_v26 = vpack.c.bf16 %v10538_v11, %v10535_v10  ;;  %v936_v27 = vor.u32 %v934_v6, %v933_v16  ;;  %v1108_v6 = vld [vmem:[#allocation2 + $0x54] sm:$0xf] }
  0x8d   : > { %1089 = vst [vmem:[#allocation2 + $0x30] sm:$0xf] %v1088_v21  ;;  %v940_v29 = vshrl.u32 %v8116_v17, 16  ;;  %v943_v20 = vshll.u32 %v8116_v17, 16  ;;  %v948_v25 = vshrl.u32 %v8117_v18, 16  ;;  %v951_v31 = vshll.u32 %v8117_v18, 16 }
  0x8e   : > { %v957_v30 = vshrl.u32 %v8118_v19, 16  ;;  %v960_v32 = vshll.u32 %v8118_v19, 16  ;;  %v937_v33 = vsel %vm10500_vm1, %v929_v15, %v936_v27  ;;  %v1092_v34 = vsel %vm10494_vm0, %v938_v28, %v1091_v22  ;;  %v1112_v21 = vld [vmem:[#allocation2 + $0x5c] sm:$0x1] }
  0x8f   : > { %v942_v35 = vrot.slane %v940_v29, 7  ;;  %v965_v36 = vshrl.u32 %v8119_v23, 16  ;;  %1090 = vst [vmem:[#allocation2 + $0x34] sm:$0xf] %v937_v33  ;;  %1093 = vst [vmem:[#allocation2 + $0x38] sm:$0x1] %v1092_v34  ;;  %v778_v8 = vpack.c.bf16 %v768_v59, %v767_v58 }
  0x90   : > { %v950_v38 = vrot.slane %v948_v25, 7  ;;  %v959_v39 = vrot.slane %v957_v30, 7  ;;  %v968_v40 = vshll.u32 %v8119_v23, 16  ;;  %v796_v41 = vsel %vm779_vm9, %v776_v24, 0  ;;  %v1115_v34 = vld [vmem:[#allocation2 + $0x60] sm:$0xf] }
  0x91   : > { %v945_v42 = vor.u32 %v943_v20, %v942_v35  ;;  %v946_v43 = vrot.slane %v942_v35, 4  ;;  %v967_v46 = vrot.slane %v965_v36, 7  ;;  %v8120_v47 = vcombine.low %v796_v41, %v796_v41  ;;  %v1119_v35 = vld [vmem:[#allocation2 + $0x68] sm:$0x1] }
  0x92   : > { %v953_v48 = vor.u32 %v951_v31, %v950_v38  ;;  %v955_v49 = vrot.slane %v950_v38, 4  ;;  %v962_v50 = vor.u32 %v960_v32, %v959_v39  ;;  %v963_v51 = vrot.slane %v959_v39, 4 }
  0x93   : > { %v1095_v54 = vsel %vm10488_vm15, %v945_v42, %v1094_v37  ;;  %v970_v55 = vor.u32 %v968_v40, %v967_v46  ;;  %v972_v56 = vrot.slane %v967_v46, 4  ;;  %v974_v57 = vshrl.u32 %v8120_v47, 16  ;;  %v1122_v42 = vld [vmem:[#allocation2 + $0x6c] sm:$0xf] }
  0x94   : > { %1096 = vst [vmem:[#allocation2 + $0x3c] sm:$0xf] %v1095_v54  ;;  %v954_v60 = vsel %vm10500_vm1, %v946_v43, %v953_v48  ;;  %v1099_v62 = vsel %vm10494_vm0, %v955_v49, %v1098_v44  ;;  %v1102_v63 = vsel %vm10488_vm15, %v962_v50, %v1101_v45  ;;  %v977_v1 = vshll.u32 %v8120_v47, 16  ;;  %v1126_v49 = vld [vmem:[#allocation2 + $0x74] sm:$0x1] }
  0x95   : > { %1097 = vst [vmem:[#allocation2 + $0x40] sm:$0xf] %v954_v60  ;;  %1100 = vst [vmem:[#allocation2 + $0x44] sm:$0x1] %v1099_v62  ;;  %v971_v2 = vsel %vm10500_vm1, %v963_v51, %v970_v55  ;;  %v1106_v3 = vsel %vm10494_vm0, %v972_v56, %v1105_v52  ;;  %v976_v4 = vrot.slane %v974_v57, 7  ;;  %v8121_v5 = vcombine.high %v796_v41, %v796_v41 }
  0x96   : > { %1103 = vst [vmem:[#allocation2 + $0x48] sm:$0xf] %v1102_v63  ;;  %1104 = vst [vmem:[#allocation2 + $0x4c] sm:$0xf] %v971_v2  ;;  %v798_v7 = vsel %vm779_vm9, %v777_v26, 0  ;;  %v800_v15 = vsel %vm779_vm9, %v778_v8, 0 }
  0x97   : > { %1107 = vst [vmem:[#allocation2 + $0x50] sm:$0x1] %v1106_v3  ;;  %v979_v9 = vor.u32 %v977_v1, %v976_v4  ;;  %v982_v10 = vshrl.u32 %v8121_v5, 16  ;;  %v985_v11 = vshll.u32 %v8121_v5, 16  ;;  %v980_v12 = vrot.slane %v976_v4, 4 }
  0x98   : > { %v8122_v13 = vcombine.low %v798_v7, %v798_v7  ;;  %v8123_v14 = vcombine.high %v798_v7, %v798_v7  ;;  %v8124_v18 = vcombine.low %v800_v15, %v800_v15  ;;  %v8125_v19 = vcombine.high %v800_v15, %v800_v15 }
  0x99   : > { %v1109_v16 = vsel %vm10488_vm15, %v979_v9, %v1108_v6  ;;  %v984_v17 = vrot.slane %v982_v10, 7 }
  0x9a   : > { %1110 = vst [vmem:[#allocation2 + $0x54] sm:$0xf] %v1109_v16  ;;  %v991_v22 = vshrl.u32 %v8122_v13, 16  ;;  %v994_v23 = vshll.u32 %v8122_v13, 16  ;;  %v999_v24 = vshrl.u32 %v8123_v14, 16  ;;  %v1002_v26 = vshll.u32 %v8123_v14, 16 }
  0x9b   : > { %v987_v27 = vor.u32 %v985_v11, %v984_v17  ;;  %v989_v28 = vrot.slane %v984_v17, 4  ;;  %v1008_v29 = vshrl.u32 %v8124_v18, 16  ;;  %v1011_v20 = vshll.u32 %v8124_v18, 16 }
  0x9c   : > { %v993_v25 = vrot.slane %v991_v22, 7  ;;  %v1001_v31 = vrot.slane %v999_v24, 7  ;;  %v1016_v30 = vshrl.u32 %v8125_v19, 16  ;;  %v1019_v37 = vshll.u32 %v8125_v19, 16 }
  0x9d   : > { %v988_v32 = vsel %vm10500_vm1, %v980_v12, %v987_v27  ;;  %v1113_v33 = vsel %vm10494_vm0, %v989_v28, %v1112_v21  ;;  %v1010_v36 = vrot.slane %v1008_v29, 7 }
  0x9e   : > { %1111 = vst [vmem:[#allocation2 + $0x58] sm:$0xf] %v988_v32  ;;  %1114 = vst [vmem:[#allocation2 + $0x5c] sm:$0x1] %v1113_v33  ;;  %v996_v38 = vor.u32 %v994_v23, %v993_v25  ;;  %v997_v39 = vrot.slane %v993_v25, 4  ;;  %v1004_v40 = vor.u32 %v1002_v26, %v1001_v31  ;;  %v1006_v41 = vrot.slane %v1001_v31, 4 }
  0x9f   : > { %v1013_v43 = vor.u32 %v1011_v20, %v1010_v36  ;;  %v1014_v44 = vrot.slane %v1010_v36, 4  ;;  %v1018_v45 = vrot.slane %v1016_v30, 7 }
  0xa0   : > { %v1116_v46 = vsel %vm10488_vm15, %v996_v38, %v1115_v34  ;;  %v1005_v47 = vsel %vm10500_vm1, %v997_v39, %v1004_v40  ;;  %v1120_v48 = vsel %vm10494_vm0, %v1006_v41, %v1119_v35 }
  0xa1   : > { %1117 = vst [vmem:[#allocation2 + $0x60] sm:$0xf] %v1116_v46  ;;  %1118 = vst [vmem:[#allocation2 + $0x64] sm:$0xf] %v1005_v47  ;;  %v1123_v50 = vsel %vm10488_vm15, %v1013_v43, %v1122_v42  ;;  %v1021_v51 = vor.u32 %v1019_v37, %v1018_v45  ;;  %v1023_v52 = vrot.slane %v1018_v45, 4 }
  0xa2   : > { %1121 = vst [vmem:[#allocation2 + $0x68] sm:$0x1] %v1120_v48  ;;  %1124 = vst [vmem:[#allocation2 + $0x6c] sm:$0xf] %v1123_v50 }
  0xa3   : > { %v1022_v54 = vsel %vm10500_vm1, %v1014_v44, %v1021_v51  ;;  %v1127_v55 = vsel %vm10494_vm0, %v1023_v52, %v1126_v49 }
  0xa4   : > { %1125 = vst [vmem:[#allocation2 + $0x70] sm:$0xf] %v1022_v54  ;;  %1128 = vst [vmem:[#allocation2 + $0x74] sm:$0x1] %v1127_v55 }
  0xa5 PF: > { %v9924_v56 = vld [vmem:[%s12793_s1] sm:$0xff]   ;;  %v9925_v53 = vld [vmem:[%s12793_s1 + $0x8] sm:$0xff]   ;;  %v9926_v0 = vld [vmem:[%s12793_s1 + $0x10] sm:$0xff]   ;;  %vm1887_vm2 = vcmask 1042432   ;;  %vm1888_vm3 = vcmask 1046532   ;;  %vm4623_vm8 = vcmask 1040384  }
  0xa6   : > { %9006 = vmatprep.subr.bf16.mxu0 %v9924_v56  ;;  %v9927_v61 = vld [vmem:[%s12793_s1 + $0x18] sm:$0xff]   ;;  %v10599_v57 = vld [vmem:[#allocation2] sm:$0xf]  ;;  %v10601_v58 = vld [vmem:[#allocation2 + $0x4] sm:$0xf]  ;;  %s8448_s13 = sadd.s32 4294967295, %s10337_s14 }
  0xa7   : > { %9007 = vmatpush3.bf16.msra.mxu0 %v9924_v56  ;;  %v8160_v59 = vcombine.low %v10599_v57, %v10601_v58  ;;  %v9928_v60 = vld [vmem:[%s12793_s1 + $0x20] sm:$0xff]   ;;  %v9929_v62 = vld [vmem:[%s12793_s1 + $0x28] sm:$0xff]   ;;  %v9930_v63 = vld [vmem:[%s12793_s1 + $0x30] sm:$0xff]   ;;  %v1892_v27 = vrot.slane %v10601_v58, 5  ;;  %vm1175_vm5 = vsmask.f32 3328 }
  0xa8   : > { %9008 = vmatprep.subr.bf16.mxu0 %v9925_v53  ;;  %v9931_v1 = vld [vmem:[%s12793_s1 + $0x38] sm:$0xff]   ;;  %v10617_v2 = vld [vmem:[#allocation2 + $0xc] sm:$0xf]  ;;  %v10619_v3 = vld [vmem:[#allocation2 + $0x10] sm:$0xf]  ;;  %s8663_s14 = sshll.u32 %s10200_s24, 7 }
  0xa9   : > { %9022 = vmatprep.mubr.bf16.mxu0 %v8160_v59  ;;  %v9934_v4 = vld [vmem:[%s12793_s1 + $0x80] sm:$0xff]   ;;  %v10624_v5 = vld [vmem:[#allocation2 + $0x18] sm:$0xf]  ;;  %v10626_v6 = vld [vmem:[#allocation2 + $0x1c] sm:$0xf]  ;;  %v8161_v7 = vcombine.low %v10617_v2, %v10619_v3  ;;  %v1899_v34 = vrot.slane %v10619_v3, 5  ;;  %s12690_s25 = scalar_lea.vmem %s10349_s16, %s8663_s14 }
  0xaa   : > { %12828 = vst [vmem:[#allocation7_spill] sm:$0xff] %v10626_v6  ;;  %v8162_v8 = vcombine.low %v10624_v5, %v10626_v6  ;;  %v9935_v9 = vld [vmem:[%s12793_s1 + $0x88] sm:$0xff]   ;;  %v10635_v10 = vld [vmem:[#allocation2 + $0x24] sm:$0xf]  ;;  %v9938_v12 = vld [vmem:[%s12793_s1 + $0x90] sm:$0xff]   ;;  %v1894_v38 = vrot.slane %v1892_v27, 4 }
  0xab   : > { %9009 = vmatpush3.bf16.msra.mxu0 %v9925_v53  ;;  %v10637_v11 = vld [vmem:[#allocation2 + $0x28] sm:$0xf]  ;;  %v10642_v13 = vld [vmem:[#allocation2 + $0x30] sm:$0xf]  ;;  %v10644_v14 = vld [vmem:[#allocation2 + $0x34] sm:$0xf] }
  0xac   : > { %9010 = vmatprep.subr.bf16.mxu0 %v9926_v0  ;;  %12829 = vst [vmem:[#allocation8_spill] sm:$0xff] %v10637_v11  ;;  %12830 = vst [vmem:[#allocation9_spill] sm:$0xff] %v10644_v14  ;;  %v8163_v15 = vcombine.low %v10635_v10, %v10637_v11  ;;  %v8164_v16 = vcombine.low %v10642_v13, %v10644_v14  ;;  %v9940_v17 = vld [vmem:[%s12793_s1 + $0x98] sm:$0xff]   ;;  %v9942_v18 = vld [vmem:[%s12793_s1 + $0xa0] sm:$0xff]   ;;  %v1906_v46 = vrot.slane %v10626_v6, 5  ;;  %v1901_v52 = vrot.slane %v1899_v34, 4 }
  0xad   : > { %v10656_v19 = vld [vmem:[#allocation2 + $0x3c] sm:$0xf]  ;;  %v10658_v21 = vld [vmem:[#allocation2 + $0x40] sm:$0xf]  ;;  %v10660_v22 = vld [vmem:[#allocation2 + $0x48] sm:$0xf] }
  0xae   : > { %12831 = vst [vmem:[#allocation10_spill] sm:$0xff] %v10658_v21  ;;  %v10662_v23 = vld [vmem:[#allocation2 + $0x4c] sm:$0xf]  ;;  %v8165_v24 = vcombine.low %v10656_v19, %v10658_v21  ;;  %v10672_v29 = vld [vmem:[#allocation2 + $0x54] sm:$0xf]  ;;  %v9949_v37 = vld [vmem:[%s12793_s1 + $0xb8] sm:$0xff]  }
  0xaf   : > { %9011 = vmatpush3.bf16.msra.mxu0 %v9926_v0  ;;  %12832 = vst [vmem:[#allocation11_spill] sm:$0xff] %v10662_v23  ;;  %v8166_v26 = vcombine.low %v10660_v22, %v10662_v23  ;;  %v9945_v28 = vld [vmem:[%s12793_s1 + $0xa8] sm:$0xff]   ;;  %v10674_v20 = vld [vmem:[#allocation2 + $0x58] sm:$0xf]  ;;  %v9946_v25 = vld [vmem:[%s12793_s1 + $0xb0] sm:$0xff]   ;;  %v1908_v0 = vrot.slane %v1906_v46, 4 }
  0xb0   : > { %9012 = vmatprep.subr.bf16.mxu0 %v9927_v61  ;;  %12833 = vst [vmem:[#allocation12_spill] sm:$0xff] %v10674_v20  ;;  %v1145_v31 = vld [vmem:[#allocation2 + $0x60] sm:$0xf]  ;;  %v10679_v30 = vld [vmem:[#allocation2 + $0x64] sm:$0xf]  ;;  %v8167_v35 = vcombine.low %v10672_v29, %v10674_v20  ;;  %vm10690_vm4 = vmor %vm1887_vm2, %vm1888_vm3  ;;  %vm4950_vm2 = vcmask 1043456  }
  0xb1   : > { %v1165_v32 = vld [vmem:[#allocation2 + $0x8] sm:$0x1]  ;;  %v1857_v33 = vld [vmem:[#allocation2] sm:$0xe]  ;;  %v8168_v36 = vcombine.low %v1145_v31, %v10679_v30  ;;  %v1147_v42 = vld [vmem:[#allocation2 + $0x6c] sm:$0xf] }
  0xb2   : > { %v8178_v40 = vrot.slane %v1857_v33, 9  ;;  %v1895_v41 = vrot.slane %v1165_v32, 5  ;;  %v10694_v43 = vld [vmem:[#allocation2 + $0x70] sm:$0xf]  ;;  %v1166_v44 = vld [vmem:[#allocation2 + $0x14] sm:$0x1] }
  0xb3   : > { %9013 = vmatpush3.bf16.msra.mxu0 %v9927_v61  ;;  %v9950_v45 = vld [vmem:[%s12793_s1 + $0xc0] sm:$0xff]   ;;  %v1858_v47 = vld [vmem:[#allocation2 + $0xc] sm:$0xe]  ;;  %v1859_v51 = vld [vmem:[#allocation2 + $0x18] sm:$0xe]  ;;  %v8169_v54 = vcombine.low %v1147_v42, %v10694_v43  ;;  %v1902_v55 = vrot.slane %v1166_v44, 5 }
  0xb4   : > { %9014 = vmatprep.subr.bf16.mxu0 %v9928_v60  ;;  %v1893_v48 = vsel %vm10690_vm4, %v8178_v40, %v1892_v27  ;;  %v1896_v49 = vsel %vm10690_vm4, %v1894_v38, %v1895_v41  ;;  %v1167_v50 = vld [vmem:[#allocation2 + $0x20] sm:$0x1]  ;;  %v8179_v53 = vrot.slane %v1858_v47, 9  ;;  %v8180_v61 = vrot.slane %v1859_v51, 9  ;;  %v9951_v27 = vld [vmem:[%s12793_s1 + $0xc8] sm:$0xff]  }
  0xb5   : > { %v8204_v56 = vcombine.low %v1893_v48, %v1896_v49  ;;  %v1909_v59 = vrot.slane %v1167_v50, 5  ;;  %v1170_v38 = vld [vmem:[#allocation2 + $0x44] sm:$0x1]  ;;  %v1862_v40 = vld [vmem:[#allocation2 + $0x3c] sm:$0xe]  ;;  %v1934_v41 = vrot.slane %v10662_v23, 5 }
  0xb6   : > { %v1171_v42 = vld [vmem:[#allocation2 + $0x50] sm:$0x1]  ;;  %v1863_v44 = vld [vmem:[#allocation2 + $0x48] sm:$0xe]  ;;  %v8183_v47 = vrot.slane %v1862_v40, 9  ;;  %v1930_v49 = vrot.slane %v1170_v38, 5 }
  0xb7   : > { %9015 = vmatpush3.bf16.msra.mxu0 %v9928_v60  ;;  %v1900_v60 = vsel %vm10690_vm4, %v8179_v53, %v1899_v34  ;;  %v1927_v34 = vrot.slane %v10658_v21, 5  ;;  %v9953_v50 = vld [vmem:[%s12793_s1 + $0xd8] sm:$0xff]   ;;  %v8184_v51 = vrot.slane %v1863_v44, 9  ;;  %v1864_v53 = vld [vmem:[#allocation2 + $0x54] sm:$0xe]  ;;  %v1182_v44 = vshll.u32 %v10599_v57, 16 }
  0xb8   : > { %9016 = vmatprep.subr.bf16.mxu0 %v9929_v62  ;;  %vm1176_vm6 = vsmask.f32 7440  ;;  %v10916_v23 = vld [vmem:[#allocation2 + $0x44] sm:$0x1]  ;;  %v2495_v21 = vld [vmem:[#allocation2 + $0x54] sm:$0xf] }
  0xb9   : > { %v1929_v48 = vrot.slane %v1927_v34, 4  ;;  %vm10890_vm7 = vmor %vm1175_vm5, %vm1176_vm6  ;;  %vm4624_vm9 = vsmask.f32 256  ;;  %vm4656_vm11 = vsmask.f32 7938 }
  0xba   : > { %vm11693_vm10 = vmand %vm4623_vm8, %vm4624_vm9  ;;  %vm4748_vm6 = vsmask.f32 4368 }
  0xbb   : > { %9017 = vmatpush3.bf16.msra.mxu0 %v9929_v62  ;;  %v1903_v62 = vsel %vm10690_vm4, %v1901_v52, %v1902_v55  ;;  %v1936_v52 = vrot.slane %v1934_v41, 4  ;;  %v1928_v55 = vsel %vm10690_vm4, %v8183_v47, %v1927_v34  ;;  %v1203_v47 = vshrl.u32 %v10617_v2, 16  ;;  %vm11700_vm12 = vmand %vm4623_vm8, %vm4656_vm11 }
  0xbc   : > { %9018 = vmatprep.subr.bf16.mxu0 %v9930_v63 }
  0xbf   : > { %9019 = vmatpush3.bf16.msra.mxu0 %v9930_v63  ;;  %v1913_v63 = vrot.slane %v10637_v11, 5 }
  0xc0   : > { %9020 = vmatprep.subr.bf16.mxu0 %v9931_v1 }
  0xc3   : > { %9021 = vmatpush3.bf16.msra.mxu0 %v9931_v1  ;;  %v1907_v1 = vsel %vm10690_vm4, %v8180_v61, %v1906_v46  ;;  %v9954_v61 = vld [vmem:[%s12793_s1 + $0xe0] sm:$0xff]  }
  0xc4   : > { %9042 = vmatprep.subr.bf16.mxu0 %v9934_v4 }
  0xc6   : > { %9023 = vmatmul.mubr.bf16.vlgmr.msra.gmra.mrb[0].mxu0 %v8161_v7  ;;  %v1168_v7 = vld [vmem:[#allocation2 + $0x2c] sm:$0x1] }
  0xc7   : > { %9043 = vmatpush3.bf16.msra.mxu0 %v9934_v4  ;;  %9026 = vmatprep.mubr.bf16.mxu0 %v8162_v8  ;;  %v1910_v4 = vsel %vm10690_vm4, %v1908_v0, %v1909_v59  ;;  %v1860_v8 = vld [vmem:[#allocation2 + $0x24] sm:$0xe]  ;;  %v1941_v0 = vrot.slane %v10674_v20, 5  ;;  %v1935_v59 = vsel %vm10690_vm4, %v8184_v51, %v1934_v41  ;;  %v1251_v51 = vshrl.u32 %v10635_v10, 16 }
  0xc8   : > { %9044 = vmatprep.subr.bf16.mxu0 %v9935_v9 }
  0xcb   : > { %9045 = vmatpush3.bf16.msra.mxu0 %v9935_v9  ;;  %v1920_v9 = vrot.slane %v10644_v14, 5 }
  0xcc   : > { %9046 = vmatprep.subr.bf16.mxu0 %v9938_v12 }
  0xce   : > { %9027 = vmatmul.mubr.bf16.gmra.mrb[4].mxu0 %v8163_v15  ;;  %v1861_v15 = vld [vmem:[#allocation2 + $0x30] sm:$0xe] }
  0xcf   : > { %9047 = vmatpush3.bf16.msra.mxu0 %v9938_v12  ;;  %9030 = vmatprep.mubr.bf16.mxu0 %v8164_v16  ;;  %v1169_v12 = vld [vmem:[#allocation2 + $0x38] sm:$0x1]  ;;  %v8205_v16 = vcombine.low %v1900_v60, %v1903_v62  ;;  %v1172_v62 = vld [vmem:[#allocation2 + $0x5c] sm:$0x1] }
  0xd0   : > { %9048 = vmatprep.subr.bf16.mxu0 %v9940_v17  ;;  %v1923_v31 = vrot.slane %v1169_v12, 5  ;;  %v1943_v12 = vrot.slane %v1941_v0, 4 }
  0xd3   : > { %9049 = vmatpush3.bf16.msra.mxu0 %v9940_v17  ;;  %v8206_v17 = vcombine.low %v1907_v1, %v1910_v4  ;;  %v1173_v1 = vld [vmem:[#allocation2 + $0x68] sm:$0x1]  ;;  %v1865_v4 = vld [vmem:[#allocation2 + $0x60] sm:$0xe] }
  0xd4   : > { %9050 = vmatprep.subr.bf16.mxu0 %v9942_v18 }
  0xd6   : > { %9031 = vmatmul.mubr.bf16.gmra.mrb[8].mxu0 %v8165_v24  ;;  %v1915_v24 = vrot.slane %v1913_v63, 4 }
  0xd7   : > { %9051 = vmatpush3.bf16.msra.mxu0 %v9942_v18  ;;  %9034 = vmatprep.mubr.bf16.mxu0 %v8166_v26  ;;  %v8181_v18 = vrot.slane %v1860_v8, 9  ;;  %v1916_v26 = vrot.slane %v1168_v7, 5  ;;  %v8185_v8 = vrot.slane %v1864_v53, 9  ;;  %v10784_v53 = vrot.slane %v1182_v44, 5 }
  0xd8   : > { %9052 = vmatprep.subr.bf16.mxu0 %v9945_v28 }
  0xd9   : > { %v1914_v32 = vsel %vm10690_vm4, %v8181_v18, %v1913_v63  ;;  %v1917_v33 = vsel %vm10690_vm4, %v1915_v24, %v1916_v26  ;;  %v1948_v63 = vrot.slane %v10679_v30, 5  ;;  %v1951_v24 = vrot.slane %v1173_v1, 5  ;;  %v10886_v1 = vld [vmem:[#allocation2 + $0x40] sm:$0xf] }
  0xda   : > { %v1942_v30 = vsel %vm10690_vm4, %v8185_v8, %v1941_v0  ;;  %v1302_v8 = vshll.u32 %v10656_v19, 16  ;;  %v2617_v0 = vshrl.u32 %v10886_v1, 16 }
  0xdb   : > { %9053 = vmatpush3.bf16.msra.mxu0 %v9945_v28  ;;  %v8182_v28 = vrot.slane %v1861_v15, 9  ;;  %v1944_v15 = vrot.slane %v1172_v62, 5  ;;  %v1950_v18 = vrot.slane %v1948_v63, 4  ;;  %v10797_v62 = vrot.slane %v1251_v51, 4  ;;  %v10843_v51 = vld [vmem:[#allocation2 + $0x1c] sm:$0xf] }
  0xdc   : > { %9054 = vmatprep.subr.bf16.mxu0 %v9946_v25 }
  0xdd   : > { %v1945_v26 = vsel %vm10690_vm4, %v1943_v12, %v1944_v15  ;;  %12838 = vst [vmem:[#allocation15_spill] sm:$0xff] %v10797_v62  ;;  %v1323_v15 = vshrl.u32 %v10660_v22, 16  ;;  %v10880_v12 = vld [vmem:[#allocation2 + $0x34] sm:$0xf] }
  0xde   : > { %9035 = vmatmul.mubr.bf16.gmra.mrb[12].mxu0 %v8167_v35  ;;  %v9952_v35 = vld [vmem:[%s12793_s1 + $0xd0] sm:$0xff]   ;;  %v8211_v34 = vcombine.low %v1942_v30, %v1945_v26 }
  0xdf   : > { %9038 = vmatprep.mubr.bf16.mxu0 %v8168_v36  ;;  %9055 = vmatpush3.bf16.msra.mxu0 %v9946_v25  ;;  %v1922_v25 = vrot.slane %v1920_v9, 4  ;;  %v1921_v36 = vsel %vm10690_vm4, %v8182_v28, %v1920_v9  ;;  %v1955_v28 = vrot.slane %v10694_v43, 5  ;;  %v9957_v43 = vld [vmem:[%s12793_s1 + $0xf8] sm:$0xff]   ;;  %v10813_v30 = vld [vmem:[#allocation2 + $0x10] sm:$0xf] }
  0xe0   : > { %9056 = vmatprep.subr.bf16.mxu0 %v9949_v37 }
  0xe3   : > { %9057 = vmatpush3.bf16.msra.mxu0 %v9949_v37  ;;  %v1924_v37 = vsel %vm10690_vm4, %v1922_v25, %v1923_v31  ;;  %v1952_v31 = vsel %vm10690_vm4, %v1950_v18, %v1951_v24  ;;  %v9959_v18 = vld [vmem:[#allocation2 + $0x18] sm:$0xff]   ;;  %v2477_v24 = vld [vmem:[#allocation2 + $0xc] sm:$0xf] }
  0xe4   : > { %9078 = vmatprep.subr.bf16.mxu0 %v9950_v45  ;;  %v8208_v46 = vcombine.low %v1921_v36, %v1924_v37  ;;  %v1957_v37 = vrot.slane %v1955_v28, 4 }
  0xe6   : > { %9039 = vmatmul.mubr.bf16.gmra.mrb[16].mxu0 %v8169_v54  ;;  %v1937_v54 = vrot.slane %v1171_v42, 5  ;;  %v1179_v42 = vshrl.u32 %v10599_v57, 16 }
  0xe7   : > { %9058 = vmatprep.mubr.bf16.mxu0 %v8204_v56  ;;  %v1931_v56 = vsel %vm10690_vm4, %v1929_v48, %v1930_v49  ;;  %v1206_v48 = vshll.u32 %v10617_v2, 16  ;;  %v1227_v49 = vshrl.u32 %v10624_v5, 16  ;;  %v1278_v2 = vshll.u32 %v10642_v13, 16 }
  0xe8   : > { %v1938_v60 = vsel %vm10690_vm4, %v1936_v52, %v1937_v54  ;;  %v8209_v7 = vcombine.low %v1928_v55, %v1931_v56  ;;  %v1254_v52 = vshll.u32 %v10635_v10, 16  ;;  %v1275_v54 = vshrl.u32 %v10642_v13, 16  ;;  %v9958_v55 = vld [vmem:[#allocation2 + $0xc] sm:$0xff]   ;;  %v9975_v13 = vld [vmem:[%s12793_s1 + $0x138] sm:$0xff]  }
  0xe9   : > { %v8210_v9 = vcombine.low %v1935_v59, %v1938_v60  ;;  %v10782_v56 = vrot.slane %v1179_v42, 4  ;;  %v10792_v59 = vrot.slane %v1227_v49, 4 }
  0xeb   : > { %12836 = vst [vmem:[#allocation13_spill] sm:$0xff] %v10792_v59 }
  0xee   : > { %9059 = vmatmul.mubr.bf16.vlgmr.msra.gmra.mrb[0].mxu0 %v8205_v16  ;;  %v9955_v16 = vld [vmem:[%s12793_s1 + $0xe8] sm:$0xff]  }
  0xef   : > { %9079 = vmatpush3.bf16.msra.mxu0 %v9950_v45  ;;  %9062 = vmatprep.mubr.bf16.mxu0 %v8206_v17  ;;  %v8207_v45 = vcombine.low %v1914_v32, %v1917_v33  ;;  %v8186_v17 = vrot.slane %v1865_v4, 9  ;;  %v1174_v32 = vld [vmem:[#allocation2 + $0x74] sm:$0x1]  ;;  %v1866_v33 = vld [vmem:[#allocation2 + $0x6c] sm:$0xe]  ;;  %v10802_v4 = vrot.slane %v1275_v54, 4 }
  0xf0   : > { %9080 = vmatprep.subr.bf16.mxu0 %v9951_v27  ;;  %v8187_v36 = vrot.slane %v1866_v33, 9  ;;  %v1958_v38 = vrot.slane %v1174_v32, 5  ;;  %v2511_v32 = vshll.u32 %v2477_v24, 16  ;;  %v10824_v33 = vrot.slane %v1323_v15, 4  ;;  %v10848_v54 = vld [vmem:[#allocation2 + $0x20] sm:$0x1] }
  0xf1   : > { %v1949_v25 = vsel %vm10690_vm4, %v8186_v17, %v1948_v63  ;;  %v10799_v63 = vrot.slane %v1254_v52, 5  ;;  %12840 = vst [vmem:[#allocation17_spill] sm:$0xff] %v10802_v4  ;;  %v1347_v17 = vshrl.u32 %v10672_v29, 16 }
  0xf2   : > { %v1956_v40 = vsel %vm10690_vm4, %v8187_v36, %v1955_v28  ;;  %v1959_v41 = vsel %vm10690_vm4, %v1957_v37, %v1958_v38  ;;  %v1350_v28 = vshll.u32 %v10672_v29, 16  ;;  %12844 = vst [vmem:[#allocation21_spill] sm:$0xff] %v10824_v33  ;;  %v2517_v36 = vshll.u32 %v10813_v30, 16  ;;  %v10832_v38 = vld [vmem:[#allocation2 + $0x14] sm:$0x1] }
  0xf3   : > { %9081 = vmatpush3.bf16.msra.mxu0 %v9951_v27  ;;  %v9956_v27 = vld [vmem:[%s12793_s1 + $0xf0] sm:$0xff]   ;;  %v8213_v57 = vcombine.low %v1956_v40, %v1959_v41  ;;  %12839 = vst [vmem:[#allocation16_spill] sm:$0xff] %v10799_v63  ;;  %v10830_v37 = vrot.slane %v1347_v17, 4  ;;  %v2521_v29 = vshrl.u32 %v10813_v30, 16  ;;  %v2513_v44 = vrot.slane %v2511_v32, 5  ;;  %v9967_v32 = vld [vmem:[#allocation2 + $0x48] sm:$0xff]  }
  0xf4   : > { %9082 = vmatprep.subr.bf16.mxu0 %v9952_v35  ;;  %v10835_v40 = vrot.slane %v1350_v28, 5  ;;  %v9964_v41 = vld [vmem:[%s12793_s1 + $0x110] sm:$0xff]   ;;  %v10840_v49 = vrot.slane %v2517_v36, 5  ;;  %v10854_v17 = vld [vmem:[#allocation2 + $0x28] sm:$0xf]  ;;  %v2551_v28 = vshll.u32 %v10848_v54, 16 }
  0xf5   : > { %12846 = vst [vmem:[#allocation23_spill] sm:$0xff] %v10830_v37  ;;  %v2523_v52 = vrot.slane %v2521_v29, 4  ;;  %v2623_v33 = vshll.u32 %v10916_v23, 16  ;;  %v11011_v63 = vld [vmem:[#allocation2 + $0x68] sm:$0x1] }
  0xf6   : > { %9063 = vmatmul.mubr.bf16.gmra.mrb[4].mxu0 %v8207_v45  ;;  %v9960_v45 = vld [vmem:[%s12793_s1 + $0x100] sm:$0xff]   ;;  %12847 = vst [vmem:[#allocation24_spill] sm:$0xff] %v10835_v40 }
  0xf7   : > { %9083 = vmatpush3.bf16.msra.mxu0 %v9952_v35  ;;  %9066 = vmatprep.mubr.bf16.mxu0 %v8208_v46  ;;  %v8212_v35 = vcombine.low %v1949_v25, %v1952_v31  ;;  %v9961_v25 = vld [vmem:[%s12793_s1 + $0x108] sm:$0xff]  }
  0xf8   : > { %9084 = vmatprep.subr.bf16.mxu0 %v9953_v50  ;;  %v9962_v31 = vld [vmem:[#allocation2 + $0x24] sm:$0xff]  }
  0xfb   : > { %9085 = vmatpush3.bf16.msra.mxu0 %v9953_v50  ;;  %v1230_v50 = vshll.u32 %v10624_v5, 16  ;;  %v10790_v5 = vrot.slane %v1206_v48, 5  ;;  %v9965_v48 = vld [vmem:[#allocation2 + $0x3c] sm:$0xff]  }
  0xfc   : > { %9086 = vmatprep.subr.bf16.mxu0 %v9954_v61 }
  0xfd   : > { %v10795_v60 = vrot.slane %v1230_v50, 5  ;;  %v2527_v50 = vshll.u32 %v10832_v38, 16 }
  0xfe   : > { %9067 = vmatmul.mubr.bf16.gmra.mrb[8].mxu0 %v8209_v7  ;;  %v1299_v7 = vshrl.u32 %v10656_v19, 16  ;;  %v9972_v19 = vld [vmem:[%s12793_s1 + $0x130] sm:$0xff]  }
  0xff   : > { %9087 = vmatpush3.bf16.msra.mxu0 %v9954_v61  ;;  %9070 = vmatprep.mubr.bf16.mxu0 %v8210_v9  ;;  %v10788_v61 = vrot.slane %v1203_v47, 4  ;;  %12837 = vst [vmem:[#allocation14_spill] sm:$0xff] %v10795_v60  ;;  %v10807_v9 = vrot.slane %v1278_v2, 5  ;;  %v9963_v47 = vld [vmem:[#allocation2 + $0x30] sm:$0xff]   ;;  %v10851_v15 = vrot.slane %v2527_v50, 5 }
 0x100   : > { %9088 = vmatprep.subr.bf16.mxu0 %v9955_v16  ;;  %v10815_v26 = vrot.slane %v1299_v7, 4  ;;  %v2541_v7 = vshll.u32 %v10843_v51, 16  ;;  %v2985_v60 = vld [vmem:[#allocation2 + $0xc] sm:$0xe] }
 0x101   : > { %12841 = vst [vmem:[#allocation18_spill] sm:$0xff] %v10807_v9  ;;  %v2501_v9 = vld [vmem:[#allocation2 + $0x6c] sm:$0xf] }
 0x102   : > { %12842 = vst [vmem:[#allocation19_spill] sm:$0xff] %v10815_v26  ;;  %v2625_v26 = vrot.slane %v2623_v33, 5  ;;  %v2498_v33 = vld [vmem:[#allocation2 + $0x60] sm:$0xf] }
 0x103   : > { %9089 = vmatpush3.bf16.msra.mxu0 %v9955_v16  ;;  %v1326_v16 = vshll.u32 %v10660_v22, 16  ;;  %v2508_v22 = vshrl.u32 %v2477_v24, 16 }
 0x104   : > { %9090 = vmatprep.subr.bf16.mxu0 %v9956_v27 }
 0x105   : > { %v2510_v42 = vrot.slane %v2508_v22, 4 }
 0x106   : > { %9071 = vmatmul.mubr.bf16.gmra.mrb[12].mxu0 %v8211_v34  ;;  %v10826_v34 = vrot.slane %v1326_v16, 5  ;;  %v2545_v16 = vshrl.u32 %v10843_v51, 16 }
 0x107   : > { %9074 = vmatprep.mubr.bf16.mxu0 %v8212_v35  ;;  %9091 = vmatpush3.bf16.msra.mxu0 %v9956_v27  ;;  %v10817_v27 = vrot.slane %v1302_v8, 5  ;;  %v2483_v8 = vld [vmem:[#allocation2 + $0x24] sm:$0xf] }
 0x108   : > { %9092 = vmatprep.subr.bf16.mxu0 %v9957_v43  ;;  %12845 = vst [vmem:[#allocation22_spill] sm:$0xff] %v10826_v34  ;;  %v2559_v22 = vshll.u32 %v2483_v8, 16 }
 0x109   : > { %12843 = vst [vmem:[#allocation20_spill] sm:$0xff] %v10817_v27 }
 0x10b   : > { %9093 = vmatpush3.bf16.msra.mxu0 %v9957_v43  ;;  %v2480_v43 = vld [vmem:[#allocation2 + $0x18] sm:$0xf] }
 0x10c   : > { %9114 = vmatprep.subr.bf16.mxu0 %v9960_v45  ;;  %v2535_v2 = vshll.u32 %v2480_v43, 16 }
 0x10e   : > { %9075 = vmatmul.mubr.bf16.gmra.mrb[16].mxu0 %v8213_v57  ;;  %v2532_v57 = vshrl.u32 %v2480_v43, 16  ;;  %v2537_v29 = vrot.slane %v2535_v2, 5  ;;  %v10863_v43 = vrot.slane %v2541_v7, 5  ;;  %v2569_v7 = vshrl.u32 %v10854_v17, 16 }
 0x10f   : > { %9094 = vmatprep.mubr.bf16.mxu0 %v9958_v55  ;;  %v2514_v55 = vor.u32 %v2513_v44, %v2510_v42  ;;  %v2565_v42 = vshll.u32 %v10854_v17, 16  ;;  %v9969_v44 = vld [vmem:[#allocation2 + $0x54] sm:$0xff]  }
 0x110   : > { %v2534_v24 = vrot.slane %v2532_v57, 4 }
 0x111   : > { %v10861_v36 = vrot.slane %v2514_v55, 4  ;;  %v2561_v55 = vrot.slane %v2559_v22, 5  ;;  %v10873_v2 = vrot.slane %v2565_v42, 5  ;;  %v2571_v22 = vrot.slane %v2569_v7, 4 }
 0x113   : > { %v2520_v46 = vsel %vm10890_vm7, %v10861_v36, %v10840_v49 }
 0x116   : > { %9095 = vmatmul.mubr.bf16.vlgmr.msra.gmra.mrb[0].mxu0 %v9959_v18  ;;  %v9968_v18 = vld [vmem:[%s12793_s1 + $0x120] sm:$0xff]  }
 0x117   : > { %9115 = vmatpush3.bf16.msra.mxu0 %v9960_v45  ;;  %9098 = vmatprep.mubr.bf16.mxu0 %v9962_v31  ;;  %v9966_v45 = vld [vmem:[%s12793_s1 + $0x118] sm:$0xff]   ;;  %v2556_v31 = vshrl.u32 %v2483_v8, 16 }
 0x118   : > { %9116 = vmatprep.subr.bf16.mxu0 %v9961_v25 }
 0x119   : > { %v2558_v57 = vrot.slane %v2556_v31, 4  ;;  %v2538_v31 = vor.u32 %v2537_v29, %v2534_v24  ;;  %v2593_v24 = vshrl.u32 %v10880_v12, 16 }
 0x11b   : > { %9117 = vmatpush3.bf16.msra.mxu0 %v9961_v25  ;;  %v2524_v25 = vor.u32 %v2523_v52, %v10840_v49  ;;  %v2547_v52 = vrot.slane %v2545_v16, 4  ;;  %v9970_v16 = vld [vmem:[#allocation2 + $0x60] sm:$0xff]   ;;  %v2562_v29 = vor.u32 %v2561_v55, %v2558_v57  ;;  %v10896_v10 = vrot.slane %v2538_v31, 4  ;;  %v2492_v31 = vld [vmem:[#allocation2 + $0x48] sm:$0xf]  ;;  %v9974_v49 = vld [vmem:[#allocation2 + $0x78] sm:$0xff]  }
 0x11c   : > { %9118 = vmatprep.subr.bf16.mxu0 %v9964_v41  ;;  %v2595_v37 = vrot.slane %v2593_v24, 4 }
 0x11d   : > { %v10871_v50 = vrot.slane %v2524_v25, 4  ;;  %v9973_v25 = vld [vmem:[#allocation2 + $0x6c] sm:$0xff]   ;;  %v2563_v36 = vrot.slane %v2562_v29, 4 }
 0x11e   : > { %9099 = vmatmul.mubr.bf16.gmra.mrb[4].mxu0 %v9963_v47  ;;  %v10866_v47 = vld [vmem:[#allocation2 + $0x2c] sm:$0x1] }
 0x11f   : > { %9119 = vmatpush3.bf16.msra.mxu0 %v9964_v41  ;;  %9102 = vmatprep.mubr.bf16.mxu0 %v9965_v48  ;;  %v9971_v41 = vld [vmem:[%s12793_s1 + $0x128] sm:$0xff]   ;;  %v2486_v48 = vld [vmem:[#allocation2 + $0x30] sm:$0xf]  ;;  %v2575_v8 = vshll.u32 %v10866_v47, 16  ;;  %v2530_v57 = vsel %vm10890_vm7, %v10871_v50, %v10851_v15  ;;  %v10921_v15 = vld [vmem:[%s12793_s1 + $0x140] sm:$0xff]   ;;  %v2572_v50 = vor.u32 %v2571_v22, %v10873_v2  ;;  %v2544_v22 = vsel %vm10890_vm7, %v10896_v10, %v10863_v43 }
 0x120   : > { %9120 = vmatprep.subr.bf16.mxu0 %v9966_v45  ;;  %v2580_v35 = vshrl.u32 %v2486_v48, 16  ;;  %v2583_v42 = vshll.u32 %v2486_v48, 16  ;;  %v8272_v24 = vcombine.low %v2520_v46, %v2530_v57  ;;  %v2568_v10 = vsel %vm10890_vm7, %v2563_v36, %v10873_v2 }
 0x121   : > { %v2573_v46 = vrot.slane %v2572_v50, 4 }
 0x122   : > { %v2582_v20 = vrot.slane %v2580_v35, 4 }
 0x123   : > { %9121 = vmatpush3.bf16.msra.mxu0 %v9966_v45  ;;  %v2489_v45 = vld [vmem:[#allocation2 + $0x3c] sm:$0xf] }
 0x124   : > { %9122 = vmatprep.subr.bf16.mxu0 %v9968_v18  ;;  %v2604_v48 = vshrl.u32 %v2489_v45, 16  ;;  %v2607_v7 = vshll.u32 %v2489_v45, 16  ;;  %v10910_v45 = vrot.slane %v2575_v8, 5 }
 0x126   : > { %9103 = vmatmul.mubr.bf16.gmra.mrb[8].mxu0 %v9967_v32  ;;  %v2548_v32 = vor.u32 %v2547_v52, %v10863_v43  ;;  %v10898_v52 = vrot.slane %v2551_v28, 5  ;;  %v10912_v28 = vld [vmem:[#allocation2 + $0x38] sm:$0x1]  ;;  %v2606_v8 = vrot.slane %v2604_v48, 4  ;;  %v2578_v2 = vsel %vm10890_vm7, %v2573_v46, %v10910_v45 }
 0x127   : > { %9123 = vmatpush3.bf16.msra.mxu0 %v9968_v18  ;;  %9106 = vmatprep.mubr.bf16.mxu0 %v9969_v44  ;;  %v2589_v44 = vshll.u32 %v10880_v12, 16  ;;  %v2599_v34 = vshll.u32 %v10912_v28, 16 }
 0x128   : > { %9124 = vmatprep.subr.bf16.mxu0 %v9971_v41  ;;  %v2549_v55 = vrot.slane %v2548_v32, 4  ;;  %v2628_v32 = vshrl.u32 %v2492_v31, 16 }
 0x129   : > { %v10914_v40 = vrot.slane %v2589_v44, 5  ;;  %v2631_v44 = vshll.u32 %v2492_v31, 16  ;;  %v2655_v31 = vshll.u32 %v2495_v21, 16  ;;  %v2601_v27 = vrot.slane %v2599_v34, 5 }
 0x12a   : > { %v2554_v29 = vsel %vm10890_vm7, %v2549_v55, %v10898_v52  ;;  %v2630_v52 = vrot.slane %v2628_v32, 4  ;;  %v2652_v55 = vshrl.u32 %v2495_v21, 16  ;;  %v10956_v32 = vld [vmem:[#allocation2 + $0x5c] sm:$0x1]  ;;  %v10012_v21 = vld [vmem:[%s12793_s1 + $0x40] sm:$0xff]  }
 0x12b   : > { %9125 = vmatpush3.bf16.msra.mxu0 %v9971_v41  ;;  %v2613_v41 = vshll.u32 %v10886_v1, 16  ;;  %v2657_v45 = vrot.slane %v2655_v31, 5  ;;  %8970 = vmatprep.subr.bf16.mxu1 %v10012_v21  ;;  %v2676_v31 = vshrl.u32 %v2498_v33, 16 }
 0x12c   : > { %9126 = vmatprep.subr.bf16.mxu0 %v9972_v19  ;;  %v2654_v14 = vrot.slane %v2652_v55, 4  ;;  %8971 = vmatpush3.bf16.msra.mxu1 %v10012_v21  ;;  %v2504_v21 = vld [vmem:[#allocation2 + $0x78] sm:$0xf] }
 0x12d   : > { %v10926_v35 = vrot.slane %v2613_v41, 5  ;;  %v2727_v11 = vshll.u32 %v2504_v21, 16 }
 0x12e   : > { %9107 = vmatmul.mubr.bf16.gmra.mrb[12].mxu0 %v9970_v16  ;;  %v2585_v16 = vrot.slane %v2583_v42, 5  ;;  %v2619_v42 = vrot.slane %v2617_v0, 4  ;;  %v2596_v0 = vor.u32 %v2595_v37, %v10914_v40  ;;  %v10947_v37 = vld [vmem:[#allocation2 + $0x50] sm:$0x1] }
 0x12f   : > { %9110 = vmatprep.mubr.bf16.mxu0 %v9973_v25  ;;  %9127 = vmatpush3.bf16.msra.mxu0 %v9972_v19  ;;  %v2609_v25 = vrot.slane %v2607_v7, 5  ;;  %v10924_v19 = vld [vmem:[#allocation2 + $0x4c] sm:$0xf]  ;;  %v10938_v7 = vld [vmem:[#allocation2 + $0x58] sm:$0xf]  ;;  %v2647_v34 = vshll.u32 %v10947_v37, 16 }
 0x130   : > { %9128 = vmatprep.subr.bf16.mxu0 %v9975_v13  ;;  %v2586_v48 = vor.u32 %v2585_v16, %v2582_v20  ;;  %v2641_v57 = vshrl.u32 %v10924_v19, 16  ;;  %v2620_v43 = vor.u32 %v2619_v42, %v10926_v35  ;;  %v2633_v20 = vrot.slane %v2631_v44, 5 }
 0x131   : > { %v2610_v41 = vor.u32 %v2609_v25, %v2606_v8  ;;  %v2661_v16 = vshll.u32 %v10938_v7, 16  ;;  %v2665_v50 = vshrl.u32 %v10938_v7, 16  ;;  %v2597_v25 = vrot.slane %v2596_v0, 4  ;;  %v10962_v0 = vld [vmem:[#allocation2 + $0x64] sm:$0xf] }
 0x132   : > { %v2587_v8 = vrot.slane %v2586_v48, 4  ;;  %v8273_v44 = vcombine.low %v2544_v22, %v2554_v29  ;;  %v2634_v48 = vor.u32 %v2633_v20, %v2630_v52  ;;  %v9977_v22 = vld [vmem:[%s12793_s1 + $0x148] sm:$0xff]   ;;  %v10979_v20 = vld [vmem:[#allocation2 + $0x70] sm:$0xf]  ;;  %v10983_v55 = vrot.slane %v2647_v34, 5 }
 0x133   : > { %9129 = vmatpush3.bf16.msra.mxu0 %v9975_v13  ;;  %v2637_v13 = vshll.u32 %v10924_v19, 16  ;;  %v2611_v36 = vrot.slane %v2610_v41, 4  ;;  %v10964_v46 = vrot.slane %v2661_v16, 5  ;;  %v2667_v41 = vrot.slane %v2665_v50, 4 }
 0x134   : > { %9150 = vmatprep.subr.bf16.mxu0 %v10921_v15  ;;  %v2602_v29 = vsel %vm10890_vm7, %v2597_v25, %v2601_v27  ;;  %v2679_v16 = vshll.u32 %v2498_v33, 16  ;;  %v10013_v27 = vld [vmem:[%s12793_s1 + $0x48] sm:$0xff]   ;;  %v10991_v50 = vrot.slane %v2634_v48, 4  ;;  %v2709_v48 = vshll.u32 %v10979_v20, 16 }
 0x135   : > { %v10954_v42 = vrot.slane %v2637_v13, 5  ;;  %v8274_v13 = vcombine.low %v2568_v10, %v2578_v2  ;;  %v2671_v10 = vshll.u32 %v10956_v32, 16  ;;  %v2668_v25 = vor.u32 %v2667_v41, %v10964_v46  ;;  %8972 = vmatprep.subr.bf16.mxu1 %v10013_v27 }
 0x136   : > { %9111 = vmatmul.mubr.bf16.gmra.mrb[16].mxu0 %v9974_v49  ;;  %v2643_v49 = vrot.slane %v2641_v57, 4  ;;  %v2592_v57 = vsel %vm10890_vm7, %v2587_v8, %v10914_v40  ;;  %v2658_v8 = vor.u32 %v2657_v45, %v2654_v14  ;;  %v2689_v2 = vshrl.u32 %v10962_v0, 16  ;;  %8973 = vmatpush3.bf16.msra.mxu1 %v10013_v27 }
 0x137   : > { %9130 = vmatprep.mubr.bf16.mxu0 %v8272_v24  ;;  %v2621_v24 = vrot.slane %v2620_v43, 4  ;;  %v2616_v43 = vsel %vm10890_vm7, %v2611_v36, %v10926_v35  ;;  %v9978_v35 = vld [vmem:[%s12793_s1 + $0x150] sm:$0xff]   ;;  %v2700_v36 = vshrl.u32 %v2501_v9, 16  ;;  %v11002_v14 = vrot.slane %v2671_v10, 5 }
 0x138   : > { %v2644_v52 = vor.u32 %v2643_v49, %v10954_v42  ;;  %v2703_v49 = vshll.u32 %v2501_v9, 16  ;;  %v2713_v34 = vshrl.u32 %v10979_v20, 16  ;;  %v2678_v45 = vrot.slane %v2676_v31, 4  ;;  %v11006_v9 = vld [vmem:[#allocation2 + $0x7c] sm:$0xf] }
 0x139   : > { %v2626_v40 = vsel %vm10890_vm7, %v2621_v24, %v2625_v26  ;;  %v2685_v26 = vshll.u32 %v10962_v0, 16  ;;  %v2681_v41 = vrot.slane %v2679_v16, 5  ;;  %v2669_v4 = vrot.slane %v2668_v25, 4  ;;  %v11021_v25 = vld [vmem:[#allocation2 + $0x60] sm:$0xf] }
 0x13a   : > { %v11000_v24 = vrot.slane %v2644_v52, 4  ;;  %v8276_v33 = vcombine.low %v2616_v43, %v2626_v40  ;;  %v2659_v52 = vrot.slane %v2658_v8, 4  ;;  %v2724_v10 = vshrl.u32 %v2504_v21, 16  ;;  %v11015_v40 = vld [vmem:[#allocation2 + $0x74] sm:$0x1] }
 0x13b   : > { %v11013_v62 = vrot.slane %v2685_v26, 5  ;;  %v2705_v43 = vrot.slane %v2703_v49, 5  ;;  %v11017_v31 = vrot.slane %v2709_v48, 5  ;;  %v2715_v16 = vrot.slane %v2713_v34, 4  ;;  %v10017_v49 = vld [vmem:[%s12793_s1 + $0x58] sm:$0xff]  }
 0x13c   : > { %v2733_v27 = vshll.u32 %v11006_v9, 16  ;;  %v2737_v8 = vshrl.u32 %v11006_v9, 16  ;;  %v2640_v26 = vsel %vm10890_vm7, %v10991_v50, %v10954_v42  ;;  %v2664_v21 = vsel %vm10890_vm7, %v2659_v52, %v10964_v46  ;;  %v10019_v46 = vld [vmem:[%s12793_s1 + $0x60] sm:$0xff]  }
 0x13d   : > { %v2695_v48 = vshll.u32 %v11011_v63, 16  ;;  %v2726_v34 = vrot.slane %v2724_v10, 4  ;;  %v2729_v42 = vrot.slane %v2727_v11, 5  ;;  %v2674_v50 = vsel %vm10890_vm7, %v2669_v4, %v11002_v14  ;;  %v11057_v14 = vld [vmem:[#allocation2 + $0x6c] sm:$0xf] }
 0x13e   : > { %9131 = vmatmul.mubr.bf16.vlgmr.msra.gmra.mrb[0].mxu0 %v8273_v44  ;;  %v10015_v44 = vld [vmem:[%s12793_s1 + $0x50] sm:$0xff]   ;;  %v2716_v11 = vor.u32 %v2715_v16, %v11017_v31  ;;  %v1395_v52 = vshrl.u32 %v11057_v14, 16  ;;  %v3027_v4 = vrot.slane %v10813_v30, 5  ;;  %v9981_v10 = vld [vmem:[%s12793_s1 + $0x168] sm:$0xff]  }
 0x13f   : > { %9151 = vmatpush3.bf16.msra.mxu0 %v10921_v15  ;;  %9134 = vmatprep.mubr.bf16.mxu0 %v8274_v13  ;;  %v8275_v15 = vcombine.low %v2592_v57, %v2602_v29  ;;  %v9979_v13 = vld [vmem:[%s12793_s1 + $0x158] sm:$0xff]   ;;  %v2691_v57 = vrot.slane %v2689_v2, 4  ;;  %v2702_v29 = vrot.slane %v2700_v36, 4  ;;  %v2650_v2 = vsel %vm10890_vm7, %v11000_v24, %v10983_v55  ;;  %v9980_v55 = vld [vmem:[%s12793_s1 + $0x160] sm:$0xff]   ;;  %v9982_v30 = vld [vmem:[%s12793_s1 + $0x170] sm:$0xff]  }
 0x140   : > { %9152 = vmatprep.subr.bf16.mxu0 %v9977_v22  ;;  %8974 = vmatprep.subr.bf16.mxu1 %v10015_v44  ;;  %v2682_v36 = vor.u32 %v2681_v41, %v2678_v45  ;;  %v1374_v45 = vshll.u32 %v11021_v25, 16  ;;  %v11054_v41 = vld [vmem:[#allocation2 + $0x64] sm:$0xf] }
 0x141   : > { %8975 = vmatpush3.bf16.msra.mxu1 %v10015_v44  ;;  %v2692_v44 = vor.u32 %v2691_v57, %v11013_v62  ;;  %v2706_v24 = vor.u32 %v2705_v43, %v2702_v29  ;;  %12850 = vst [vmem:[#allocation25_spill] sm:$0xff] %v11054_v41  ;;  %v11061_v57 = vld [vmem:[#allocation2 + $0x80] sm:$0x1]  ;;  %v8277_v29 = vcombine.low %v2640_v26, %v2650_v2  ;;  %v2717_v41 = vrot.slane %v2716_v11, 4 }
 0x142   : > { %8976 = vmatprep.subr.bf16.mxu1 %v10017_v49  ;;  %v8278_v43 = vcombine.low %v2664_v21, %v2674_v50  ;;  %v2683_v16 = vrot.slane %v2682_v36, 4  ;;  %v2743_v2 = vshll.u32 %v11061_v57, 16  ;;  %v3029_v50 = vrot.slane %v3027_v4, 4 }
 0x143   : > { %9153 = vmatpush3.bf16.msra.mxu0 %v9977_v22  ;;  %v1371_v22 = vshrl.u32 %v11021_v25, 16  ;;  %v2697_v25 = vrot.slane %v2695_v48, 5  ;;  %v2707_v6 = vrot.slane %v2706_v24, 4  ;;  %v8290_v48 = vrot.slane %v2985_v60, 9  ;;  %v10021_v60 = vld [vmem:[%s12793_s1 + $0x68] sm:$0xff]  }
 0x144   : > { %9154 = vmatprep.subr.bf16.mxu0 %v9978_v35  ;;  %v2745_v24 = vrot.slane %v2743_v2, 5  ;;  %v3037_v11 = vrot.slane %v10848_v54, 5 }
 0x145   : > { %8977 = vmatpush3.bf16.msra.mxu1 %v10017_v49  ;;  %v11069_v36 = vrot.slane %v1371_v22, 4  ;;  %v3034_v49 = vrot.slane %v10843_v51, 5  ;;  %v2688_v22 = vsel %vm10890_vm7, %v2683_v16, %v11013_v62  ;;  %v2712_v51 = vsel %vm10890_vm7, %v2707_v6, %v11017_v31 }
 0x146   : > { %9135 = vmatmul.mubr.bf16.gmra.mrb[4].mxu0 %v8275_v15  ;;  %v2719_v15 = vshll.u32 %v11015_v40, 16  ;;  %8978 = vmatprep.subr.bf16.mxu1 %v10019_v46  ;;  %v3041_v62 = vrot.slane %v10854_v17, 5  ;;  %v2988_v17 = vld [vmem:[#allocation2 + $0x30] sm:$0xe] }
 0x147   : > { %9155 = vmatpush3.bf16.msra.mxu0 %v9978_v35  ;;  %9138 = vmatprep.mubr.bf16.mxu0 %v8276_v33  ;;  %v11051_v35 = vrot.slane %v2733_v27, 5  ;;  %v2739_v33 = vrot.slane %v2737_v8, 4  ;;  %v2730_v27 = vor.u32 %v2729_v42, %v2726_v34  ;;  %v2693_v8 = vrot.slane %v2692_v44, 4  ;;  %v2987_v44 = vld [vmem:[#allocation2 + $0x24] sm:$0xe] }
 0x148   : > { %9156 = vmatprep.subr.bf16.mxu0 %v9979_v13  ;;  %v2721_v59 = vrot.slane %v2719_v15, 5  ;;  %v3030_v34 = vrot.slane %v10832_v38, 5  ;;  %v10022_v15 = vld [vmem:[%s12793_s1 + $0x70] sm:$0xff]   ;;  %v3036_v31 = vrot.slane %v3034_v49, 4  ;;  %v8293_v2 = vrot.slane %v2988_v17, 9 }
 0x149   : > { %v2740_v26 = vor.u32 %v2739_v33, %v11051_v35  ;;  %8979 = vmatpush3.bf16.msra.mxu1 %v10019_v46  ;;  %v2731_v21 = vrot.slane %v2730_v27, 4  ;;  %v2698_v42 = vsel %vm10890_vm7, %v2693_v8, %v2697_v25  ;;  %v11093_v46 = vrot.slane %v1374_v45, 5  ;;  %v11096_v33 = vld [vmem:[#allocation2 + $0x70] sm:$0xf]  ;;  %v2989_v25 = vld [vmem:[#allocation2 + $0x3c] sm:$0xe] }
 0x14a   : > { %v2722_v38 = vsel %vm10890_vm7, %v2717_v41, %v2721_v59  ;;  %8980 = vmatprep.subr.bf16.mxu1 %v10021_v60  ;;  %v8279_v59 = vcombine.low %v2688_v22, %v2698_v42  ;;  %v11101_v41 = vsel %vm10690_vm4, %v8290_v48, %v3027_v4  ;;  %v11104_v45 = vrot.slane %v1395_v52, 4  ;;  %v10126_v22 = vld [vmem:[#allocation2 + $0x4] sm:$0xf] }
 0x14b   : > { %9157 = vmatpush3.bf16.msra.mxu0 %v9979_v13  ;;  %v2986_v13 = vld [vmem:[#allocation2 + $0x18] sm:$0xe]  ;;  %v8280_v16 = vcombine.low %v2712_v51, %v2722_v38  ;;  %v2736_v54 = vsel %vm10890_vm7, %v2731_v21, %v11051_v35  ;;  %v11111_v27 = vsel %vm10690_vm4, %v3029_v50, %v3030_v34  ;;  %v8292_v52 = vrot.slane %v2987_v44, 9  ;;  %v2991_v38 = vld [vmem:[#allocation2 + $0x54] sm:$0xe] }
 0x14c   : > { %9158 = vmatprep.subr.bf16.mxu0 %v9980_v55  ;;  %v8291_v6 = vrot.slane %v2986_v13, 9  ;;  %v3044_v8 = vrot.slane %v10866_v47, 5  ;;  %v3055_v13 = vrot.slane %v10886_v1, 5  ;;  %v12851_v21 = vshll.u32 %v11057_v14, 16  ;;  %v11141_v14 = vld [vmem:[%s12793_s1 + $0x180] sm:$0xff]  }
 0x14d   : > { %8981 = vmatpush3.bf16.msra.mxu1 %v10021_v60  ;;  %v3051_v47 = vrot.slane %v10912_v28, 5  ;;  %v1188_v42 = vshll.u32 %v10126_v22, 16  ;;  %v8316_v1 = vcombine.low %v11101_v41, %v11111_v27  ;;  %v8294_v50 = vrot.slane %v2989_v25, 9  ;;  %v2990_v28 = vld [vmem:[#allocation2 + $0x48] sm:$0xe] }
 0x14e   : > { %9139 = vmatmul.mubr.bf16.gmra.mrb[8].mxu0 %v8277_v29  ;;  %8982 = vmatprep.subr.bf16.mxu1 %v10022_v15  ;;  %v11121_v35 = vsel %vm10690_vm4, %v8291_v6, %v3034_v49  ;;  %v11130_v48 = vrot.slane %v12851_v21, 5  ;;  %v10024_v49 = vld [vmem:[%s12793_s1 + $0x78] sm:$0xff]   ;;  %v11147_v60 = vsel %vm10690_vm4, %v8292_v52, %v3041_v62  ;;  %v3062_v6 = vrot.slane %v10924_v19, 5  ;;  %v10127_v27 = vld [vmem:[#allocation2 + $0x8] sm:$0x1] }
 0x14f   : > { %9159 = vmatpush3.bf16.msra.mxu0 %v9980_v55  ;;  %9142 = vmatprep.mubr.bf16.mxu0 %v8278_v43  ;;  %v2741_v55 = vrot.slane %v2740_v26, 4  ;;  %v3048_v43 = vrot.slane %v10880_v12, 5  ;;  %v9983_v12 = vld [vmem:[%s12793_s1 + $0x178] sm:$0xff]   ;;  %v11125_v26 = vsel %vm10690_vm4, %v3036_v31, %v3037_v11  ;;  %v1185_v11 = vor.u32 %v10784_v53, %v10782_v56 }
 0x150   : > { %9160 = vmatprep.subr.bf16.mxu0 %v9981_v10  ;;  %v8317_v44 = vcombine.low %v11121_v35, %v11125_v26  ;;  %v8295_v19 = vrot.slane %v2990_v28, 9  ;;  %v3065_v17 = vrot.slane %v10947_v37, 5  ;;  %v12852_v53 = vshrl.u32 %v10601_v58, 16  ;;  %v11253_v26 = vld [vmem:[#allocation2 + $0x1c] sm:$0xf] }
 0x151   : > { %v2746_v4 = vsel %vm10890_vm7, %v2741_v55, %v2745_v24  ;;  %v3050_v34 = vrot.slane %v3048_v43, 4  ;;  %8983 = vmatpush3.bf16.msra.mxu1 %v10022_v15  ;;  %v11155_v55 = vsel %vm10690_vm4, %v8293_v2, %v3048_v43  ;;  %v3057_v24 = vrot.slane %v3055_v13, 4  ;;  %v11173_v43 = vld [vmem:[#allocation2 + $0x60] sm:$0xe]  ;;  %v10132_v37 = vld [vmem:[#allocation2 + $0x28] sm:$0xf] }
 0x152   : > { %v8281_v51 = vcombine.low %v2736_v54, %v2746_v4  ;;  %8984 = vmatprep.subr.bf16.mxu1 %v10024_v49  ;;  %v3058_v15 = vrot.slane %v10916_v23, 5  ;;  %v11170_v23 = vsel %vm10690_vm4, %v8294_v50, %v3055_v13  ;;  %v1186_v56 = vrot.slane %v1185_v11, 4  ;;  %v9985_v11 = vld [vmem:[%s12793_s1 + $0x188] sm:$0xff]  }
 0x153   : > { %9161 = vmatpush3.bf16.msra.mxu0 %v9981_v10  ;;  %v3043_v10 = vrot.slane %v3041_v62, 4  ;;  %v11161_v31 = vsel %vm10690_vm4, %v3050_v34, %v3051_v47  ;;  %v3069_v62 = vrot.slane %v10938_v7, 5  ;;  %v8296_v7 = vrot.slane %v2991_v38, 9 }
 0x154   : > { %9162 = vmatprep.subr.bf16.mxu0 %v9982_v30  ;;  %v1194_v54 = vrot.slane %v12852_v53, 4  ;;  %v1198_v4 = vshll.u32 %v10127_v27, 16  ;;  %v11184_v52 = vsel %vm10690_vm4, %v3057_v24, %v3058_v15  ;;  %v3072_v2 = vrot.slane %v10956_v32, 5  ;;  %v11198_v24 = vld [vmem:[#allocation2 + $0x78] sm:$0xe] }
 0x155   : > { %8985 = vmatpush3.bf16.msra.mxu1 %v10024_v49  ;;  %v3071_v25 = vrot.slane %v3069_v62, 4  ;;  %v8297_v21 = vrot.slane %v11173_v43, 9  ;;  %v3076_v34 = vrot.slane %v10962_v0, 5  ;;  %v10128_v49 = vld [vmem:[#allocation2 + $0x10] sm:$0xf]  ;;  %v3079_v32 = vrot.slane %v11011_v63, 5 }
 0x156   : > { %9143 = vmatmul.mubr.bf16.gmra.mrb[12].mxu0 %v8279_v59  ;;  %v1190_v59 = vrot.slane %v1188_v42, 5  ;;  %v1200_v58 = vrot.slane %v1198_v4, 5  ;;  %v1212_v22 = vshll.u32 %v10128_v49, 16  ;;  %v3083_v38 = vrot.slane %v10979_v20, 5  ;;  %v12854_v49 = vld [vmem:[#allocation13_spill] sm:$0xff] }
 0x157   : > { %9146 = vmatprep.mubr.bf16.mxu0 %v8280_v16  ;;  %9163 = vmatpush3.bf16.msra.mxu0 %v9982_v30  ;;  %v11151_v30 = vsel %vm10690_vm4, %v3043_v10, %v3044_v8  ;;  %v11176_v16 = vld [vmem:[#allocation2 + $0x6c] sm:$0xe]  ;;  %v3064_v10 = vrot.slane %v3062_v6, 4  ;;  %v1209_v8 = vor.u32 %v10790_v5, %v10788_v61  ;;  %v12853_v61 = vshrl.u32 %v10619_v3, 16  ;;  %v11298_v0 = vld [vmem:[#allocation2 + $0x28] sm:$0xf] }
 0x158   : > { %9164 = vmatprep.subr.bf16.mxu0 %v9983_v12  ;;  %v8318_v41 = vcombine.low %v11147_v60, %v11151_v30  ;;  %v1195_v13 = vor.u32 %v1194_v54, %v1190_v59  ;;  %v1191_v47 = vsel %vm10890_vm7, %v1186_v56, %v1190_v59  ;;  %v1214_v15 = vrot.slane %v1212_v22, 5  ;;  %v12855_v22 = vld [vmem:[#allocation14_spill] sm:$0xff]  ;;  %v12858_v60 = vld [vmem:[#allocation15_spill] sm:$0xff]  ;;  %v12859_v30 = vld [vmem:[#allocation16_spill] sm:$0xff] }
 0x159   : > { %v1210_v50 = vrot.slane %v1209_v8, 4  ;;  %v1218_v5 = vrot.slane %v12853_v61, 4  ;;  %v11205_v59 = vsel %vm10690_vm4, %v8295_v19, %v3062_v6  ;;  %v3090_v3 = vrot.slane %v11006_v9, 5  ;;  %v3612_v19 = vld [vmem:[#allocation2 + $0x18] sm:$0xf] }
 0x15a   : > { %v1196_v42 = vrot.slane %v1195_v13, 4  ;;  %v8320_v54 = vcombine.low %v11170_v23, %v11184_v52  ;;  %v11214_v27 = vsel %vm10690_vm4, %v8296_v7, %v3069_v62  ;;  %v11218_v13 = vrot.slane %v3076_v34, 4  ;;  %v12856_v7 = vld [vmem:[#allocation7_spill] sm:$0xff]  ;;  %v10136_v63 = vld [vmem:[#allocation2 + $0x40] sm:$0xf] }
 0x15b   : > { %9165 = vmatpush3.bf16.msra.mxu0 %v9983_v12  ;;  %v8319_v12 = vcombine.low %v11155_v55, %v11161_v31  ;;  %v1219_v8 = vor.u32 %v1218_v5, %v1214_v15  ;;  %v3086_v6 = vrot.slane %v11015_v40, 5  ;;  %v11251_v35 = vsel %vm10690_vm4, %v3064_v10, %v3065_v17  ;;  %v12862_v31 = vld [vmem:[#allocation17_spill] sm:$0xff]  ;;  %v11411_v9 = vld [vmem:[#allocation2 + $0x34] sm:$0xf] }
 0x15c   : > { %9186 = vmatprep.subr.bf16.mxu0 %v11141_v14  ;;  %v1201_v56 = vsel %vm10890_vm7, %v1196_v42, %v1200_v58  ;;  %v1215_v58 = vsel %vm10890_vm7, %v1210_v50, %v1214_v15  ;;  %v1233_v42 = vor.u32 %v12855_v22, %v12854_v49  ;;  %v9986_v50 = vld [vmem:[%s12793_s1 + $0x190] sm:$0xff]   ;;  %v11235_v15 = vrot.slane %v3083_v38, 4 }
 0x15d   : > { %v8142_v4 = vcombine.low %v1191_v47, %v1201_v56  ;;  %v1220_v61 = vrot.slane %v1219_v8, 4  ;;  %v12857_v47 = vshrl.u32 %v12856_v7, 16  ;;  %v11240_v8 = vrot.slane %v3090_v3, 4  ;;  %v11257_v7 = vld [vmem:[#allocation2 + $0x20] sm:$0x1]  ;;  %v12860_v49 = vld [vmem:[#allocation8_spill] sm:$0xff] }
 0x15e   : > { %9147 = vmatmul.mubr.bf16.gmra.mrb[16].mxu0 %v8281_v51  ;;  %v10129_v51 = vld [vmem:[#allocation2 + $0x14] sm:$0x1]  ;;  %v1234_v22 = vrot.slane %v1233_v42, 4  ;;  %v11263_v17 = vsel %vm10690_vm4, %v3071_v25, %v3072_v2  ;;  %v8321_v25 = vcombine.low %v11205_v59, %v11251_v35  ;;  %v3652_v2 = vshll.u32 %v11253_v26, 16 }
 0x15f   : > { %9166 = vmatprep.mubr.bf16.mxu0 %v8316_v1  ;;  %v1222_v28 = vshll.u32 %v10129_v51, 16  ;;  %v8298_v1 = vrot.slane %v11176_v16, 9  ;;  %8986 = vmatprep.mubr.bf16.mxu1 %v8142_v4  ;;  %v10130_v51 = vld [vmem:[#allocation2 + $0x1c] sm:$0xf]  ;;  %v1242_v5 = vrot.slane %v12857_v47, 4  ;;  %v8299_v4 = vrot.slane %v11198_v24, 9 }
 0x160   : > { %v1236_v62 = vshll.u32 %v10130_v51, 16  ;;  %v3662_v35 = vshll.u32 %v11257_v7, 16  ;;  %v11329_v20 = vsel %vm10690_vm4, %v11218_v13, %v3079_v32  ;;  %v11346_v13 = vsel %vm10690_vm4, %v11235_v15, %v3086_v6 }
 0x161   : > { %v1224_v53 = vrot.slane %v1222_v28, 5  ;;  %v10131_v28 = vld [vmem:[#allocation2 + $0x20] sm:$0x1]  ;;  %v11319_v23 = vsel %vm10690_vm4, %v8298_v1, %v3083_v38  ;;  %v9989_v1 = vld [vmem:[%s12793_s1 + $0x1a8] sm:$0xff]  }
 0x162   : > { %v1246_v56 = vshll.u32 %v10131_v28, 16  ;;  %v1238_v51 = vrot.slane %v1236_v62, 5  ;;  %v1260_v28 = vshll.u32 %v10132_v37, 16  ;;  %v3646_v62 = vshll.u32 %v3612_v19, 16  ;;  %v11334_v38 = vld [vmem:[#allocation2 + $0x2c] sm:$0x1] }
 0x163   : > { %v11352_v40 = vrot.slane %v3662_v35, 5 }
 0x164   : > { %v1243_v10 = vor.u32 %v1242_v5, %v1238_v51  ;;  %v1248_v29 = vrot.slane %v1246_v56, 5  ;;  %v11273_v5 = vld [vmem:[#allocation2 + $0x24] sm:$0xf]  ;;  %v1239_v56 = vsel %vm10890_vm7, %v1234_v22, %v1238_v51  ;;  %v10134_v51 = vld [vmem:[#allocation2 + $0x34] sm:$0xf] }
 0x165   : > { %v3667_v55 = vshrl.u32 %v11273_v5, 16  ;;  %v1284_v7 = vshll.u32 %v10134_v51, 16  ;;  %v3670_v52 = vshll.u32 %v11273_v5, 16  ;;  %v12868_v5 = vld [vmem:[#allocation10_spill] sm:$0xff] }
 0x166   : > { %9167 = vmatmul.mubr.bf16.vlgmr.msra.gmra.mrb[0].mxu0 %v8317_v44  ;;  %v1225_v44 = vsel %vm10890_vm7, %v1220_v61, %v1224_v53  ;;  %v12861_v53 = vshrl.u32 %v12860_v49, 16  ;;  %v9987_v61 = vld [vmem:[%s12793_s1 + $0x198] sm:$0xff]   ;;  %v1244_v49 = vrot.slane %v1243_v10, 4 }
 0x167   : > { %9187 = vmatpush3.bf16.msra.mxu0 %v11141_v14  ;;  %9170 = vmatprep.mubr.bf16.mxu0 %v8318_v41  ;;  %v3643_v14 = vshrl.u32 %v3612_v19, 16  ;;  %v8143_v47 = vcombine.low %v1215_v58, %v1225_v44  ;;  %v1257_v41 = vor.u32 %v12859_v30, %v12858_v60  ;;  %v1262_v44 = vrot.slane %v1260_v28, 5  ;;  %v10133_v60 = vld [vmem:[#allocation2 + $0x2c] sm:$0x1] }
 0x168   : > { %9188 = vmatprep.subr.bf16.mxu0 %v9985_v11  ;;  %v1266_v42 = vrot.slane %v12861_v53, 4  ;;  %v1270_v30 = vshll.u32 %v10133_v60, 16  ;;  %v8322_v19 = vcombine.low %v11214_v27, %v11263_v17  ;;  %v1249_v22 = vsel %vm10890_vm7, %v1244_v49, %v1248_v29  ;;  %v9988_v29 = vld [vmem:[%s12793_s1 + $0x1a0] sm:$0xff]  }
 0x169   : > { %8987 = vmatmul.mubr.bf16.vlgmr.msra.gmra.mrb[0].mxu1 %v8143_v47  ;;  %v1258_v58 = vrot.slane %v1257_v41, 4  ;;  %v3656_v47 = vshrl.u32 %v11253_v26, 16  ;;  %v11288_v59 = vrot.slane %v3643_v14, 4  ;;  %v11296_v27 = vrot.slane %v3646_v62, 5  ;;  %v12864_v14 = vld [vmem:[#allocation9_spill] sm:$0xff] }
 0x16a   : > { %v1267_v41 = vor.u32 %v1266_v42, %v1262_v44  ;;  %v1272_v37 = vrot.slane %v1270_v30, 5  ;;  %v8144_v43 = vcombine.low %v1239_v56, %v1249_v22  ;;  %v12865_v28 = vshrl.u32 %v12864_v14, 16  ;;  %v12871_v14 = vld [vmem:[#allocation22_spill] sm:$0xff] }
 0x16b   : > { %9189 = vmatpush3.bf16.msra.mxu0 %v9985_v11  ;;  %v11286_v11 = vsel %vm10690_vm4, %v8297_v21, %v3076_v34  ;;  %v1263_v21 = vsel %vm10890_vm7, %v1258_v58, %v1262_v44  ;;  %v1286_v42 = vrot.slane %v1284_v7, 5  ;;  %v3676_v62 = vshll.u32 %v11298_v0, 16  ;;  %v12866_v58 = vld [vmem:[#allocation19_spill] sm:$0xff]  ;;  %v12867_v44 = vld [vmem:[#allocation20_spill] sm:$0xff] }
 0x16c   : > { %9190 = vmatprep.subr.bf16.mxu0 %v9986_v50  ;;  %v1268_v34 = vrot.slane %v1267_v41, 4  ;;  %v1290_v17 = vrot.slane %v12865_v28, 4  ;;  %8990 = vmatprep.mubr.bf16.mxu1 %v8144_v43  ;;  %v1305_v60 = vor.u32 %v12867_v44, %v12866_v58  ;;  %v1308_v30 = vshll.u32 %v10136_v63, 16 }
 0x16d   : > { %v12869_v56 = vshrl.u32 %v12868_v5, 16  ;;  %v11348_v43 = vrot.slane %v3652_v2, 5  ;;  %v11361_v7 = vrot.slane %v3676_v62, 5  ;;  %v12875_v5 = vld [vmem:[#allocation24_spill] sm:$0xff] }
 0x16e   : > { %9171 = vmatmul.mubr.bf16.gmra.mrb[4].mxu0 %v8319_v12  ;;  %v12863_v12 = vld [vmem:[#allocation18_spill] sm:$0xff]  ;;  %v1291_v49 = vor.u32 %v1290_v17, %v1286_v42  ;;  %v8323_v17 = vcombine.low %v11286_v11, %v11329_v20  ;;  %v10139_v11 = vld [vmem:[#allocation2 + $0x50] sm:$0x1] }
 0x16f   : > { %9191 = vmatpush3.bf16.msra.mxu0 %v9986_v50  ;;  %9174 = vmatprep.mubr.bf16.mxu0 %v8320_v54  ;;  %v1281_v26 = vor.u32 %v12863_v12, %v12862_v31  ;;  %v1273_v54 = vsel %vm10890_vm7, %v1268_v34, %v1272_v37  ;;  %v10135_v50 = vld [vmem:[#allocation2 + $0x38] sm:$0x1]  ;;  %v1314_v32 = vrot.slane %v12869_v56, 4  ;;  %v10137_v37 = vld [vmem:[#allocation2 + $0x44] sm:$0x1]  ;;  %v1306_v34 = vrot.slane %v1305_v60, 4 }
 0x170   : > { %9192 = vmatprep.subr.bf16.mxu0 %v9987_v61  ;;  %v1294_v10 = vshll.u32 %v10135_v50, 16  ;;  %v8145_v16 = vcombine.low %v1263_v21, %v1273_v54  ;;  %v1318_v22 = vshll.u32 %v10137_v37, 16  ;;  %v3658_v21 = vrot.slane %v3656_v47, 4  ;;  %v10138_v54 = vld [vmem:[#allocation2 + $0x4c] sm:$0xf]  ;;  %v12876_v37 = vld [vmem:[#allocation12_spill] sm:$0xff] }
 0x171   : > { %v1282_v53 = vrot.slane %v1281_v26, 4  ;;  %v1310_v31 = vrot.slane %v1308_v30, 5  ;;  %v1292_v15 = vrot.slane %v1291_v49, 4  ;;  %v11356_v12 = vrot.slane %v3667_v55, 4  ;;  %v12874_v30 = vld [vmem:[#allocation23_spill] sm:$0xff] }
 0x172   : > { %8991 = vmatmul.mubr.bf16.gmra.mrb[4].mxu1 %v8145_v16  ;;  %v1296_v41 = vrot.slane %v1294_v10, 5  ;;  %v3680_v26 = vshrl.u32 %v11298_v0, 16  ;;  %v1320_v2 = vrot.slane %v1318_v22, 5  ;;  %v11359_v47 = vrot.slane %v3670_v52, 5  ;;  %v12872_v10 = vld [vmem:[#allocation11_spill] sm:$0xff] }
 0x173   : > { %9193 = vmatpush3.bf16.msra.mxu0 %v9987_v61  ;;  %v3649_v61 = vor.u32 %v11296_v27, %v11288_v59  ;;  %v1287_v6 = vsel %vm10890_vm7, %v1282_v53, %v1286_v42  ;;  %v1315_v51 = vor.u32 %v1314_v32, %v1310_v31  ;;  %v3686_v59 = vshll.u32 %v11334_v38, 16  ;;  %v9991_v42 = vld [vmem:[%s12793_s1 + $0x1b8] sm:$0xff]  }
 0x174   : > { %9194 = vmatprep.subr.bf16.mxu0 %v9988_v29  ;;  %v1297_v35 = vsel %vm10890_vm7, %v1292_v15, %v1296_v41  ;;  %v1311_v55 = vsel %vm10890_vm7, %v1306_v34, %v1310_v31  ;;  %v8324_v52 = vcombine.low %v11319_v23, %v11346_v13  ;;  %v1332_v50 = vshll.u32 %v10138_v54, 16  ;;  %v3618_v23 = vld [vmem:[#allocation2 + $0x30] sm:$0xf]  ;;  %v10140_v32 = vld [vmem:[#allocation2 + $0x58] sm:$0xf] }
 0x175   : > { %v8146_v27 = vcombine.low %v1287_v6, %v1297_v35  ;;  %v12873_v16 = vshrl.u32 %v12872_v10, 16  ;;  %v3659_v62 = vor.u32 %v3658_v21, %v11348_v43  ;;  %v1342_v20 = vshll.u32 %v10139_v11, 16  ;;  %v10141_v34 = vld [vmem:[#allocation2 + $0x5c] sm:$0x1]  ;;  %v11405_v35 = vld [vmem:[%s12793_s1 + $0x1c0] sm:$0xff]  }
 0x176   : > { %9175 = vmatmul.mubr.bf16.gmra.mrb[8].mxu0 %v8321_v25  ;;  %v9990_v25 = vld [vmem:[%s12793_s1 + $0x1b0] sm:$0xff]   ;;  %v1334_v63 = vrot.slane %v1332_v50, 5  ;;  %v1353_v56 = vor.u32 %v12875_v5, %v12874_v30  ;;  %v1356_v13 = vshll.u32 %v10140_v32, 16  ;;  %v11387_v49 = vrot.slane %v3649_v61, 4  ;;  %v11422_v54 = vld [vmem:[#allocation2 + $0x38] sm:$0x1] }
 0x177   : > { %9195 = vmatpush3.bf16.msra.mxu0 %v9988_v29  ;;  %9178 = vmatprep.mubr.bf16.mxu0 %v8322_v19  ;;  %v1316_v29 = vrot.slane %v1315_v51, 4  ;;  %v12870_v19 = vld [vmem:[#allocation21_spill] sm:$0xff]  ;;  %v1338_v53 = vrot.slane %v12873_v16, 4  ;;  %v1344_v41 = vrot.slane %v1342_v20, 5  ;;  %v12877_v22 = vshrl.u32 %v12876_v37, 16 }
 0x178   : > { %9196 = vmatprep.subr.bf16.mxu0 %v9989_v1  ;;  %v1329_v28 = vor.u32 %v12871_v14, %v12870_v19  ;;  %8994 = vmatprep.mubr.bf16.mxu1 %v8146_v27  ;;  %v1366_v31 = vshll.u32 %v10141_v34, 16  ;;  %v1358_v15 = vrot.slane %v1356_v13, 5  ;;  %v3091_v51 = vsel %vm10690_vm4, %v8299_v4, %v3090_v3  ;;  %v9992_v14 = vld [vmem:[#allocation2 + $0x18] sm:$0xff]  }
 0x179   : > { %v1321_v58 = vsel %vm10890_vm7, %v1316_v29, %v1320_v2  ;;  %v1362_v21 = vrot.slane %v12877_v22, 4  ;;  %v1339_v6 = vor.u32 %v1338_v53, %v1334_v63  ;;  %v12878_v61 = vrot.slane %v11061_v57, 5  ;;  %v12879_v16 = vld [vmem:[#allocation25_spill] sm:$0xff] }
 0x17a   : > { %v1330_v44 = vrot.slane %v1329_v28, 4  ;;  %v8147_v60 = vcombine.low %v1311_v55, %v1321_v58  ;;  %v11407_v27 = vrot.slane %v3659_v62, 4  ;;  %v11409_v55 = vrot.slane %v3680_v26, 4 }
 0x17b   : > { %9197 = vmatpush3.bf16.msra.mxu0 %v9989_v1  ;;  %v1354_v1 = vrot.slane %v1353_v56, 4  ;;  %v3094_v2 = vsel %vm10690_vm4, %v11240_v8, %v12878_v61  ;;  %v1340_v24 = vrot.slane %v1339_v6, 4  ;;  %v1363_v3 = vor.u32 %v1362_v21, %v1358_v15  ;;  %v11441_v56 = vld [vmem:[#allocation2 + $0x40] sm:$0xf]  ;;  %v9996_v61 = vld [vmem:[#allocation2 + $0x30] sm:$0xff]  }
 0x17c   : > { %9198 = vmatprep.subr.bf16.mxu0 %v9990_v25  ;;  %8995 = vmatmul.mubr.bf16.gmra.mrb[8].mxu1 %v8147_v60  ;;  %v1335_v57 = vsel %vm10890_vm7, %v1330_v44, %v1334_v63  ;;  %v1368_v4 = vrot.slane %v1366_v31, 5  ;;  %v3691_v8 = vshrl.u32 %v3618_v23, 16  ;;  %v3694_v29 = vshll.u32 %v3618_v23, 16  ;;  %v11431_v44 = vld [vmem:[#allocation2 + $0x3c] sm:$0xf] }
 0x17d   : > { %v1377_v19 = vor.u32 %v11093_v46, %v11069_v36  ;;  %v3700_v26 = vshll.u32 %v11411_v9, 16  ;;  %v1345_v28 = vsel %vm10890_vm7, %v1340_v24, %v1344_v41  ;;  %v3704_v50 = vshrl.u32 %v11411_v9, 16  ;;  %v10142_v23 = vld [vmem:[#allocation2 + $0x68] sm:$0x1] }
 0x17e   : > { %9179 = vmatmul.mubr.bf16.gmra.mrb[12].mxu0 %v8323_v17  ;;  %v1364_v17 = vrot.slane %v1363_v3, 4  ;;  %v8148_v10 = vcombine.low %v1335_v57, %v1345_v28  ;;  %v1380_v53 = vshll.u32 %v12879_v16, 16  ;;  %v12880_v62 = vshrl.u32 %v12879_v16, 16  ;;  %v9995_v24 = vld [vmem:[%s12793_s1 + $0x1c8] sm:$0xff]   ;;  %v9998_v28 = vld [vmem:[%s12793_s1 + $0x1d0] sm:$0xff]   ;;  %v10002_v16 = vld [vmem:[%s12793_s1 + $0x1e0] sm:$0xff]  }
 0x17f   : > { %9182 = vmatprep.mubr.bf16.mxu0 %v8324_v52  ;;  %9199 = vmatpush3.bf16.msra.mxu0 %v9990_v25  ;;  %v1359_v25 = vsel %vm10890_vm7, %v1354_v1, %v1358_v15  ;;  %v8325_v52 = vcombine.low %v3091_v51, %v3094_v2  ;;  %v1378_v46 = vrot.slane %v1377_v19, 4  ;;  %v1390_v60 = vshll.u32 %v10142_v23, 16  ;;  %v10143_v15 = vld [vmem:[#allocation2 + $0x74] sm:$0x1]  ;;  %v11484_v23 = vld [vmem:[#allocation2 + $0x4c] sm:$0xf] }
 0x180   : > { %9200 = vmatprep.subr.bf16.mxu0 %v9991_v42  ;;  %v1369_v36 = vsel %vm10890_vm7, %v1364_v17, %v1368_v4  ;;  %v1386_v58 = vrot.slane %v12880_v62, 4  ;;  %8998 = vmatprep.mubr.bf16.mxu1 %v8148_v10  ;;  %v1382_v20 = vrot.slane %v1380_v53, 5  ;;  %v11433_v63 = vrot.slane %v3691_v8, 4  ;;  %v10000_v10 = vld [vmem:[%s12793_s1 + $0x1d8] sm:$0xff]   ;;  %v10003_v53 = vld [vmem:[#allocation2 + $0x60] sm:$0xff]   ;;  %v10004_v62 = vld [vmem:[#allocation2 + $0x6c] sm:$0xff]  }
 0x181   : > { %v8149_v11 = vcombine.low %v1359_v25, %v1369_v36  ;;  %v11435_v30 = vrot.slane %v3694_v29, 5  ;;  %v1401_v5 = vor.u32 %v11130_v48, %v11104_v45  ;;  %v1392_v13 = vrot.slane %v1390_v60, 5  ;;  %v9993_v45 = vld [vmem:[#allocation2 + $0x24] sm:$0xff]   ;;  %v10009_v60 = vld [vmem:[%s12793_s1 + $0x1f8] sm:$0xff]  }
 0x182   : > { %v1387_v32 = vor.u32 %v1386_v58, %v1382_v20  ;;  %v1404_v41 = vshll.u32 %v11096_v33, 16  ;;  %v11444_v37 = vrot.slane %v3704_v50, 4  ;;  %v3710_v22 = vshll.u32 %v11422_v54, 16  ;;  %v9999_v50 = vld [vmem:[#allocation2 + $0x48] sm:$0xff]   ;;  %v10007_v58 = vld [vmem:[#allocation2 + $0x78] sm:$0xff]  }
 0x183   : > { %9201 = vmatpush3.bf16.msra.mxu0 %v9991_v42  ;;  %v11437_v42 = vrot.slane %v3700_v26, 5  ;;  %v1383_v21 = vsel %vm10890_vm7, %v1378_v46, %v1382_v20  ;;  %v12881_v34 = vshrl.u32 %v11096_v33, 16  ;;  %v1402_v6 = vrot.slane %v1401_v5, 4  ;;  %v10005_v36 = vld [vmem:[%s12793_s1 + $0x1e8] sm:$0xff]   ;;  %v10006_v46 = vld [vmem:[%s12793_s1 + $0x1f0] sm:$0xff]  }
 0x184   : > { %9222 = vmatprep.subr.bf16.mxu0 %v11405_v35  ;;  %8999 = vmatmul.mubr.bf16.gmra.mrb[12].mxu1 %v8149_v11  ;;  %v1388_v48 = vrot.slane %v1387_v32, 4  ;;  %v1406_v1 = vrot.slane %v1404_v41, 5  ;;  %v1414_v51 = vshll.u32 %v10143_v15, 16  ;;  %v3715_v2 = vshrl.u32 %v11431_v44, 16 }
 0x185   : > { %v1410_v31 = vrot.slane %v12881_v34, 4  ;;  %v3718_v57 = vshll.u32 %v11431_v44, 16  ;;  %v3724_v4 = vshll.u32 %v11441_v56, 16  ;;  %v3728_v19 = vshrl.u32 %v11441_v56, 16  ;;  %v3624_v44 = vld [vmem:[#allocation2 + $0x48] sm:$0xf] }
 0x186   : > { %9183 = vmatmul.mubr.bf16.gmra.mrb[16].mxu0 %v8325_v52  ;;  %v1393_v3 = vsel %vm10890_vm7, %v1388_v48, %v1392_v13  ;;  %v1416_v29 = vrot.slane %v1414_v51, 5  ;;  %v9997_v52 = vld [vmem:[#allocation2 + $0x3c] sm:$0xff]   ;;  %v3673_v11 = vor.u32 %v11359_v47, %v11356_v12  ;;  %v3683_v20 = vor.u32 %v11409_v55, %v11361_v7  ;;  %v11501_v55 = vld [vmem:[#allocation2 + $0x44] sm:$0x1]  ;;  %v3627_v51 = vld [vmem:[#allocation2 + $0x54] sm:$0xf] }
 0x187   : > { %9202 = vmatprep.mubr.bf16.mxu0 %v9992_v14  ;;  %v1411_v33 = vor.u32 %v1410_v31, %v1406_v1  ;;  %v8150_v8 = vcombine.low %v1383_v21, %v1393_v3  ;;  %v1407_v14 = vsel %vm10890_vm7, %v1402_v6, %v1406_v1  ;;  %v3697_v5 = vor.u32 %v11435_v30, %v11433_v63 }
 0x188   : > { %v3707_v32 = vor.u32 %v11444_v37, %v11437_v42  ;;  %v3717_v13 = vrot.slane %v3715_v2, 4  ;;  %v3720_v41 = vrot.slane %v3718_v57, 5  ;;  %v3655_v12 = vsel %vm10890_vm7, %v11387_v49, %v11348_v43 }
 0x189   : > { %v1412_v26 = vrot.slane %v1411_v33, 4  ;;  %9002 = vmatprep.mubr.bf16.mxu1 %v8150_v8  ;;  %v3665_v47 = vsel %vm10890_vm7, %v11407_v27, %v11352_v40  ;;  %v11503_v21 = vrot.slane %v3724_v4, 5  ;;  %v3730_v63 = vrot.slane %v3728_v19, 4  ;;  %v11514_v27 = vld [vmem:[%s12793_s1 + $0x200] sm:$0xff]   ;;  %v11522_v4 = vld [vmem:[#allocation2 + $0x58] sm:$0xf] }
 0x18a   : > { %v3739_v30 = vshrl.u32 %v3624_v44, 16  ;;  %v3742_v37 = vshll.u32 %v3624_v44, 16  ;;  %v3748_v34 = vshll.u32 %v11484_v23, 16  ;;  %v3752_v31 = vshrl.u32 %v11484_v23, 16 }
 0x18b   : > { %v1417_v25 = vsel %vm10890_vm7, %v1412_v26, %v1416_v29  ;;  %v3674_v43 = vrot.slane %v3673_v11, 4  ;;  %v3684_v49 = vrot.slane %v3683_v20, 4  ;;  %v3712_v40 = vrot.slane %v3710_v22, 5  ;;  %v3630_v26 = vld [vmem:[#allocation2 + $0x60] sm:$0xf] }
 0x18c   : > { %v8151_v17 = vcombine.low %v1407_v14, %v1417_v25  ;;  %v3698_v48 = vrot.slane %v3697_v5, 4  ;;  %v3708_v6 = vrot.slane %v3707_v32, 4  ;;  %v3721_v1 = vor.u32 %v3720_v41, %v3717_v13  ;;  %v11546_v32 = vld [vmem:[#allocation2 + $0x5c] sm:$0x1] }
 0x18d   : > { %v3734_v15 = vshll.u32 %v11501_v55, 16  ;;  %v8384_v2 = vcombine.low %v3655_v12, %v3665_v47  ;;  %v3731_v57 = vor.u32 %v3730_v63, %v11503_v21  ;;  %v3744_v22 = vrot.slane %v3742_v37, 5  ;;  %v11552_v63 = vld [vmem:[#allocation2 + $0x68] sm:$0x1] }
 0x18e   : > { %9203 = vmatmul.mubr.bf16.vlgmr.msra.gmra.mrb[0].mxu0 %v9993_v45  ;;  %9003 = vmatmul.mubr.bf16.gmra.mrb[16].mxu1 %v8151_v17  ;;  %v3688_v45 = vrot.slane %v3686_v59, 5  ;;  %v11518_v59 = vld [vmem:[#allocation2 + $0x50] sm:$0x1]  ;;  %v11520_v3 = vrot.slane %v3748_v34, 5  ;;  %v3754_v33 = vrot.slane %v3752_v31, 4  ;;  %v3679_v8 = vsel %vm10890_vm7, %v3674_v43, %v11361_v7 }
 0x18f   : > { %9223 = vmatpush3.bf16.msra.mxu0 %v11405_v35  ;;  %9206 = vmatprep.mubr.bf16.mxu0 %v9996_v61  ;;  %v10001_v35 = vld [vmem:[#allocation2 + $0x54] sm:$0xff]   ;;  %v10008_v61 = vld [vmem:[#allocation2 + $0x84] sm:$0xff]   ;;  %v3763_v19 = vshrl.u32 %v3627_v51, 16  ;;  %v3766_v14 = vshll.u32 %v3627_v51, 16  ;;  %v3703_v25 = vsel %vm10890_vm7, %v3698_v48, %v11437_v42  ;;  %v3713_v17 = vsel %vm10890_vm7, %v3708_v6, %v3712_v40  ;;  %v3633_v43 = vld [vmem:[#allocation2 + $0x6c] sm:$0xf] }
 0x190   : > { %9224 = vmatprep.subr.bf16.mxu0 %v9995_v24  ;;  %v3689_v29 = vsel %vm10890_vm7, %v3684_v49, %v3688_v45  ;;  %v3732_v7 = vrot.slane %v3731_v57, 4  ;;  %v3782_v40 = vshll.u32 %v11546_v32, 16  ;;  %v11557_v48 = vld [vmem:[#allocation2 + $0x70] sm:$0xf]  ;;  %v10011_v6 = vld [vmem:[%s12793_s1 + $0x208] sm:$0xff]  }
 0x191   : > { %v3765_v44 = vrot.slane %v3763_v19, 4  ;;  %v3768_v11 = vrot.slane %v3766_v14, 5  ;;  %v8385_v20 = vcombine.low %v3679_v8, %v3689_v29  ;;  %v3636_v57 = vld [vmem:[#allocation2 + $0x78] sm:$0xf]  ;;  %v3820_v8 = vshll.u32 %v11557_v48, 16 }
 0x192   : > { %v3824_v29 = vshrl.u32 %v11557_v48, 16 }
 0x193   : > { %9225 = vmatpush3.bf16.msra.mxu0 %v9995_v24  ;;  %v3741_v24 = vrot.slane %v3739_v30, 4 }
 0x194   : > { %9226 = vmatprep.subr.bf16.mxu0 %v9998_v28 }
 0x195   : > { %v3745_v42 = vor.u32 %v3744_v22, %v3741_v24  ;;  %v11564_v24 = vld [vmem:[#allocation2 + $0x7c] sm:$0xf] }
 0x196   : > { %9207 = vmatmul.mubr.bf16.gmra.mrb[4].mxu0 %v9997_v52  ;;  %v3722_v52 = vrot.slane %v3721_v1, 4  ;;  %v3806_v1 = vshll.u32 %v11552_v63, 16 }
 0x197   : > { %9227 = vmatpush3.bf16.msra.mxu0 %v9998_v28  ;;  %9210 = vmatprep.mubr.bf16.mxu0 %v9999_v50  ;;  %v11529_v28 = vld [vmem:[#allocation2 + $0x64] sm:$0xf]  ;;  %v3736_v50 = vrot.slane %v3734_v15, 5  ;;  %v3746_v49 = vrot.slane %v3745_v42, 4  ;;  %v3826_v42 = vrot.slane %v3824_v29, 4 }
 0x198   : > { %9228 = vmatprep.subr.bf16.mxu0 %v10000_v10  ;;  %v3727_v5 = vsel %vm10890_vm7, %v3722_v52, %v11503_v21  ;;  %v3769_v21 = vor.u32 %v3768_v11, %v3765_v44  ;;  %v3835_v52 = vshrl.u32 %v3636_v57, 16  ;;  %v10016_v44 = vld [vmem:[%s12793_s1 + $0x218] sm:$0xff]   ;;  %v3639_v11 = vld [vmem:[#allocation2 + $0x84] sm:$0xf] }
 0x199   : > { %v3737_v13 = vsel %vm10890_vm7, %v3732_v7, %v3736_v50  ;;  %v3751_v19 = vsel %vm10890_vm7, %v3746_v49, %v11520_v3  ;;  %v3838_v50 = vshll.u32 %v3636_v57, 16  ;;  %v3844_v7 = vshll.u32 %v11564_v24, 16 }
 0x19a   : > { %v8387_v15 = vcombine.low %v3727_v5, %v3737_v13 }
 0x19b   : > { %9229 = vmatpush3.bf16.msra.mxu0 %v10000_v10  ;;  %v3758_v10 = vshll.u32 %v11518_v59, 16  ;;  %v3846_v5 = vrot.slane %v3844_v7, 5  ;;  %v11612_v7 = vld [vmem:[#allocation2 + $0x8c] sm:$0x1] }
 0x19c   : > { %9230 = vmatprep.subr.bf16.mxu0 %v10002_v16 }
 0x19d   : > { %v3760_v41 = vrot.slane %v3758_v10, 5 }
 0x19e   : > { %9211 = vmatmul.mubr.bf16.gmra.mrb[8].mxu0 %v10001_v35  ;;  %v3776_v35 = vshrl.u32 %v11522_v4, 16 }
 0x19f   : > { %9231 = vmatpush3.bf16.msra.mxu0 %v10002_v16  ;;  %9214 = vmatprep.mubr.bf16.mxu0 %v10003_v53  ;;  %v3772_v16 = vshll.u32 %v11522_v4, 16  ;;  %v3787_v53 = vshrl.u32 %v3630_v26, 16 }
 0x1a0   : > { %9232 = vmatprep.subr.bf16.mxu0 %v10005_v36  ;;  %v3778_v47 = vrot.slane %v3776_v35, 4 }
 0x1a1   : > { %v11550_v12 = vrot.slane %v3772_v16, 5  ;;  %v3789_v30 = vrot.slane %v3787_v53, 4  ;;  %v3808_v16 = vrot.slane %v3806_v1, 5 }
 0x1a3   : > { %9233 = vmatpush3.bf16.msra.mxu0 %v10005_v36  ;;  %v3790_v36 = vshll.u32 %v3630_v26, 16  ;;  %v3779_v51 = vor.u32 %v3778_v47, %v11550_v12  ;;  %v3770_v26 = vrot.slane %v3769_v21, 4 }
 0x1a4   : > { %9234 = vmatprep.subr.bf16.mxu0 %v10006_v46 }
 0x1a5   : > { %v3792_v37 = vrot.slane %v3790_v36, 5  ;;  %v3780_v10 = vrot.slane %v3779_v51, 4  ;;  %v3775_v47 = vsel %vm10890_vm7, %v3770_v26, %v11550_v12  ;;  %v3859_v12 = vshrl.u32 %v3639_v11, 16 }
 0x1a6   : > { %9215 = vmatmul.mubr.bf16.gmra.mrb[12].mxu0 %v10004_v62  ;;  %v3800_v62 = vshrl.u32 %v11529_v28, 16 }
 0x1a7   : > { %9218 = vmatprep.mubr.bf16.mxu0 %v10007_v58  ;;  %9235 = vmatpush3.bf16.msra.mxu0 %v10006_v46  ;;  %v3796_v46 = vshll.u32 %v11529_v28, 16  ;;  %v3755_v58 = vor.u32 %v3754_v33, %v11520_v3  ;;  %v3793_v22 = vor.u32 %v3792_v37, %v3789_v30  ;;  %v3861_v29 = vrot.slane %v3859_v12, 4 }
 0x1a8   : > { %9236 = vmatprep.subr.bf16.mxu0 %v10009_v60  ;;  %v3802_v31 = vrot.slane %v3800_v62, 4  ;;  %v11582_v62 = vrot.slane %v3820_v8, 5  ;;  %v4169_v12 = vrot.slane %v11298_v0, 5 }
 0x1a9   : > { %v11554_v34 = vrot.slane %v3796_v46, 5  ;;  %v3756_v45 = vrot.slane %v3755_v58, 4  ;;  %v3794_v53 = vrot.slane %v3793_v22, 4  ;;  %v11580_v46 = vld [vmem:[#allocation2 + $0x74] sm:$0x1] }
 0x1aa   : > { %v3830_v37 = vshll.u32 %v11580_v46, 16  ;;  %v3827_v21 = vor.u32 %v3826_v42, %v11582_v62  ;;  %v10144_v42 = vld [vmem:[#allocation2 + $0x1c] sm:$0xf] }
 0x1ab   : > { %9237 = vmatpush3.bf16.msra.mxu0 %v10009_v60  ;;  %v8386_v60 = vcombine.low %v3703_v25, %v3713_v17  ;;  %v3803_v33 = vor.u32 %v3802_v31, %v11554_v34  ;;  %v3761_v14 = vsel %vm10890_vm7, %v3756_v45, %v3760_v41  ;;  %v3784_v25 = vrot.slane %v3782_v40, 5  ;;  %v10014_v17 = vld [vmem:[%s12793_s1 + $0x210] sm:$0xff]   ;;  %v11587_v41 = vld [vmem:[#allocation2 + $0x88] sm:$0xf]  ;;  %v11595_v31 = vld [vmem:[#allocation2 + $0x80] sm:$0x1] }
 0x1ac   : > { %9258 = vmatprep.subr.bf16.mxu0 %v11514_v27  ;;  %v8388_v58 = vcombine.low %v3751_v19, %v3761_v14  ;;  %v3862_v40 = vshll.u32 %v3639_v11, 16  ;;  %v3872_v1 = vshrl.u32 %v11587_v41, 16  ;;  %v3832_v8 = vrot.slane %v3830_v37, 5 }
 0x1ad   : > { %v3804_v36 = vrot.slane %v3803_v33, 4  ;;  %v3785_v30 = vsel %vm10890_vm7, %v3780_v10, %v3784_v25  ;;  %v3828_v33 = vrot.slane %v3827_v21, 4  ;;  %v10020_v25 = vld [vmem:[%s12793_s1 + $0x228] sm:$0xff]  }
 0x1ae   : > { %9219 = vmatmul.mubr.bf16.gmra.mrb[16].mxu0 %v10008_v61  ;;  %v3811_v61 = vshrl.u32 %v3633_v43, 16  ;;  %v3864_v19 = vrot.slane %v3862_v40, 5  ;;  %v3874_v26 = vrot.slane %v3872_v1, 4  ;;  %v4121_v1 = vld [vmem:[#allocation2 + $0x24] sm:$0xe] }
 0x1af   : > { %9238 = vmatprep.mubr.bf16.mxu0 %v8384_v2  ;;  %v3814_v2 = vshll.u32 %v3633_v43, 16  ;;  %v3799_v43 = vsel %vm10890_vm7, %v3794_v53, %v11554_v34  ;;  %v3809_v49 = vsel %vm10890_vm7, %v3804_v36, %v3808_v16  ;;  %v3833_v10 = vsel %vm10890_vm7, %v3828_v33, %v3832_v8  ;;  %v10023_v53 = vld [vmem:[%s12793_s1 + $0x230] sm:$0xff]  }
 0x1b0   : > { %v3813_v35 = vrot.slane %v3811_v61, 4  ;;  %v3854_v61 = vshll.u32 %v11595_v31, 16  ;;  %v8390_v57 = vcombine.low %v3799_v43, %v3809_v49  ;;  %v3865_v16 = vor.u32 %v3864_v19, %v3861_v29 }
 0x1b1   : > { %v3816_v3 = vrot.slane %v3814_v2, 5  ;;  %v8389_v2 = vcombine.low %v3775_v47, %v3785_v30  ;;  %v10025_v30 = vld [vmem:[%s12793_s1 + $0x238] sm:$0xff]   ;;  %v4179_v8 = vrot.slane %v11422_v54, 5  ;;  %v4183_v19 = vrot.slane %v11441_v56, 5  ;;  %v4124_v54 = vld [vmem:[#allocation2 + $0x48] sm:$0xe] }
 0x1b2   : > { %v4193_v56 = vrot.slane %v11518_v59, 5  ;;  %v4126_v59 = vld [vmem:[#allocation2 + $0x60] sm:$0xe] }
 0x1b3   : > { %v3817_v45 = vor.u32 %v3816_v3, %v3813_v35  ;;  %v3878_v3 = vshll.u32 %v11612_v7, 16 }
 0x1b5   : > { %v3818_v22 = vrot.slane %v3817_v45, 4  ;;  %v3880_v47 = vrot.slane %v3878_v3, 5 }
 0x1b6   : > { %9239 = vmatmul.mubr.bf16.vlgmr.msra.gmra.mrb[0].mxu0 %v8385_v20  ;;  %v3837_v20 = vrot.slane %v3835_v52, 4 }
 0x1b7   : > { %9259 = vmatpush3.bf16.msra.mxu0 %v11514_v27  ;;  %9242 = vmatprep.mubr.bf16.mxu0 %v8386_v60  ;;  %v3848_v27 = vshrl.u32 %v11564_v24, 16  ;;  %v3840_v60 = vrot.slane %v3838_v50, 5  ;;  %v3856_v50 = vrot.slane %v3854_v61, 5 }
 0x1b8   : > { %9260 = vmatprep.subr.bf16.mxu0 %v10011_v6 }
 0x1b9   : > { %v3850_v13 = vrot.slane %v3848_v27, 4  ;;  %v3841_v34 = vor.u32 %v3840_v60, %v3837_v20  ;;  %v3823_v27 = vsel %vm10890_vm7, %v3818_v22, %v11582_v62  ;;  %v3866_v60 = vrot.slane %v3865_v16, 4 }
 0x1ba   : > { %v8391_v11 = vcombine.low %v3823_v27, %v3833_v10  ;;  %v4172_v22 = vrot.slane %v11334_v38, 5  ;;  %v4185_v27 = vrot.slane %v4183_v19, 4  ;;  %v4186_v10 = vrot.slane %v11501_v55, 5 }
 0x1bb   : > { %9261 = vmatpush3.bf16.msra.mxu0 %v10011_v6  ;;  %v3868_v6 = vshll.u32 %v11587_v41, 16  ;;  %v3851_v51 = vor.u32 %v3850_v13, %v3846_v5  ;;  %v8406_v16 = vrot.slane %v4124_v54, 9  ;;  %v4661_v54 = vld [vmem:[#allocation3 + $0x14] sm:$0x1] }
 0x1bc   : > { %9262 = vmatprep.subr.bf16.mxu0 %v10014_v17 }
 0x1bd   : > { %v3870_v14 = vrot.slane %v3868_v6, 5  ;;  %v3852_v52 = vrot.slane %v3851_v51, 4 }
 0x1be   : > { %9243 = vmatmul.mubr.bf16.gmra.mrb[4].mxu0 %v8387_v15  ;;  %v10018_v15 = vld [vmem:[%s12793_s1 + $0x220] sm:$0xff]  }
 0x1bf   : > { %9263 = vmatpush3.bf16.msra.mxu0 %v10014_v17  ;;  %9246 = vmatprep.mubr.bf16.mxu0 %v8388_v58  ;;  %v3842_v17 = vrot.slane %v3841_v34, 4  ;;  %v3875_v35 = vor.u32 %v3874_v26, %v3870_v14  ;;  %v3857_v62 = vsel %vm10890_vm7, %v3852_v52, %v3856_v50  ;;  %v4162_v58 = vrot.slane %v10144_v42, 5  ;;  %v4122_v34 = vld [vmem:[#allocation2 + $0x30] sm:$0xe]  ;;  %v4123_v26 = vld [vmem:[#allocation2 + $0x3c] sm:$0xe] }
 0x1c0   : > { %9264 = vmatprep.subr.bf16.mxu0 %v10016_v44  ;;  %v3871_v45 = vsel %vm10890_vm7, %v3866_v60, %v3870_v14  ;;  %v8404_v33 = vrot.slane %v4122_v34, 9  ;;  %v8405_v50 = vrot.slane %v4123_v26, 9  ;;  %v4204_v42 = vrot.slane %v11529_v28, 5 }
 0x1c1   : > { %v3847_v36 = vsel %vm10890_vm7, %v3842_v17, %v3846_v5  ;;  %v3876_v13 = vrot.slane %v3875_v35, 4  ;;  %v4164_v43 = vrot.slane %v4162_v58, 4  ;;  %v10145_v5 = vld [vmem:[#allocation2 + $0x20] sm:$0x1]  ;;  %v4200_v60 = vrot.slane %v11546_v32, 5 }
 0x1c2   : > { %v8392_v20 = vcombine.low %v3847_v36, %v3857_v62  ;;  %v4165_v49 = vrot.slane %v10145_v5, 5  ;;  %v4184_v3 = vsel %vm10690_vm4, %v8405_v50, %v4183_v19  ;;  %v4125_v62 = vld [vmem:[#allocation2 + $0x54] sm:$0xe]  ;;  %v4211_v28 = vrot.slane %v11557_v48, 5  ;;  %v4127_v5 = vld [vmem:[#allocation2 + $0x6c] sm:$0xe] }
 0x1c3   : > { %9265 = vmatpush3.bf16.msra.mxu0 %v10016_v44  ;;  %v4120_v44 = vld [vmem:[#allocation2 + $0x18] sm:$0xe]  ;;  %v3881_v21 = vsel %vm10890_vm7, %v3876_v13, %v3880_v47  ;;  %v8408_v13 = vrot.slane %v4126_v59, 9  ;;  %v4206_v47 = vrot.slane %v4204_v42, 4  ;;  %v4221_v48 = vrot.slane %v11595_v31, 5  ;;  %v10026_v19 = vld [vmem:[#allocation4 + $0x40] sm:$0xff]  }
 0x1c4   : > { %9266 = vmatprep.subr.bf16.mxu0 %v10018_v15  ;;  %v8402_v37 = vrot.slane %v4120_v44, 9  ;;  %v4166_v6 = vsel %vm10690_vm4, %v4164_v43, %v4165_v49  ;;  %v8393_v51 = vcombine.low %v3871_v45, %v3881_v21  ;;  %v4218_v49 = vrot.slane %v11564_v24, 5  ;;  %9294 = vmatprep.subr.bf16.mxu1 %v10026_v19 }
 0x1c5   : > { %v4205_v43 = vsel %vm10690_vm4, %v8408_v13, %v4204_v42  ;;  %v4225_v24 = vrot.slane %v11587_v41, 5  ;;  %9295 = vmatpush3.bf16.msra.mxu1 %v10026_v19  ;;  %v4650_v19 = vld [vmem:[#allocation3 + $0x60] sm:$0x1] }
 0x1c6   : > { %9247 = vmatmul.mubr.bf16.gmra.mrb[8].mxu0 %v8389_v2  ;;  %v4163_v40 = vsel %vm10690_vm4, %v8402_v37, %v4162_v58  ;;  %v8403_v2 = vrot.slane %v4121_v1, 9 }
 0x1c7   : > { %9267 = vmatpush3.bf16.msra.mxu0 %v10018_v15  ;;  %9250 = vmatprep.mubr.bf16.mxu0 %v8390_v57  ;;  %v4176_v15 = vrot.slane %v11411_v9, 5  ;;  %v8428_v61 = vcombine.low %v4163_v40, %v4166_v6  ;;  %v4171_v57 = vrot.slane %v4169_v12, 4  ;;  %v4213_v40 = vrot.slane %v4211_v28, 4 }
 0x1c8   : > { %9268 = vmatprep.subr.bf16.mxu0 %v10020_v25  ;;  %v4170_v29 = vsel %vm10690_vm4, %v8403_v2, %v4169_v12  ;;  %v8409_v12 = vrot.slane %v4127_v5, 9  ;;  %v4214_v6 = vrot.slane %v11580_v46, 5  ;;  %v4129_v2 = vld [vmem:[#allocation2 + $0x84] sm:$0xe]  ;;  %v10030_v5 = vld [vmem:[#allocation4 + $0x60] sm:$0xff]  }
 0x1c9   : > { %v4178_v0 = vrot.slane %v4176_v15, 4  ;;  %v4173_v9 = vsel %vm10690_vm4, %v4171_v57, %v4172_v22  ;;  %v4177_v14 = vsel %vm10690_vm4, %v8404_v33, %v4176_v15  ;;  %v4220_v15 = vrot.slane %v4218_v49, 4 }
 0x1ca   : > { %v8429_v17 = vcombine.low %v4170_v29, %v4173_v9  ;;  %v4212_v34 = vsel %vm10690_vm4, %v8409_v12, %v4211_v28  ;;  %v8411_v31 = vrot.slane %v4129_v2, 9  ;;  %v4227_v33 = vrot.slane %v4225_v24, 4  ;;  %v4629_v9 = vld [vmem:[#allocation3 + $0xc] sm:$0x1]  ;;  %v4641_v28 = vld [vmem:[#allocation3 + $0x3c] sm:$0x1] }
 0x1cb   : > { %9269 = vmatpush3.bf16.msra.mxu0 %v10020_v25  ;;  %v4180_v38 = vsel %vm10690_vm4, %v4178_v0, %v4179_v8  ;;  %v4190_v25 = vrot.slane %v11484_v23, 5  ;;  %v4197_v23 = vrot.slane %v11522_v4, 5  ;;  %v4207_v4 = vrot.slane %v11552_v63, 5  ;;  %v4128_v63 = vld [vmem:[#allocation2 + $0x78] sm:$0xe] }
 0x1cc   : > { %9270 = vmatprep.subr.bf16.mxu0 %v10023_v53  ;;  %v8430_v52 = vcombine.low %v4177_v14, %v4180_v38  ;;  %v8410_v1 = vrot.slane %v4128_v63, 9  ;;  %v4222_v46 = vsel %vm10690_vm4, %v4220_v15, %v4221_v48  ;;  %v4228_v0 = vrot.slane %v11612_v7, 5  ;;  %v4626_v7 = vld [vmem:[#allocation3] sm:$0x1]  ;;  %v4673_v63 = vld [vmem:[#allocation3 + $0x44] sm:$0x1] }
 0x1cd   : > { %v4192_v35 = vrot.slane %v4190_v25, 4  ;;  %v4191_v36 = vsel %vm10690_vm4, %v8406_v16, %v4190_v25  ;;  %v4208_v32 = vsel %vm10690_vm4, %v4206_v47, %v4207_v4  ;;  %v4226_v8 = vsel %vm10690_vm4, %v8411_v31, %v4225_v24  ;;  %v10029_v47 = vld [vmem:[#allocation4 + $0x58] sm:$0xff]   ;;  %v4644_v24 = vld [vmem:[#allocation3 + $0x48] sm:$0x1]  ;;  %v4679_v2 = vld [vmem:[#allocation3 + $0x5c] sm:$0x1] }
 0x1ce   : > { %9251 = vmatmul.mubr.bf16.gmra.mrb[12].mxu0 %v8391_v11  ;;  %v8407_v11 = vrot.slane %v4125_v62, 9  ;;  %v8434_v21 = vcombine.low %v4205_v43, %v4208_v32  ;;  %v4229_v41 = vsel %vm10690_vm4, %v4227_v33, %v4228_v0  ;;  %v4630_v38 = vsel %vm11693_vm10, 0, %v4629_v9  ;;  %v4638_v32 = vld [vmem:[#allocation3 + $0x30] sm:$0x1]  ;;  %v4647_v48 = vld [vmem:[#allocation3 + $0x54] sm:$0x1] }
 0x1cf   : > { %9254 = vmatprep.mubr.bf16.mxu0 %v8392_v20  ;;  %9271 = vmatpush3.bf16.msra.mxu0 %v10023_v53  ;;  %v4187_v53 = vsel %vm10690_vm4, %v4185_v27, %v4186_v10  ;;  %v4194_v55 = vsel %vm10690_vm4, %v4192_v35, %v4193_v56  ;;  %v4199_v20 = vrot.slane %v4197_v23, 4  ;;  %v8437_v29 = vcombine.low %v4226_v8, %v4229_v41  ;;  %v10027_v10 = vld [vmem:[#allocation4 + $0x48] sm:$0xff]   ;;  %v4676_v31 = vld [vmem:[#allocation3 + $0x50] sm:$0x1] }
 0x1d0   : > { %9272 = vmatprep.subr.bf16.mxu0 %v10025_v30  ;;  %v8431_v58 = vcombine.low %v4184_v3, %v4187_v53  ;;  %v8432_v44 = vcombine.low %v4191_v36, %v4194_v55  ;;  %v4627_v25 = vsel %vm11693_vm10, 0, %v4626_v7  ;;  %4631 = vst [vmem:[#allocation3 + $0xc] sm:$0x1] %v4630_v38  ;;  %9296 = vmatprep.subr.bf16.mxu1 %v10027_v10  ;;  %v4635_v3 = vld [vmem:[#allocation3 + $0x24] sm:$0x1]  ;;  %v4642_v43 = vsel %vm11693_vm10, 0, %v4641_v28 }
 0x1d1   : > { %v4201_v37 = vsel %vm10690_vm4, %v4199_v20, %v4200_v60  ;;  %4628 = vst [vmem:[#allocation3] sm:$0x1] %v4627_v25  ;;  %9297 = vmatpush3.bf16.msra.mxu1 %v10027_v10  ;;  %v4636_v53 = vsel %vm11693_vm10, 0, %v4635_v3  ;;  %v4664_v20 = vld [vmem:[#allocation3 + $0x20] sm:$0x1]  ;;  %v4677_v0 = vsel %vm11700_vm12, 0, %v4676_v31  ;;  %v4543_v10 = vstv %s8448_s13 }
 0x1d2   : > { %4637 = vst [vmem:[#allocation3 + $0x24] sm:$0x1] %v4636_v53  ;;  %v4665_v60 = vsel %vm11700_vm12, 0, %v4664_v20  ;;  %4643 = vst [vmem:[#allocation3 + $0x3c] sm:$0x1] %v4642_v43  ;;  %v10033_v7 = vld [vmem:[#allocation4 + $0x78] sm:$0xff]  }
 0x1d3   : > { %9273 = vmatpush3.bf16.msra.mxu0 %v10025_v30  ;;  %v4198_v30 = vsel %vm10690_vm4, %v8407_v11, %v4197_v23  ;;  %v4632_v23 = vld [vmem:[#allocation3 + $0x18] sm:$0x1]  ;;  %v10028_v11 = vld [vmem:[#allocation4 + $0x50] sm:$0xff]   ;;  %4666 = vst [vmem:[#allocation3 + $0x20] sm:$0x1] %v4665_v60  ;;  %v4651_v38 = vsel %vm11693_vm10, 0, %v4650_v19 }
 0x1d4   : > { %v8433_v45 = vcombine.low %v4198_v30, %v4201_v37  ;;  %v4633_v55 = vsel %vm11693_vm10, 0, %v4632_v23  ;;  %9298 = vmatprep.subr.bf16.mxu1 %v10028_v11  ;;  %4678 = vst [vmem:[#allocation3 + $0x50] sm:$0x1] %v4677_v0  ;;  %4652 = vst [vmem:[#allocation3 + $0x60] sm:$0x1] %v4651_v38  ;;  %v4544_v3 = vadd.s32 1, %v4543_v10 }
 0x1d5   : > { %4634 = vst [vmem:[#allocation3 + $0x18] sm:$0x1] %v4633_v55  ;;  %9299 = vmatpush3.bf16.msra.mxu1 %v10028_v11  ;;  %v4685_v25 = vld [vmem:[#allocation3 + $0x74] sm:$0x1]  ;;  %v11789_v23 = vld [vmem:[%s12794_s2] ss:$0 sm:$0xff] }
 0x1d6   : > { %9255 = vmatmul.mubr.bf16.gmra.mrb[16].mxu0 %v8393_v51  ;;  %v4215_v51 = vsel %vm10690_vm4, %v4213_v40, %v4214_v6  ;;  %9300 = vmatprep.subr.bf16.mxu1 %v10029_v47  ;;  %v11791_v55 = vadd.s32 3, %v4543_v10  ;;  %vm4554_vm13 = vcmp.ge.s32.totalorder %v4544_v3, 0  ;;  %vm4564_vm14 = vcmp.lt.s32.totalorder %v4544_v3, 16 }
 0x1d7   : > { %9274 = vmatprep.mubr.bf16.mxu0 %v8428_v61  ;;  %v4219_v61 = vsel %vm10690_vm4, %v8410_v1, %v4218_v49  ;;  %v8435_v57 = vcombine.low %v4212_v34, %v4215_v51  ;;  %v4639_v49 = vsel %vm11693_vm10, 0, %v4638_v32  ;;  %v4648_v34 = vsel %vm11693_vm10, 0, %v4647_v48  ;;  %v10031_v51 = vld [vmem:[#allocation4 + $0x68] sm:$0xff]   ;;  %vm11812_vm5 = vmand %vm4554_vm13, %vm4564_vm14 }
 0x1d8   : > { %v8436_v22 = vcombine.low %v4219_v61, %v4222_v46  ;;  %4640 = vst [vmem:[#allocation3 + $0x30] sm:$0x1] %v4639_v49  ;;  %4649 = vst [vmem:[#allocation3 + $0x54] sm:$0x1] %v4648_v34  ;;  %v4645_v61 = vsel %vm11693_vm10, 0, %v4644_v24  ;;  %v10032_v46 = vld [vmem:[#allocation4 + $0x70] sm:$0xff]  }
 0x1d9   : > { %9301 = vmatpush3.bf16.msra.mxu1 %v10029_v47  ;;  %4646 = vst [vmem:[#allocation3 + $0x48] sm:$0x1] %v4645_v61  ;;  %vm4553_vm15 = vcmp.ge.s32.totalorder %v4543_v10, 0  ;;  %v11802_v43 = vadd.s32 2, %v4543_v10  ;;  %vm4563_vm0 = vcmp.lt.s32.totalorder %v4543_v10, 16  ;;  %vm4556_vm1 = vcmp.ge.s32.totalorder %v11791_v55, 0 }
 0x1da   : > { %9302 = vmatprep.subr.bf16.mxu1 %v10030_v5  ;;  %vm4566_vm3 = vcmp.lt.s32.totalorder %v11791_v55, 16  ;;  %vm11821_vm8 = vmand %vm4553_vm15, %vm4563_vm0  ;;  %v11828_v48 = vadd.s32 4, %v4543_v10  ;;  %v11830_v34 = vadd.s32 7, %v4543_v10  ;;  %v4952_v55 = vld [vmem:[#allocation3] sm:$0xf] }
 0x1db   : > { %vm4565_vm13 = vcmp.lt.s32.totalorder %v11802_v43, 16  ;;  %vm11858_vm14 = vmand %vm4556_vm1, %vm4566_vm3 }
 0x1dc   : > { %vm11865_vm15 = vmand %vm4950_vm2, %vm4656_vm11  ;;  %vm4557_vm2 = vcmp.ge.s32.totalorder %v11828_v48, 0  ;;  %vm4567_vm3 = vcmp.lt.s32.totalorder %v11828_v48, 16 }
 0x1dd   : > { %9303 = vmatpush3.bf16.msra.mxu1 %v10030_v5  ;;  %vm11874_vm11 = vmor %vm4624_vm9, %vm4748_vm6 }
 0x1de   : > { %9275 = vmatmul.mubr.bf16.vlgmr.msra.gmra.mrb[0].mxu0 %v8429_v17  ;;  %v4662_v17 = vsel %vm11700_vm12, 0, %v4661_v54  ;;  %9304 = vmatprep.subr.bf16.mxu1 %v10031_v51  ;;  %v4686_v54 = vsel %vm11700_vm12, 0, %v4685_v25  ;;  %vm11948_vm6 = vmand %vm4557_vm2, %vm4567_vm3 }
 0x1df   : > { %9278 = vmatprep.mubr.bf16.mxu0 %v8430_v52  ;;  %v4658_v52 = vld [vmem:[#allocation3 + $0x8] sm:$0x1]  ;;  %4663 = vst [vmem:[#allocation3 + $0x14] sm:$0x1] %v4662_v17  ;;  %4687 = vst [vmem:[#allocation3 + $0x74] sm:$0x1] %v4686_v54 }
 0x1e0   : > { %v4659_v27 = vsel %vm11700_vm12, 0, %v4658_v52  ;;  %v4682_v17 = vld [vmem:[#allocation3 + $0x68] sm:$0x1] }
 0x1e1   : > { %4660 = vst [vmem:[#allocation3 + $0x8] sm:$0x1] %v4659_v27  ;;  %9305 = vmatpush3.bf16.msra.mxu1 %v10031_v51  ;;  %v4683_v52 = vsel %vm11700_vm12, 0, %v4682_v17  ;;  %v11782_v27 = vld [vmem:[#allocation4] sm:$0xff]  }
 0x1e2   : > { %9306 = vmatprep.subr.bf16.mxu1 %v10032_v46  ;;  %4684 = vst [vmem:[#allocation3 + $0x68] sm:$0x1] %v4683_v52 }
 0x1e5   : > { %9307 = vmatpush3.bf16.msra.mxu1 %v10032_v46  ;;  %v11833_v46 = vadd.s32 6, %v4543_v10 }
 0x1e6   : > { %9279 = vmatmul.mubr.bf16.gmra.mrb[4].mxu0 %v8431_v58  ;;  %v4667_v58 = vld [vmem:[#allocation3 + $0x2c] sm:$0x1]  ;;  %9308 = vmatprep.subr.bf16.mxu1 %v10033_v7 }
 0x1e7   : > { %9282 = vmatprep.mubr.bf16.mxu0 %v8432_v44  ;;  %v4668_v44 = vsel %vm11700_vm12, 0, %v4667_v58 }
 0x1e8   : > { %4669 = vst [vmem:[#allocation3 + $0x2c] sm:$0x1] %v4668_v44  ;;  %v11797_v44 = vld [vmem:[%s12795_s3] ss:$0 sm:$0xff] }
 0x1e9   : > { %9309 = vmatpush3.bf16.msra.mxu1 %v10033_v7 }
 0x1ea   : > { %9326 = vmatprep.subr.bf16.mxu1 %v11782_v27 }
 0x1ee   : > { %9283 = vmatmul.mubr.bf16.gmra.mrb[8].mxu0 %v8433_v45  ;;  %v4674_v45 = vsel %vm11700_vm12, 0, %v4673_v63  ;;  %v11818_v63 = vadd.s32 5, %v4543_v10 }
 0x1ef   : > { %9286 = vmatprep.mubr.bf16.mxu0 %v8434_v21  ;;  %v4670_v21 = vld [vmem:[#allocation3 + $0x38] sm:$0x1]  ;;  %4675 = vst [vmem:[#allocation3 + $0x44] sm:$0x1] %v4674_v45 }
 0x1f0   : > { %v4671_v12 = vsel %vm11700_vm12, 0, %v4670_v21  ;;  %vm4558_vm0 = vcmp.ge.s32.totalorder %v11818_v63, 0  ;;  %vm4568_vm1 = vcmp.lt.s32.totalorder %v11818_v63, 16 }
 0x1f1   : > { %4672 = vst [vmem:[#allocation3 + $0x38] sm:$0x1] %v4671_v12 }
 0x1f6   : > { %9287 = vmatmul.mubr.bf16.gmra.mrb[12].mxu0 %v8435_v57  ;;  %v4680_v57 = vsel %vm11700_vm12, 0, %v4679_v2  ;;  %vm4555_vm12 = vcmp.ge.s32.totalorder %v11802_v43, 0  ;;  %v11835_v2 = vadd.s32 9, %v4543_v10 }
 0x1f7   : > { %9290 = vmatprep.mubr.bf16.mxu0 %v8436_v22  ;;  %4681 = vst [vmem:[#allocation3 + $0x5c] sm:$0x1] %v4680_v57  ;;  %vm11888_vm9 = vmand %vm4555_vm12, %vm4565_vm13  ;;  %vm4570_vm12 = vcmp.lt.s32.totalorder %v11830_v34, 16  ;;  %vm4559_vm13 = vcmp.ge.s32.totalorder %v11833_v46, 0 }
 0x1fe   : > { %9291 = vmatmul.mubr.bf16.gmra.mrb[16].mxu0 %v8437_v29  ;;  %v4653_v29 = vld [vmem:[#allocation3 + $0x6c] sm:$0x1] }
 0x1ff   : > { %v4654_v9 = vsel %vm11693_vm10, 0, %v4653_v29 }
 0x200   : > { %4655 = vst [vmem:[#allocation3 + $0x6c] sm:$0x1] %v4654_v9  ;;  %v11840_v9 = vadd.s32 8, %v4543_v10 }
 0x202   : > { %vm4561_vm3 = vcmp.ge.s32.totalorder %v11840_v9, 0 }
 0x23c   : > { %v11708_v50 = vpop.f32.mrb[0].mxu1 }
 0x23d   : > { %v11712_v16 = vpop.f32.mrb[1].mxu1 }
 0x23e   : > { %v11714_v35 = vpop.f32.mrb[2].mxu1 }
 0x23f   : > { %v11716_v56 = vpop.f32.mrb[3].mxu1 }
 0x245   : > { %v11720_v36 = vpop.f32.mrb[4].mxu1 }
 0x246   : > { %v11724_v62 = vpop.f32.mrb[5].mxu1 }
 0x247   : > { %v11726_v42 = vpop.f32.mrb[6].mxu1 }
 0x248   : > { %v11728_v59 = vpop.f32.mrb[7].mxu1 }
 0x24f   : > { %v11734_v13 = vpop.f32.mrb[8].mxu1 }
 0x250   : > { %v11736_v4 = vpop.f32.mrb[9].mxu1 }
 0x251   : > { %v11738_v30 = vpop.f32.mrb[10].mxu1 }
 0x252   : > { %v11740_v37 = vpop.f32.mrb[11].mxu1 }
 0x257   : > { %v11750_v40 = vpop.f32.mrb[12].mxu1 }
 0x258   : > { %v11752_v6 = vpop.f32.mrb[13].mxu1 }
 0x259   : > { %v11754_v1 = vpop.f32.mrb[14].mxu1 }
 0x25a   : > { %v11756_v15 = vpop.f32.mrb[15].mxu1 }
 0x261   : > { %v11764_v22 = vpop.f32.mrb[16].mxu1 }
 0x262   : > { %v11766_v33 = vpop.f32.mrb[17].mxu1 }
 0x263   : > { %v11770_v8 = vpop.f32.mrb[18].mxu1 }
 0x264   : > { %v11772_v41 = vpop.f32.mrb[19].mxu1 }
 0x2b1   : > { %v9276_v53 = vpop.f32.mrb[0].mxu0 }
 0x2b2   : > { %v9582_v58 = vadd.f32 %v9276_v53, %v11708_v50  ;;  %v4369_v26 = vpop.f32.mrb[1].mxu0 }
 0x2b3   : > { %v9583_v11 = vadd.f32 %v4369_v26, %v11712_v16  ;;  %v9277_v20 = vpop.f32.mrb[2].mxu0 }
 0x2b4   : > { %v4477_v60 = vmul.f32 %v9582_v58, %v11789_v23  ;;  %v9584_v47 = vadd.f32 %v9277_v20, %v11714_v35  ;;  %v4372_v28 = vpop.f32.mrb[3].mxu0  ;;  %v4959_v35 = vld [vmem:[#allocation3 + $0xc] sm:$0xf] }
 0x2b5   : > { %v4475_v50 = vmul.f32 %v9583_v11, %v11789_v23  ;;  %v9585_v32 = vadd.f32 %v4372_v28, %v11716_v56 }
 0x2b6   : > { %v4504_v5 = vadd.f32 %v11797_v44, %v4477_v60  ;;  %v4478_v16 = vmul.f32 %v9584_v47, %v11789_v23 }
 0x2b7   : > { %v4502_v49 = vadd.f32 %v11797_v44, %v4475_v50  ;;  %v4476_v56 = vmul.f32 %v9585_v32, %v11789_v23 }
 0x2b8   : > { %v4524_v45 = vmax.f32 %v4504_v5, 0.0  ;;  %v4505_v12 = vadd.f32 %v11797_v44, %v4478_v16 }
 0x2b9   : > { %v4522_v51 = vmax.f32 %v4502_v49, 0.0  ;;  %v4503_v24 = vadd.f32 %v11797_v44, %v4476_v56  ;;  %v9280_v61 = vpop.f32.mrb[4].mxu0 }
 0x2ba   : > { %v4605_v57 = vsel %vm11812_vm5, %v4524_v45, 0.0  ;;  %v4525_v31 = vmax.f32 %v4505_v12, 0.0  ;;  %v9586_v0 = vadd.f32 %v9280_v61, %v11720_v36  ;;  %v4385_v29 = vpop.f32.mrb[5].mxu0 }
 0x2bb   : > { %v8645_v19 = vpack.c.bf16 %v4605_v57, %v4605_v57  ;;  %v4603_v7 = vsel %vm11821_vm8, %v4522_v51, 0.0  ;;  %v4523_v38 = vmax.f32 %v4503_v24, 0.0  ;;  %v9587_v25 = vadd.f32 %v4385_v29, %v11724_v62  ;;  %v9281_v54 = vpop.f32.mrb[6].mxu0 }
 0x2bc   : > { %v8643_v17 = vpack.c.bf16 %v4603_v7, %v4603_v7  ;;  %v4606_v52 = vsel %vm11812_vm5, %v4525_v31, 0.0  ;;  %v4481_v3 = vmul.f32 %v9586_v0, %v11789_v23  ;;  %v9588_v53 = vadd.f32 %v9281_v54, %v11726_v42  ;;  %v11849_v36 = vpop.f32.mrb[7].mxu0  ;;  %vm11935_vm5 = vmand %vm4558_vm0, %vm4568_vm1 }
 0x2bd   : > { %v4768_v10 = vshrl.u32 %v8645_v19, 16  ;;  %v4771_v58 = vshll.u32 %v8645_v19, 16  ;;  %v8646_v26 = vpack.c.bf16 %v4606_v52, %v4606_v52  ;;  %v4604_v11 = vsel %vm11821_vm8, %v4523_v38, 0.0  ;;  %v4963_v19 = vld [vmem:[#allocation3 + $0x14] sm:$0x1] }
 0x2be   : > { %v4751_v20 = vshrl.u32 %v8643_v17, 16  ;;  %v4754_v60 = vshll.u32 %v8643_v17, 16  ;;  %v8644_v62 = vpack.c.bf16 %v4604_v11, %v4604_v11  ;;  %v4508_v47 = vadd.f32 %v11797_v44, %v4481_v3  ;;  %v4956_v3 = vld [vmem:[#allocation3 + $0x8] sm:$0x1] }
 0x2bf   : > { %v4770_v28 = vrot.slane %v4768_v10, 7  ;;  %v4776_v50 = vshrl.u32 %v8646_v26, 16  ;;  %v4779_v32 = vshll.u32 %v8646_v26, 16  ;;  %v4479_v5 = vmul.f32 %v9587_v25, %v11789_v23 }
 0x2c0   : > { %v4753_v49 = vrot.slane %v4751_v20, 7  ;;  %v4759_v56 = vshrl.u32 %v8644_v62, 16  ;;  %v4762_v45 = vshll.u32 %v8644_v62, 16  ;;  %v4528_v21 = vmax.f32 %v4508_v47, 0.0 }
 0x2c1   : > { %v4773_v12 = vor.u32 %v4771_v58, %v4770_v28  ;;  %v4774_v51 = vrot.slane %v4770_v28, 4  ;;  %v4778_v24 = vrot.slane %v4776_v50, 7  ;;  %v4506_v61 = vadd.f32 %v11797_v44, %v4479_v5  ;;  %v9284_v57 = vpop.f32.mrb[8].mxu0 }
 0x2c2   : > { %v4756_v31 = vor.u32 %v4754_v60, %v4753_v49  ;;  %v4757_v0 = vrot.slane %v4753_v49, 4  ;;  %v4761_v7 = vrot.slane %v4759_v56, 7  ;;  %v4609_v38 = vsel %vm11858_vm14, %v4528_v21, 0.0  ;;  %v4401_v25 = vpop.f32.mrb[9].mxu0 }
 0x2c3   : > { %v4960_v54 = vsel %vm11865_vm15, %v4773_v12, %v4959_v35  ;;  %v4781_v17 = vor.u32 %v4779_v32, %v4778_v24  ;;  %v4783_v52 = vrot.slane %v4778_v24, 4  ;;  %v8649_v10 = vpack.c.bf16 %v4609_v38, %v4609_v38  ;;  %v9285_v26 = vpop.f32.mrb[10].mxu0 }
 0x2c4   : > { %4961 = vst [vmem:[#allocation3 + $0xc] sm:$0xf] %v4960_v54  ;;  %v4953_v11 = vsel %vm11865_vm15, %v4756_v31, %v4952_v55  ;;  %v4764_v20 = vor.u32 %v4762_v45, %v4761_v7  ;;  %v4766_v60 = vrot.slane %v4761_v7, 4  ;;  %v4526_v62 = vmax.f32 %v4506_v61, 0.0  ;;  %v4404_v47 = vpop.f32.mrb[11].mxu0 }
 0x2c5   : > { %4954 = vst [vmem:[#allocation3] sm:$0xf] %v4953_v11  ;;  %v4782_v28 = vsel %vm11874_vm11, %v4774_v51, %v4781_v17  ;;  %v4964_v43 = vsel %vm11693_vm10, %v4783_v52, %v4963_v19  ;;  %v4802_v50 = vshrl.u32 %v8649_v10, 16  ;;  %v4805_v32 = vshll.u32 %v8649_v10, 16  ;;  %v4973_v55 = vld [vmem:[#allocation3 + $0x24] sm:$0xf] }
 0x2c6   : > { %4962 = vst [vmem:[#allocation3 + $0x10] sm:$0xf] %v4782_v28  ;;  %4965 = vst [vmem:[#allocation3 + $0x14] sm:$0x1] %v4964_v43  ;;  %v4765_v5 = vsel %vm11874_vm11, %v4757_v0, %v4764_v20  ;;  %v4957_v35 = vsel %vm11693_vm10, %v4766_v60, %v4956_v3  ;;  %v4607_v49 = vsel %vm11888_vm9, %v4526_v62, 0.0  ;;  %v4482_v56 = vmul.f32 %v9588_v53, %v11789_v23 }
 0x2c7   : > { %4955 = vst [vmem:[#allocation3 + $0x4] sm:$0xf] %v4765_v5  ;;  %4958 = vst [vmem:[#allocation3 + $0x8] sm:$0x1] %v4957_v35  ;;  %v11905_v45 = vrot.slane %v4802_v50, 7  ;;  %v8647_v21 = vpack.c.bf16 %v4607_v49, %v4607_v49  ;;  %v9589_v12 = vadd.f32 %v11849_v36, %v11728_v59  ;;  %v9590_v51 = vadd.f32 %v9284_v57, %v11734_v13 }
 0x2c8   : > { %v4509_v24 = vadd.f32 %v11797_v44, %v4482_v56  ;;  %v9591_v61 = vadd.f32 %v4401_v25, %v11736_v4  ;;  %v9592_v31 = vadd.f32 %v9285_v26, %v11738_v30  ;;  %v9593_v0 = vadd.f32 %v4404_v47, %v11740_v37  ;;  %v4966_v3 = vld [vmem:[#allocation3 + $0x18] sm:$0xf] }
 0x2c9   : > { %v4807_v53 = vor.u32 %v4805_v32, %v11905_v45  ;;  %v4808_v19 = vrot.slane %v11905_v45, 4  ;;  %v4785_v7 = vshrl.u32 %v8647_v21, 16  ;;  %v4788_v38 = vshll.u32 %v8647_v21, 16  ;;  %v9288_v54 = vpop.f32.mrb[12].mxu0  ;;  %v4980_v45 = vld [vmem:[#allocation3 + $0x30] sm:$0xf] }
 0x2ca   : > { %v4529_v17 = vmax.f32 %v4509_v24, 0.0  ;;  %v4480_v59 = vmul.f32 %v9589_v12, %v11789_v23  ;;  %v4485_v13 = vmul.f32 %v9590_v51, %v11789_v23  ;;  %v4483_v36 = vmul.f32 %v9591_v61, %v11789_v23  ;;  %v4417_v57 = vpop.f32.mrb[13].mxu0 }
 0x2cb   : > { %v4974_v4 = vsel %vm11865_vm15, %v4807_v53, %v4973_v55  ;;  %v11921_v30 = vrot.slane %v4785_v7, 7  ;;  %v4486_v37 = vmul.f32 %v9592_v31, %v11789_v23  ;;  %v4484_v25 = vmul.f32 %v9593_v0, %v11789_v23  ;;  %v11925_v52 = vpop.f32.mrb[14].mxu0 }
 0x2cc   : > { %4975 = vst [vmem:[#allocation3 + $0x24] sm:$0xf] %v4974_v4  ;;  %v4610_v10 = vsel %vm11858_vm14, %v4529_v17, 0.0  ;;  %v4507_v26 = vadd.f32 %v11797_v44, %v4480_v59  ;;  %v4512_v11 = vadd.f32 %v11797_v44, %v4485_v13  ;;  %v4510_v60 = vadd.f32 %v11797_v44, %v4483_v36  ;;  %v11940_v62 = vpop.f32.mrb[15].mxu0 }
 0x2cd   : > { %v4790_v47 = vor.u32 %v4788_v38, %v11921_v30  ;;  %v4791_v42 = vrot.slane %v11921_v30, 4  ;;  %v8650_v28 = vpack.c.bf16 %v4610_v10, %v4610_v10  ;;  %v4513_v63 = vadd.f32 %v11797_v44, %v4486_v37  ;;  %v4977_v38 = vld [vmem:[#allocation3 + $0x2c] sm:$0x1] }
 0x2ce   : > { %v4527_v50 = vmax.f32 %v4507_v26, 0.0  ;;  %v4532_v32 = vmax.f32 %v4512_v11, 0.0  ;;  %v4530_v5 = vmax.f32 %v4510_v60, 0.0  ;;  %v4511_v35 = vadd.f32 %v11797_v44, %v4484_v25 }
 0x2cf   : > { %v4967_v49 = vsel %vm11865_vm15, %v4790_v47, %v4966_v3  ;;  %v4810_v56 = vshrl.u32 %v8650_v28, 16  ;;  %v4813_v21 = vshll.u32 %v8650_v28, 16  ;;  %v4533_v12 = vmax.f32 %v4513_v63, 0.0  ;;  %v4970_v28 = vld [vmem:[#allocation3 + $0x20] sm:$0x1] }
 0x2d0   : > { %4968 = vst [vmem:[#allocation3 + $0x18] sm:$0xf] %v4967_v49  ;;  %v4608_v48 = vsel %vm11888_vm9, %v4527_v50, 0.0  ;;  %v4613_v51 = vsel %vm11935_vm5, %v4532_v32, 0.0  ;;  %v4611_v55 = vsel %vm11948_vm6, %v4530_v5, 0.0  ;;  %v4531_v24 = vmax.f32 %v4511_v35, 0.0 }
 0x2d1   : > { %vm4560_vm8 = vcmp.ge.s32.totalorder %v11830_v34, 0  ;;  %v4812_v61 = vrot.slane %v4810_v56, 7  ;;  %v8648_v31 = vpack.c.bf16 %v4608_v48, %v4608_v48  ;;  %v8653_v0 = vpack.c.bf16 %v4613_v51, %v4613_v51  ;;  %v11964_v7 = vpop.f32.mrb[16].mxu0  ;;  %v4987_v63 = vld [vmem:[#allocation3 + $0x3c] sm:$0xf] }
 0x2d2   : > { %v8651_v53 = vpack.c.bf16 %v4611_v55, %v4611_v55  ;;  %v4614_v58 = vsel %vm11935_vm5, %v4533_v12, 0.0  ;;  %v4612_v17 = vsel %vm11948_vm6, %v4531_v24, 0.0  ;;  %v9594_v59 = vadd.f32 %v9288_v54, %v11750_v40  ;;  %v11972_v36 = vpop.f32.mrb[17].mxu0  ;;  %vm12004_vm2 = vmand %vm4560_vm8, %vm4570_vm12 }
 0x2d3   : > { %v9595_v13 = vadd.f32 %v4417_v57, %v11752_v6  ;;  %v4815_v4 = vor.u32 %v4813_v21, %v4812_v61  ;;  %v4817_v37 = vrot.slane %v4812_v61, 4  ;;  %v4793_v25 = vshrl.u32 %v8648_v31, 16  ;;  %v11974_v10 = vpop.f32.mrb[18].mxu0 }
 0x2d4   : > { %v4796_v3 = vshll.u32 %v8648_v31, 16  ;;  %v4836_v26 = vshrl.u32 %v8653_v0, 16  ;;  %v4839_v11 = vshll.u32 %v8653_v0, 16  ;;  %v4819_v60 = vshrl.u32 %v8651_v53, 16  ;;  %v11978_v47 = vpop.f32.mrb[19].mxu0 }
 0x2d5   : > { %v4822_v20 = vshll.u32 %v8651_v53, 16  ;;  %vm4569_vm14 = vcmp.lt.s32.totalorder %v11833_v46, 16  ;;  %v4816_v40 = vsel %vm11874_vm11, %v4808_v19, %v4815_v4  ;;  %v4978_v6 = vsel %vm11693_vm10, %v4817_v37, %v4977_v38  ;;  %v4991_v38 = vld [vmem:[#allocation3 + $0x44] sm:$0x1] }
 0x2d6   : > { %v4795_v54 = vrot.slane %v4793_v25, 7  ;;  %v8654_v57 = vpack.c.bf16 %v4614_v58, %v4614_v58  ;;  %4976 = vst [vmem:[#allocation3 + $0x28] sm:$0xf] %v4816_v40  ;;  %4979 = vst [vmem:[#allocation3 + $0x2c] sm:$0x1] %v4978_v6  ;;  %v4838_v43 = vrot.slane %v4836_v26, 7  ;;  %v8652_v32 = vpack.c.bf16 %v4612_v17, %v4612_v17 }
 0x2d7   : > { %v4821_v50 = vrot.slane %v4819_v60, 7  ;;  %v4489_v5 = vmul.f32 %v9594_v59, %v11789_v23  ;;  %vm4562_vm0 = vcmp.ge.s32.totalorder %v11835_v2, 0  ;;  %vm4572_vm1 = vcmp.lt.s32.totalorder %v11835_v2, 16  ;;  %v4984_v25 = vld [vmem:[#allocation3 + $0x38] sm:$0x1]  ;;  %vm12034_vm5 = vmand %vm4559_vm13, %vm4569_vm14 }
 0x2d8   : > { %v4798_v35 = vor.u32 %v4796_v3, %v4795_v54  ;;  %v4800_v49 = vrot.slane %v4795_v54, 4  ;;  %v4844_v56 = vshrl.u32 %v8654_v57, 16  ;;  %v4847_v21 = vshll.u32 %v8654_v57, 16  ;;  %vm12053_vm6 = vmand %vm4562_vm0, %vm4572_vm1 }
 0x2d9   : > { %v4841_v19 = vor.u32 %v4839_v11, %v4838_v43  ;;  %v4842_v12 = vrot.slane %v4838_v43, 4  ;;  %v4824_v48 = vor.u32 %v4822_v20, %v4821_v50  ;;  %v4825_v51 = vrot.slane %v4821_v50, 4 }
 0x2da   : > { %v4799_v55 = vsel %vm11874_vm11, %v4791_v42, %v4798_v35  ;;  %v4971_v24 = vsel %vm11693_vm10, %v4800_v49, %v4970_v28  ;;  %v4846_v61 = vrot.slane %v4844_v56, 7  ;;  %v4827_v31 = vshrl.u32 %v8652_v32, 16 }
 0x2db   : > { %4969 = vst [vmem:[#allocation3 + $0x1c] sm:$0xf] %v4799_v55  ;;  %4972 = vst [vmem:[#allocation3 + $0x20] sm:$0x1] %v4971_v24  ;;  %v4988_v0 = vsel %vm11865_vm15, %v4841_v19, %v4987_v63  ;;  %v4981_v53 = vsel %vm11865_vm15, %v4824_v48, %v4980_v45  ;;  %v4830_v58 = vshll.u32 %v8652_v32, 16  ;;  %v4516_v30 = vadd.f32 %v11797_v44, %v4489_v5 }
 0x2dc   : > { %4989 = vst [vmem:[#allocation3 + $0x3c] sm:$0xf] %v4988_v0  ;;  %4982 = vst [vmem:[#allocation3 + $0x30] sm:$0xf] %v4981_v53  ;;  %v4849_v42 = vor.u32 %v4847_v21, %v4846_v61  ;;  %v4851_v17 = vrot.slane %v4846_v61, 4  ;;  %v4829_v59 = vrot.slane %v4827_v31, 7  ;;  %v4487_v37 = vmul.f32 %v9595_v13, %v11789_v23 }
 0x2dd   : > { %v4536_v3 = vmax.f32 %v4516_v30, 0.0  ;;  %v9596_v26 = vadd.f32 %v11925_v52, %v11754_v1  ;;  %v9597_v11 = vadd.f32 %v11940_v62, %v11756_v15  ;;  %v9598_v60 = vadd.f32 %v11964_v7, %v11764_v22 }
 0x2de   : > { %vm4571_vm9 = vcmp.lt.s32.totalorder %v11840_v9, 16  ;;  %v4850_v34 = vsel %vm11874_vm11, %v4842_v12, %v4849_v42  ;;  %v4992_v13 = vsel %vm11693_vm10, %v4851_v17, %v4991_v38  ;;  %v4832_v20 = vor.u32 %v4830_v58, %v4829_v59 }
 0x2df   : > { %v4834_v40 = vrot.slane %v4829_v59, 4  ;;  %4990 = vst [vmem:[#allocation3 + $0x40] sm:$0xf] %v4850_v34  ;;  %4993 = vst [vmem:[#allocation3 + $0x44] sm:$0x1] %v4992_v13  ;;  %v4617_v1 = vsel %vm12004_vm2, %v4536_v3, 0.0  ;;  %v4514_v15 = vadd.f32 %v11797_v44, %v4487_v37  ;;  %v4490_v22 = vmul.f32 %v9596_v26, %v11789_v23 }
 0x2e0   : > { %v4488_v52 = vmul.f32 %v9597_v11, %v11789_v23  ;;  %v4833_v62 = vsel %vm11874_vm11, %v4825_v51, %v4832_v20  ;;  %v8657_v6 = vpack.c.bf16 %v4617_v1, %v4617_v1  ;;  %v4493_v57 = vmul.f32 %v9598_v60, %v11789_v23  ;;  %v4994_v59 = vld [vmem:[#allocation3 + $0x48] sm:$0xf]  ;;  %vm12073_vm8 = vmand %vm4561_vm3, %vm4571_vm9  ;;  %v5005_v34 = vld [vmem:[#allocation3 + $0x5c] sm:$0x1] }
 0x2e1   : > { %v4985_v7 = vsel %vm11693_vm10, %v4834_v40, %v4984_v25  ;;  %4983 = vst [vmem:[#allocation3 + $0x34] sm:$0xf] %v4833_v62  ;;  %v4534_v28 = vmax.f32 %v4514_v15, 0.0  ;;  %v4517_v43 = vadd.f32 %v11797_v44, %v4490_v22  ;;  %v9599_v50 = vadd.f32 %v11972_v36, %v11766_v33  ;;  %v5001_v36 = vld [vmem:[#allocation3 + $0x54] sm:$0xf] }
 0x2e2   : > { %4986 = vst [vmem:[#allocation3 + $0x38] sm:$0x1] %v4985_v7  ;;  %v4515_v63 = vadd.f32 %v11797_v44, %v4488_v52  ;;  %v4870_v32 = vshrl.u32 %v8657_v6, 16  ;;  %v4873_v5 = vshll.u32 %v8657_v6, 16  ;;  %v4520_v46 = vadd.f32 %v11797_v44, %v4493_v57  ;;  %v4998_v52 = vld [vmem:[#allocation3 + $0x50] sm:$0x1] }
 0x2e3   : > { %v9600_v35 = vadd.f32 %v11974_v10, %v11770_v8  ;;  %v4615_v49 = vsel %vm12034_vm5, %v4534_v28, 0.0  ;;  %v4537_v45 = vmax.f32 %v4517_v43, 0.0  ;;  %v4491_v21 = vmul.f32 %v9599_v50, %v11789_v23  ;;  %v12085_v50 = vld [vmem:[#allocation3] sm:$0xf] }
 0x2e4   : > { %v4535_v56 = vmax.f32 %v4515_v63, 0.0  ;;  %v4872_v19 = vrot.slane %v4870_v32, 7  ;;  %v8655_v12 = vpack.c.bf16 %v4615_v49, %v4615_v49  ;;  %v4540_v48 = vmax.f32 %v4520_v46, 0.0  ;;  %v5015_v63 = vld [vmem:[#allocation3 + $0x6c] sm:$0xf] }
 0x2e5   : > { %v4494_v8 = vmul.f32 %v9600_v35, %v11789_v23  ;;  %v4618_v10 = vsel %vm12004_vm2, %v4537_v45, 0.0  ;;  %v4518_v55 = vadd.f32 %v11797_v44, %v4491_v21  ;;  %v9601_v24 = vadd.f32 %v11978_v47, %v11772_v41  ;;  %v12089_v49 = vld [vmem:[#allocation3 + $0x4] sm:$0xf] }
 0x2e6   : > { %v4616_v51 = vsel %vm12034_vm5, %v4535_v56, 0.0  ;;  %v4875_v61 = vor.u32 %v4873_v5, %v4872_v19  ;;  %v4876_v2 = vrot.slane %v4872_v19, 4  ;;  %v4853_v31 = vshrl.u32 %v8655_v12, 16 }
 0x2e7   : > { %v4856_v0 = vshll.u32 %v8655_v12, 16  ;;  %v8658_v53 = vpack.c.bf16 %v4618_v10, %v4618_v10  ;;  %v8656_v38 = vpack.c.bf16 %v4616_v51, %v4616_v51  ;;  %v4621_v58 = vsel %vm12053_vm6, %v4540_v48, 0.0  ;;  %v5008_v48 = vld [vmem:[#allocation3 + $0x60] sm:$0xf] }
 0x2e8   : > { %v4538_v30 = vmax.f32 %v4518_v55, 0.0  ;;  %v5002_v42 = vsel %vm11865_vm15, %v4875_v61, %v5001_v36  ;;  %v4855_v17 = vrot.slane %v4853_v31, 7  ;;  %v8661_v4 = vpack.c.bf16 %v4621_v58, %v4621_v58  ;;  %v12109_v61 = vld [vmem:[#allocation3 + $0xc] sm:$0xf] }
 0x2e9   : > { %v4521_v47 = vadd.f32 %v11797_v44, %v4494_v8  ;;  %5003 = vst [vmem:[#allocation3 + $0x54] sm:$0xf] %v5002_v42  ;;  %v4878_v37 = vshrl.u32 %v8658_v53, 16  ;;  %v4881_v25 = vshll.u32 %v8658_v53, 16  ;;  %v4861_v3 = vshrl.u32 %v8656_v38, 16 }
 0x2ea   : > { %v4864_v26 = vshll.u32 %v8656_v38, 16  ;;  %v4858_v11 = vor.u32 %v4856_v0, %v4855_v17  ;;  %v4859_v60 = vrot.slane %v4855_v17, 4  ;;  %v4904_v13 = vshrl.u32 %v8661_v4, 16  ;;  %v12113_v53 = vld [vmem:[#allocation3 + $0x8] sm:$0x1] }
 0x2eb   : > { %v4907_v20 = vshll.u32 %v8661_v4, 16  ;;  %v4880_v40 = vrot.slane %v4878_v37, 7  ;;  %v4863_v1 = vrot.slane %v4861_v3, 7  ;;  %v4619_v9 = vsel %vm12073_vm8, %v4538_v30, 0.0  ;;  %v12116_v42 = vld [vmem:[#allocation3 + $0x10] sm:$0xf] }
 0x2ec   : > { %v4541_v15 = vmax.f32 %v4521_v47, 0.0  ;;  %v4995_v22 = vsel %vm11865_vm15, %v4858_v11, %v4994_v59  ;;  %v12082_v62 = vrot.slane %v4904_v13, 7  ;;  %v8659_v7 = vpack.c.bf16 %v4619_v9, %v4619_v9  ;;  %v5019_v11 = vld [vmem:[#allocation3 + $0x74] sm:$0x1]  ;;  %v5012_v9 = vld [vmem:[#allocation3 + $0x68] sm:$0x1] }
 0x2ed   : > { %v4492_v6 = vmul.f32 %v9601_v24, %v11789_v23  ;;  %4996 = vst [vmem:[#allocation3 + $0x48] sm:$0xf] %v4995_v22  ;;  %v4883_v54 = vor.u32 %v4881_v25, %v4880_v40  ;;  %v4885_v57 = vrot.slane %v4880_v40, 4  ;;  %v4866_v28 = vor.u32 %v4864_v26, %v4863_v1 }
 0x2ee   : > { %v4868_v43 = vrot.slane %v4863_v1, 4  ;;  %v4909_v32 = vor.u32 %v4907_v20, %v12082_v62  ;;  %v4910_v5 = vrot.slane %v12082_v62, 4  ;;  %v4887_v46 = vshrl.u32 %v8659_v7, 16  ;;  %v12126_v62 = vld [vmem:[#allocation3 + $0x14] sm:$0x1] }
 0x2ef   : > { %v4890_v35 = vshll.u32 %v8659_v7, 16  ;;  %v4884_v45 = vsel %vm11874_vm11, %v4876_v2, %v4883_v54  ;;  %v5006_v23 = vsel %vm11693_vm10, %v4885_v57, %v5005_v34  ;;  %v4867_v56 = vsel %vm11874_vm11, %v4859_v60, %v4866_v28 }
 0x2f0   : > { %v4999_v21 = vsel %vm11693_vm10, %v4868_v43, %v4998_v52  ;;  %5004 = vst [vmem:[#allocation3 + $0x58] sm:$0xf] %v4884_v45  ;;  %5007 = vst [vmem:[#allocation3 + $0x5c] sm:$0x1] %v5006_v23  ;;  %v5016_v19 = vsel %vm11865_vm15, %v4909_v32, %v5015_v63  ;;  %v12101_v12 = vrot.slane %v4887_v46, 7  ;;  %v4622_v8 = vsel %vm12053_vm6, %v4541_v15, 0.0 }
 0x2f1   : > { %4997 = vst [vmem:[#allocation3 + $0x4c] sm:$0xf] %v4867_v56  ;;  %5000 = vst [vmem:[#allocation3 + $0x50] sm:$0x1] %v4999_v21  ;;  %v4519_v36 = vadd.f32 %v11797_v44, %v4492_v6  ;;  %v8662_v10 = vpack.c.bf16 %v4622_v8, %v4622_v8  ;;  %v5063_v51 = vshrl.u32 %v12085_v50, 16  ;;  %v5066_v55 = vshll.u32 %v12085_v50, 16 }
 0x2f2   : > { %5017 = vst [vmem:[#allocation3 + $0x6c] sm:$0xf] %v5016_v19  ;;  %v5072_v24 = vshll.u32 %v12089_v49, 16  ;;  %v4892_v2 = vor.u32 %v4890_v35, %v12101_v12  ;;  %v4893_v31 = vrot.slane %v12101_v12, 4  ;;  %v5076_v33 = vshrl.u32 %v12089_v49, 16 }
 0x2f3   : > { %v4539_v0 = vmax.f32 %v4519_v36, 0.0  ;;  %v4912_v44 = vshrl.u32 %v8662_v10, 16  ;;  %v4915_v38 = vshll.u32 %v8662_v10, 16  ;;  %v5065_v58 = vrot.slane %v5063_v51, 4  ;;  %v12132_v43 = vld [vmem:[#allocation3 + $0x18] sm:$0xf] }
 0x2f4   : > { %v5068_v30 = vrot.slane %v5066_v55, 5  ;;  %v5009_v17 = vsel %vm11865_vm15, %v4892_v2, %v5008_v48  ;;  %v5074_v4 = vrot.slane %v5072_v24, 5  ;;  %v5078_v47 = vrot.slane %v5076_v33, 4  ;;  %v12134_v63 = vld [vmem:[#allocation3 + $0x1c] sm:$0xf] }
 0x2f5   : > { %v4620_v59 = vsel %vm12073_vm8, %v4539_v0, 0.0  ;;  %5010 = vst [vmem:[#allocation3 + $0x60] sm:$0xf] %v5009_v17  ;;  %v4914_v37 = vrot.slane %v4912_v44, 7  ;;  %v5082_v26 = vshll.u32 %v12113_v53, 16  ;;  %v5087_v34 = vshrl.u32 %v12109_v61, 16 }
 0x2f6   : > { %v8660_v25 = vpack.c.bf16 %v4620_v59, %v4620_v59  ;;  %v5069_v3 = vor.u32 %v5068_v30, %v5065_v58  ;;  %v5079_v60 = vor.u32 %v5078_v47, %v5074_v4  ;;  %v5090_v13 = vshll.u32 %v12109_v61, 16  ;;  %v12141_v19 = vld [vmem:[#allocation3 + $0x20] sm:$0x1]  ;;  %v12151_v2 = vld [vmem:[#allocation3 + $0x24] sm:$0xf] }
 0x2f7   : > { %v5096_v16 = vshll.u32 %v12116_v42, 16  ;;  %v4917_v20 = vor.u32 %v4915_v38, %v4914_v37  ;;  %v4919_v40 = vrot.slane %v4914_v37, 4  ;;  %v5084_v52 = vrot.slane %v5082_v26, 5  ;;  %v12153_v58 = vld [vmem:[#allocation3 + $0x28] sm:$0xf] }
 0x2f8   : > { %v4895_v41 = vshrl.u32 %v8660_v25, 16  ;;  %v4898_v1 = vshll.u32 %v8660_v25, 16  ;;  %v5070_v15 = vrot.slane %v5069_v3, 4  ;;  %v5080_v22 = vrot.slane %v5079_v60, 4  ;;  %v12165_v60 = vld [vmem:[#allocation3 + $0x30] sm:$0xf] }
 0x2f9   : > { %v5089_v7 = vrot.slane %v5087_v34, 4  ;;  %v4918_v6 = vsel %vm11874_vm11, %v4910_v5, %v4917_v20  ;;  %v5020_v54 = vsel %vm11693_vm10, %v4919_v40, %v5019_v11  ;;  %v5092_v28 = vrot.slane %v5090_v13, 5  ;;  %v12169_v40 = vld [vmem:[#allocation3 + $0x34] sm:$0xf] }
 0x2fa   : > { %v4897_v57 = vrot.slane %v4895_v41, 7  ;;  %5018 = vst [vmem:[#allocation3 + $0x70] sm:$0xf] %v4918_v6  ;;  %5021 = vst [vmem:[#allocation3 + $0x74] sm:$0x1] %v5020_v54  ;;  %v5075_v32 = vsel %vm10890_vm7, %v5070_v15, %v5074_v4  ;;  %v5085_v46 = vsel %vm10890_vm7, %v5080_v22, %v5084_v52  ;;  %v5098_v35 = vrot.slane %v5096_v16, 5 }
 0x2fb   : > { %v5100_v5 = vshrl.u32 %v12116_v42, 16  ;;  %v8469_v56 = vcombine.low %v5075_v32, %v5085_v46  ;;  %v5093_v21 = vor.u32 %v5092_v28, %v5089_v7  ;;  %v5106_v48 = vshll.u32 %v12126_v62, 16  ;;  %v12159_v4 = vld [vmem:[#allocation3 + $0x2c] sm:$0x1]  ;;  %v12174_v54 = vld [vmem:[#allocation3 + $0x38] sm:$0x1] }
 0x2fc   : > { %v4900_v45 = vor.u32 %v4898_v1, %v4897_v57  ;;  %v4902_v23 = vrot.slane %v4897_v57, 4  ;;  %v5111_v8 = vshrl.u32 %v12132_v43, 16  ;;  %v5114_v36 = vshll.u32 %v12132_v43, 16  ;;  %v10035_v1 = vld [vmem:[#allocation4 + $0x8] sm:$0xff]   ;;  %v12177_v28 = vld [vmem:[#allocation3 + $0x3c] sm:$0xf] }
 0x2fd   : > { %v5102_v12 = vrot.slane %v5100_v5, 4  ;;  %9310 = vmatprep.mubr.bf16.mxu1 %v8469_v56  ;;  %v5094_v55 = vrot.slane %v5093_v21, 4  ;;  %v5120_v24 = vshll.u32 %v12134_v63, 16  ;;  %v5108_v33 = vrot.slane %v5106_v48, 5 }
 0x2fe   : > { %v4901_v10 = vsel %vm11874_vm11, %v4893_v31, %v4900_v45  ;;  %v5013_v51 = vsel %vm11693_vm10, %v4902_v23, %v5012_v9  ;;  %v5113_v44 = vrot.slane %v5111_v8, 4  ;;  %v5116_v38 = vrot.slane %v5114_v36, 5  ;;  %v10036_v36 = vld [vmem:[#allocation4 + $0x10] sm:$0xff]  }
 0x2ff   : > { %5011 = vst [vmem:[#allocation3 + $0x64] sm:$0xf] %v4901_v10  ;;  %5014 = vst [vmem:[#allocation3 + $0x68] sm:$0x1] %v5013_v51  ;;  %v5103_v0 = vor.u32 %v5102_v12, %v5098_v35  ;;  %v5099_v29 = vsel %vm10890_vm7, %v5094_v55, %v5098_v35  ;;  %v5122_v31 = vrot.slane %v5120_v24, 5  ;;  %v5124_v14 = vshrl.u32 %v12134_v63, 16 }
 0x300   : > { %v5130_v30 = vshll.u32 %v12141_v19, 16  ;;  %v5117_v59 = vor.u32 %v5116_v38, %v5113_v44  ;;  %v5135_v47 = vshrl.u32 %v12151_v2, 16  ;;  %v5138_v37 = vshll.u32 %v12151_v2, 16  ;;  %v12183_v12 = vld [vmem:[#allocation3 + $0x40] sm:$0xf] }
 0x301   : > { %v5104_v17 = vrot.slane %v5103_v0, 4  ;;  %v5126_v25 = vrot.slane %v5124_v14, 4  ;;  %v5144_v26 = vshll.u32 %v12153_v58, 16  ;;  %v5148_v11 = vshrl.u32 %v12153_v58, 16  ;;  %v12187_v55 = vld [vmem:[#allocation3 + $0x44] sm:$0x1] }
 0x302   : > { %v5132_v3 = vrot.slane %v5130_v30, 5  ;;  %v5118_v13 = vrot.slane %v5117_v59, 4  ;;  %v5137_v16 = vrot.slane %v5135_v47, 4  ;;  %v5140_v20 = vrot.slane %v5138_v37, 5  ;;  %v12192_v44 = vld [vmem:[#allocation3 + $0x48] sm:$0xf] }
 0x303   : > { %v5109_v34 = vsel %vm10890_vm7, %v5104_v17, %v5108_v33  ;;  %v5127_v9 = vor.u32 %v5126_v25, %v5122_v31  ;;  %v5146_v15 = vrot.slane %v5144_v26, 5  ;;  %v5150_v22 = vrot.slane %v5148_v11, 4  ;;  %v12198_v17 = vld [vmem:[#allocation3 + $0x4c] sm:$0xf] }
 0x304   : > { %v8470_v41 = vcombine.low %v5099_v29, %v5109_v34  ;;  %v5123_v52 = vsel %vm10890_vm7, %v5118_v13, %v5122_v31  ;;  %v5141_v7 = vor.u32 %v5140_v20, %v5137_v16  ;;  %v5154_v6 = vshll.u32 %v12159_v4, 16  ;;  %v10037_v29 = vld [vmem:[#allocation4 + $0x18] sm:$0xff]  }
 0x305   : > { %v5159_v57 = vshrl.u32 %v12165_v60, 16  ;;  %v5128_v32 = vrot.slane %v5127_v9, 4  ;;  %v5151_v46 = vor.u32 %v5150_v22, %v5146_v15  ;;  %v5162_v35 = vshll.u32 %v12165_v60, 16  ;;  %v12202_v13 = vld [vmem:[#allocation3 + $0x54] sm:$0xf]  ;;  %v10038_v22 = vld [vmem:[#allocation4 + $0x20] sm:$0xff]  }
 0x306   : > { %9311 = vmatmul.mubr.bf16.vlgmr.msra.gmra.mrb[20].mxu1 %v8470_v41  ;;  %v5168_v5 = vshll.u32 %v12169_v40, 16  ;;  %v5142_v45 = vrot.slane %v5141_v7, 4  ;;  %v5156_v23 = vrot.slane %v5154_v6, 5  ;;  %v5172_v21 = vshrl.u32 %v12169_v40, 16 }
 0x307   : > { %9327 = vmatpush3.bf16.msra.mxu1 %v11782_v27  ;;  %v5161_v56 = vrot.slane %v5159_v57, 4  ;;  %v5133_v48 = vsel %vm10890_vm7, %v5128_v32, %v5132_v3  ;;  %v5152_v8 = vrot.slane %v5151_v46, 4  ;;  %v5164_v10 = vrot.slane %v5162_v35, 5  ;;  %v12211_v57 = vld [vmem:[#allocation3 + $0x50] sm:$0x1] }
 0x308   : > { %9328 = vmatprep.subr.bf16.mxu1 %v10035_v1  ;;  %v5170_v51 = vrot.slane %v5168_v5, 5  ;;  %v8471_v24 = vcombine.low %v5123_v52, %v5133_v48  ;;  %v5147_v27 = vsel %vm10890_vm7, %v5142_v45, %v5146_v15  ;;  %v5174_v0 = vrot.slane %v5172_v21, 4 }
 0x309   : > { %v5178_v33 = vshll.u32 %v12174_v54, 16  ;;  %v5157_v38 = vsel %vm10890_vm7, %v5152_v8, %v5156_v23  ;;  %v5165_v31 = vor.u32 %v5164_v10, %v5161_v56  ;;  %v5183_v14 = vshrl.u32 %v12177_v28, 16  ;;  %v12214_v56 = vld [vmem:[#allocation3 + $0x58] sm:$0xf] }
 0x30a   : > { %v5186_v30 = vshll.u32 %v12177_v28, 16  ;;  %9314 = vmatprep.mubr.bf16.mxu1 %v8471_v24  ;;  %v8472_v59 = vcombine.low %v5147_v27, %v5157_v38  ;;  %v5175_v47 = vor.u32 %v5174_v0, %v5170_v51  ;;  %v5192_v25 = vshll.u32 %v12183_v12, 16 }
 0x30b   : > { %9329 = vmatpush3.bf16.msra.mxu1 %v10035_v1  ;;  %v5180_v37 = vrot.slane %v5178_v33, 5  ;;  %v5166_v3 = vrot.slane %v5165_v31, 4  ;;  %v5185_v26 = vrot.slane %v5183_v14, 4  ;;  %v5196_v34 = vshrl.u32 %v12183_v12, 16  ;;  %v12220_v33 = vld [vmem:[#allocation3 + $0x5c] sm:$0x1] }
 0x30c   : > { %9330 = vmatprep.subr.bf16.mxu1 %v10036_v36  ;;  %v5188_v11 = vrot.slane %v5186_v30, 5  ;;  %v5176_v16 = vrot.slane %v5175_v47, 4  ;;  %v5194_v20 = vrot.slane %v5192_v25, 5  ;;  %v5202_v41 = vshll.u32 %v12187_v55, 16 }
 0x30d   : > { %v5207_v1 = vshrl.u32 %v12192_v44, 16  ;;  %v5198_v15 = vrot.slane %v5196_v34, 4  ;;  %v5210_v52 = vshll.u32 %v12192_v44, 16  ;;  %v5171_v7 = vsel %vm10890_vm7, %v5166_v3, %v5170_v51 }
 0x30e   : > { %9315 = vmatmul.mubr.bf16.gmra.mrb[24].mxu1 %v8472_v59  ;;  %v5189_v9 = vor.u32 %v5188_v11, %v5185_v26  ;;  %v5181_v6 = vsel %vm10890_vm7, %v5176_v16, %v5180_v37  ;;  %v5216_v46 = vshll.u32 %v12198_v17, 16  ;;  %v5220_v48 = vshrl.u32 %v12198_v17, 16 }
 0x30f   : > { %9331 = vmatpush3.bf16.msra.mxu1 %v10036_v36  ;;  %v5209_v32 = vrot.slane %v5207_v1, 4  ;;  %v8473_v35 = vcombine.low %v5171_v7, %v5181_v6  ;;  %v5199_v45 = vor.u32 %v5198_v15, %v5194_v20  ;;  %v5212_v23 = vrot.slane %v5210_v52, 5  ;;  %v10040_v7 = vld [vmem:[#allocation4 + $0x30] sm:$0xff]  }
 0x310   : > { %9332 = vmatprep.subr.bf16.mxu1 %v10037_v29  ;;  %v5190_v5 = vrot.slane %v5189_v9, 4  ;;  %v5218_v21 = vrot.slane %v5216_v46, 5  ;;  %v5231_v8 = vshrl.u32 %v12202_v13, 16  ;;  %v5204_v10 = vrot.slane %v5202_v41, 5 }
 0x311   : > { %9318 = vmatprep.mubr.bf16.mxu1 %v8473_v35  ;;  %v5200_v36 = vrot.slane %v5199_v45, 4  ;;  %v5213_v51 = vor.u32 %v5212_v23, %v5209_v32  ;;  %v5234_v24 = vshll.u32 %v12202_v13, 16  ;;  %v5222_v27 = vrot.slane %v5220_v48, 4  ;;  %v5641_v35 = vld [vmem:[#allocation3] sm:$0xe] }
 0x312   : > { %v5226_v0 = vshll.u32 %v12211_v57, 16  ;;  %v5233_v38 = vrot.slane %v5231_v8, 4  ;;  %v5240_v31 = vshll.u32 %v12214_v56, 16  ;;  %v5195_v14 = vsel %vm10890_vm7, %v5190_v5, %v5194_v20  ;;  %v5642_v45 = vld [vmem:[#allocation3 + $0xc] sm:$0xe]  ;;  %v10042_v8 = vld [vmem:[#allocation4 + $0x38] sm:$0xff]  }
 0x313   : > { %9333 = vmatpush3.bf16.msra.mxu1 %v10037_v29  ;;  %v5205_v30 = vsel %vm10890_vm7, %v5200_v36, %v5204_v10  ;;  %v5236_v59 = vrot.slane %v5234_v24, 5  ;;  %v5244_v47 = vshrl.u32 %v12214_v56, 16  ;;  %v10039_v29 = vld [vmem:[#allocation4 + $0x28] sm:$0xff]   ;;  %v5214_v25 = vrot.slane %v5213_v51, 4 }
 0x314   : > { %9334 = vmatprep.subr.bf16.mxu1 %v10038_v22  ;;  %v8474_v37 = vcombine.low %v5195_v14, %v5205_v30  ;;  %v5223_v3 = vor.u32 %v5222_v27, %v5218_v21  ;;  %v5242_v26 = vrot.slane %v5240_v31, 5  ;;  %v5250_v16 = vshll.u32 %v12220_v33, 16  ;;  %v5644_v31 = vld [vmem:[#allocation3 + $0x24] sm:$0xe] }
 0x315   : > { %v5237_v11 = vor.u32 %v5236_v59, %v5233_v38  ;;  %v5246_v34 = vrot.slane %v5244_v47, 4  ;;  %v5228_v1 = vrot.slane %v5226_v0, 5  ;;  %v5219_v15 = vsel %vm10890_vm7, %v5214_v25, %v5218_v21 }
 0x316   : > { %9319 = vmatmul.mubr.bf16.gmra.mrb[28].mxu1 %v8474_v37  ;;  %v5224_v41 = vrot.slane %v5223_v3, 4  ;;  %v5252_v46 = vrot.slane %v5250_v16, 5  ;;  %v5667_v5 = vrot.slane %v12089_v49, 5  ;;  %v5674_v23 = vrot.slane %v12116_v42, 5  ;;  %v5645_v3 = vld [vmem:[#allocation3 + $0x30] sm:$0xe] }
 0x317   : > { %9335 = vmatpush3.bf16.msra.mxu1 %v10038_v22  ;;  %v5238_v20 = vrot.slane %v5237_v11, 4  ;;  %v5247_v9 = vor.u32 %v5246_v34, %v5242_v26  ;;  %v8501_v36 = vrot.slane %v5641_v35, 9  ;;  %v5670_v51 = vrot.slane %v12113_v53, 5  ;;  %v5646_v11 = vld [vmem:[#allocation3 + $0x3c] sm:$0xe] }
 0x318   : > { %9336 = vmatprep.subr.bf16.mxu1 %v10039_v29  ;;  %v5229_v52 = vsel %vm10890_vm7, %v5224_v41, %v5228_v1  ;;  %v5669_v10 = vrot.slane %v5667_v5, 4  ;;  %v8485_v24 = vcombine.low %v12085_v50, %v12089_v49  ;;  %v8502_v27 = vrot.slane %v5642_v45, 9 }
 0x319   : > { %v8475_v6 = vcombine.low %v5219_v15, %v5229_v52  ;;  %v5248_v32 = vrot.slane %v5247_v9, 4  ;;  %v5243_v22 = vsel %vm10890_vm7, %v5238_v20, %v5242_v26  ;;  %v5676_v0 = vrot.slane %v5674_v23, 4  ;;  %v10046_v52 = vld [vmem:[#allocation4 + $0x88] sm:$0xff]  }
 0x31a   : > { %v5677_v38 = vrot.slane %v12126_v62, 5  ;;  %v12245_v14 = vsel %vm10690_vm4, %v8501_v36, %v5667_v5  ;;  %v12249_v30 = vsel %vm10690_vm4, %v5669_v10, %v5670_v51  ;;  %v5688_v59 = vrot.slane %v12153_v58, 5  ;;  %v10044_v62 = vld [vmem:[#allocation4 + $0x80] sm:$0xff]  }
 0x31b   : > { %9337 = vmatpush3.bf16.msra.mxu1 %v10039_v29  ;;  %9322 = vmatprep.mubr.bf16.mxu1 %v8475_v6  ;;  %v5253_v21 = vsel %vm10890_vm7, %v5248_v32, %v5252_v46  ;;  %v8509_v50 = vcombine.low %v12245_v14, %v12249_v30  ;;  %v12256_v49 = vsel %vm10690_vm4, %v8502_v27, %v5674_v23  ;;  %v8504_v37 = vrot.slane %v5644_v31, 9  ;;  %v5648_v46 = vld [vmem:[#allocation3 + $0x54] sm:$0xe]  ;;  %v10052_v27 = vld [vmem:[#allocation4 + $0xa0] sm:$0xff]   ;;  %v10060_v14 = vld [vmem:[#allocation4 + $0xd0] sm:$0xff]  }
 0x31c   : > { %v8476_v48 = vcombine.low %v5243_v22, %v5253_v21  ;;  %9338 = vmatprep.subr.bf16.mxu1 %v10040_v7  ;;  %v12260_v53 = vsel %vm10690_vm4, %v5676_v0, %v5677_v38  ;;  %v5690_v29 = vrot.slane %v5688_v59, 4  ;;  %v5691_v25 = vrot.slane %v12159_v4, 5  ;;  %v10054_v38 = vld [vmem:[#allocation4 + $0xa8] sm:$0xff]   ;;  %v10061_v30 = vld [vmem:[#allocation4 + $0xd8] sm:$0xff]  }
 0x31d   : > { %v8510_v47 = vcombine.low %v12256_v49, %v12260_v53  ;;  %v5695_v26 = vrot.slane %v12169_v40, 5  ;;  %v5702_v34 = vrot.slane %v12183_v12, 5  ;;  %v12269_v16 = vsel %vm10690_vm4, %v8504_v37, %v5688_v59  ;;  %v5647_v49 = vld [vmem:[#allocation3 + $0x48] sm:$0xe]  ;;  %v10062_v53 = vld [vmem:[#allocation4 + $0xe0] sm:$0xff]  }
 0x31e   : > { %9323 = vmatmul.mubr.bf16.gmra.mrb[32].mxu1 %v8476_v48  ;;  %v12273_v41 = vsel %vm10690_vm4, %v5690_v29, %v5691_v25  ;;  %v8505_v20 = vrot.slane %v5645_v3, 9  ;;  %v5698_v9 = vrot.slane %v12174_v54, 5  ;;  %v8486_v15 = vcombine.low %v12109_v61, %v12116_v42  ;;  %v10048_v48 = vld [vmem:[#allocation4 + $0x90] sm:$0xff]   ;;  %v10063_v3 = vld [vmem:[#allocation4 + $0xe8] sm:$0xff]  }
 0x31f   : > { %9339 = vmatpush3.bf16.msra.mxu1 %v10040_v7  ;;  %9342 = vmatprep.mubr.bf16.mxu1 %v8485_v24  ;;  %v8512_v1 = vcombine.low %v12269_v16, %v12273_v41  ;;  %v5697_v4 = vrot.slane %v5695_v26, 4  ;;  %v8506_v7 = vrot.slane %v5646_v11, 9  ;;  %v5704_v6 = vrot.slane %v5702_v34, 4  ;;  %v10050_v24 = vld [vmem:[#allocation4 + $0x98] sm:$0xff]   ;;  %v10064_v11 = vld [vmem:[#allocation4 + $0xf0] sm:$0xff]   ;;  %v10068_v16 = vld [vmem:[#allocation4 + $0x100] sm:$0xff]  }
 0x320   : > { %9340 = vmatprep.subr.bf16.mxu1 %v10042_v8  ;;  %v5705_v32 = vrot.slane %v12187_v55, 5  ;;  %v8487_v35 = vcombine.low %v12132_v43, %v12134_v63  ;;  %v12285_v5 = vsel %vm10690_vm4, %v8505_v20, %v5695_v26  ;;  %v5716_v61 = vrot.slane %v12214_v56, 5  ;;  %v10067_v41 = vld [vmem:[#allocation3 + $0x18] sm:$0xff]   ;;  %v10069_v20 = vld [vmem:[#allocation3 + $0x24] sm:$0xff]  }
 0x321   : > { %v12289_v54 = vsel %vm10690_vm4, %v5697_v4, %v5698_v9  ;;  %v12296_v55 = vsel %vm10690_vm4, %v8506_v7, %v5702_v34  ;;  %v8508_v23 = vrot.slane %v5648_v46, 9  ;;  %v5719_v21 = vrot.slane %v12220_v33, 5  ;;  %v10065_v34 = vld [vmem:[#allocation3 + $0xc] sm:$0xff]  }
 0x322   : > { %v8513_v42 = vcombine.low %v12285_v5, %v12289_v54  ;;  %v12300_v43 = vsel %vm10690_vm4, %v5704_v6, %v5705_v32  ;;  %v5718_v22 = vrot.slane %v5716_v61, 4  ;;  %v8488_v51 = vcombine.low %v12151_v2, %v12153_v58  ;;  %v10056_v2 = vld [vmem:[#allocation4 + $0xb0] sm:$0xff]   ;;  %v12355_v4 = vld [vmem:[#allocation3 + $0x10] sm:$0xf]  ;;  %v12359_v6 = vld [vmem:[#allocation3 + $0x1c] sm:$0xf] }
 0x323   : > { %9341 = vmatpush3.bf16.msra.mxu1 %v10042_v8  ;;  %v8514_v45 = vcombine.low %v12296_v55, %v12300_v43  ;;  %v12307_v8 = vsel %vm10690_vm4, %v8508_v23, %v5716_v61  ;;  %v8489_v33 = vcombine.low %v12165_v60, %v12169_v40  ;;  %v8490_v0 = vcombine.low %v12177_v28, %v12183_v12  ;;  %v10057_v40 = vld [vmem:[#allocation4 + $0xb8] sm:$0xff]   ;;  %v5643_v12 = vld [vmem:[#allocation3 + $0x18] sm:$0xe]  ;;  %v6174_v9 = vld [vmem:[#allocation3 + $0xc] sm:$0xf] }
 0x324   : > { %9358 = vmatprep.subr.bf16.mxu1 %v10044_v62  ;;  %v12311_v36 = vsel %vm10690_vm4, %v5718_v22, %v5719_v21  ;;  %v8491_v31 = vcombine.low %v12192_v44, %v12198_v17  ;;  %v5681_v58 = vrot.slane %v12134_v63, 5  ;;  %v8492_v60 = vcombine.low %v12202_v13, %v12214_v56  ;;  %v10058_v44 = vld [vmem:[#allocation4 + $0xc0] sm:$0xff]   ;;  %v10059_v56 = vld [vmem:[#allocation4 + $0xc8] sm:$0xff]   ;;  %v10071_v5 = vld [vmem:[#allocation3 + $0x30] sm:$0xff]  }
 0x325   : > { %v8516_v10 = vcombine.low %v12307_v8, %v12311_v36  ;;  %v5684_v59 = vrot.slane %v12141_v19, 5  ;;  %v5709_v19 = vrot.slane %v12198_v17, 5  ;;  %v8507_v29 = vrot.slane %v5647_v49, 9  ;;  %v10074_v54 = vld [vmem:[#allocation4 + $0x118] sm:$0xff]   ;;  %v12367_v36 = vld [vmem:[#allocation3 + $0x28] sm:$0xf] }
 0x326   : > { %9343 = vmatmul.mubr.bf16.vlgmr.msra.gmra.mrb[20].mxu1 %v8486_v15  ;;  %v5683_v28 = vrot.slane %v5681_v58, 4  ;;  %v10072_v15 = vld [vmem:[#allocation4 + $0x110] sm:$0xff]   ;;  %v6212_v7 = vshrl.u32 %v12355_v4, 16  ;;  %v6199_v32 = vshrl.u32 %v6174_v9, 16  ;;  %v6202_v46 = vshll.u32 %v6174_v9, 16 }
 0x327   : > { %9346 = vmatprep.mubr.bf16.mxu1 %v8487_v35  ;;  %9359 = vmatpush3.bf16.msra.mxu1 %v10044_v62  ;;  %v8503_v62 = vrot.slane %v5643_v12, 9  ;;  %v5710_v25 = vsel %vm10690_vm4, %v8507_v29, %v5709_v19  ;;  %v6177_v35 = vld [vmem:[#allocation3 + $0x18] sm:$0xf]  ;;  %v6232_v55 = vshll.u32 %v12359_v6, 16  ;;  %v6236_v43 = vshrl.u32 %v12359_v6, 16 }
 0x328   : > { %9360 = vmatprep.subr.bf16.mxu1 %v10046_v52  ;;  %v5685_v63 = vsel %vm10690_vm4, %v5683_v28, %v5684_v59  ;;  %v6201_v23 = vrot.slane %v6199_v32, 4  ;;  %v6204_v22 = vrot.slane %v6202_v46, 5  ;;  %v12365_v21 = vld [vmem:[#allocation3 + $0x14] sm:$0x1]  ;;  %v6226_v8 = vshll.u32 %v6177_v35, 16  ;;  %v10078_v59 = vld [vmem:[#allocation4 + $0x128] sm:$0xff]  }
 0x329   : > { %v5682_v13 = vsel %vm10690_vm4, %v8503_v62, %v5681_v58  ;;  %v6260_v58 = vshrl.u32 %v12367_v36, 16  ;;  %v12381_v49 = vld [vmem:[#allocation3 + $0x34] sm:$0xf] }
 0x32a   : > { %v8511_v37 = vcombine.low %v5682_v13, %v5685_v63 }
 0x32b   : > { %9361 = vmatpush3.bf16.msra.mxu1 %v10046_v52  ;;  %v6208_v52 = vshll.u32 %v12355_v4, 16 }
 0x32c   : > { %9362 = vmatprep.subr.bf16.mxu1 %v10048_v48 }
 0x32d   : > { %v12361_v61 = vrot.slane %v6208_v52, 5 }
 0x32e   : > { %9347 = vmatmul.mubr.bf16.gmra.mrb[24].mxu1 %v8488_v51 }
 0x32f   : > { %9350 = vmatprep.mubr.bf16.mxu1 %v8489_v33  ;;  %9363 = vmatpush3.bf16.msra.mxu1 %v10048_v48  ;;  %v6223_v48 = vshrl.u32 %v6177_v35, 16  ;;  %v6238_v33 = vrot.slane %v6236_v43, 4 }
 0x330   : > { %9364 = vmatprep.subr.bf16.mxu1 %v10050_v24 }
 0x333   : > { %9365 = vmatpush3.bf16.msra.mxu1 %v10050_v24  ;;  %v12370_v24 = vrot.slane %v6232_v55, 5 }
 0x334   : > { %9366 = vmatprep.subr.bf16.mxu1 %v10052_v27 }
 0x335   : > { %v6239_v63 = vor.u32 %v6238_v33, %v12370_v24  ;;  %v12404_v33 = vld [vmem:[#allocation3 + $0x4c] sm:$0xf] }
 0x336   : > { %9351 = vmatmul.mubr.bf16.gmra.mrb[28].mxu1 %v8490_v0  ;;  %v12372_v0 = vld [vmem:[#allocation3 + $0x20] sm:$0x1] }
 0x337   : > { %9354 = vmatprep.mubr.bf16.mxu1 %v8491_v31  ;;  %9367 = vmatpush3.bf16.msra.mxu1 %v10052_v27  ;;  %v6180_v27 = vld [vmem:[#allocation3 + $0x24] sm:$0xf]  ;;  %v6218_v31 = vshll.u32 %v12365_v21, 16  ;;  %v6242_v13 = vshll.u32 %v12372_v0, 16 }
 0x338   : > { %9368 = vmatprep.subr.bf16.mxu1 %v10054_v38  ;;  %v6247_v28 = vshrl.u32 %v6180_v27, 16  ;;  %v6250_v12 = vshll.u32 %v6180_v27, 16 }
 0x33a   : > { %v6252_v29 = vrot.slane %v6250_v12, 5 }
 0x33b   : > { %9369 = vmatpush3.bf16.msra.mxu1 %v10054_v38  ;;  %v6205_v38 = vor.u32 %v6204_v22, %v6201_v23 }
 0x33c   : > { %9370 = vmatprep.subr.bf16.mxu1 %v10056_v2 }
 0x33e   : > { %9355 = vmatmul.mubr.bf16.gmra.mrb[32].mxu1 %v8492_v60  ;;  %v6225_v60 = vrot.slane %v6223_v48, 4 }
 0x33f   : > { %9371 = vmatpush3.bf16.msra.mxu1 %v10056_v2  ;;  %9374 = vmatprep.mubr.bf16.mxu1 %v8509_v50  ;;  %v5711_v50 = vrot.slane %v5709_v19, 4  ;;  %v6256_v2 = vshll.u32 %v12367_v36, 16  ;;  %v6220_v19 = vrot.slane %v6218_v31, 5  ;;  %v12409_v31 = vld [vmem:[#allocation3 + $0x38] sm:$0x1] }
 0x340   : > { %9372 = vmatprep.subr.bf16.mxu1 %v10057_v40 }
 0x343   : > { %9373 = vmatpush3.bf16.msra.mxu1 %v10057_v40  ;;  %v6228_v40 = vrot.slane %v6226_v8, 5 }
 0x344   : > { %9390 = vmatprep.subr.bf16.mxu1 %v10058_v44 }
 0x346   : > { %9375 = vmatmul.mubr.bf16.vlgmr.msra.gmra.mrb[20].mxu1 %v8510_v47  ;;  %v5712_v47 = vrot.slane %v12211_v57, 5  ;;  %v10066_v57 = vld [vmem:[#allocation4 + $0xf8] sm:$0xff]  }
 0x347   : > { %9378 = vmatprep.mubr.bf16.mxu1 %v8511_v37  ;;  %9391 = vmatpush3.bf16.msra.mxu1 %v10058_v44  ;;  %v10075_v44 = vld [vmem:[#allocation3 + $0x48] sm:$0xff]   ;;  %v6183_v37 = vld [vmem:[#allocation3 + $0x30] sm:$0xf] }
 0x348   : > { %9392 = vmatprep.subr.bf16.mxu1 %v10059_v56  ;;  %v5713_v17 = vsel %vm10690_vm4, %v5711_v50, %v5712_v47  ;;  %v6262_v50 = vrot.slane %v6260_v58, 4  ;;  %v6249_v47 = vrot.slane %v6247_v28, 4 }
 0x349   : > { %v8515_v26 = vcombine.low %v5710_v25, %v5713_v17  ;;  %v12383_v17 = vld [vmem:[#allocation3 + $0x40] sm:$0xf]  ;;  %v10080_v25 = vld [vmem:[#allocation4 + $0x130] sm:$0xff]  }
 0x34a   : > { %v6304_v52 = vshll.u32 %v12383_v17, 16  ;;  %v6253_v35 = vor.u32 %v6252_v29, %v6249_v47  ;;  %v6290_v47 = vshll.u32 %v12409_v31, 16 }
 0x34b   : > { %9393 = vmatpush3.bf16.msra.mxu1 %v10059_v56  ;;  %v10077_v56 = vld [vmem:[#allocation3 + $0x54] sm:$0xff]  }
 0x34c   : > { %9394 = vmatprep.subr.bf16.mxu1 %v10060_v14 }
 0x34e   : > { %9379 = vmatmul.mubr.bf16.gmra.mrb[24].mxu1 %v8512_v1  ;;  %v10070_v1 = vld [vmem:[#allocation4 + $0x108] sm:$0xff]  }
 0x34f   : > { %9382 = vmatprep.mubr.bf16.mxu1 %v8513_v42  ;;  %9395 = vmatpush3.bf16.msra.mxu1 %v10060_v14  ;;  %v6214_v42 = vrot.slane %v6212_v7, 4  ;;  %v6206_v14 = vrot.slane %v6205_v38, 4  ;;  %v6308_v7 = vshrl.u32 %v12383_v17, 16  ;;  %v6254_v38 = vrot.slane %v6253_v35, 4 }
 0x350   : > { %9396 = vmatprep.subr.bf16.mxu1 %v10061_v30  ;;  %v6292_v35 = vrot.slane %v6290_v47, 5 }
 0x351   : > { %v6215_v51 = vor.u32 %v6214_v42, %v12361_v61  ;;  %v6211_v9 = vsel %vm10890_vm7, %v6206_v14, %v12361_v61 }
 0x353   : > { %9397 = vmatpush3.bf16.msra.mxu1 %v10061_v30  ;;  %v6216_v62 = vrot.slane %v6215_v51, 4  ;;  %v12379_v30 = vrot.slane %v6256_v2, 5  ;;  %v6310_v51 = vrot.slane %v6308_v7, 4  ;;  %v12411_v2 = vld [vmem:[#allocation3 + $0x58] sm:$0xf] }
 0x354   : > { %9398 = vmatprep.subr.bf16.mxu1 %v10062_v53 }
 0x356   : > { %9383 = vmatmul.mubr.bf16.gmra.mrb[28].mxu1 %v8514_v45  ;;  %v10073_v45 = vld [vmem:[#allocation3 + $0x3c] sm:$0xff]  }
 0x357   : > { %9386 = vmatprep.mubr.bf16.mxu1 %v8515_v26  ;;  %9399 = vmatpush3.bf16.msra.mxu1 %v10062_v53  ;;  %v6229_v53 = vor.u32 %v6228_v40, %v6225_v60  ;;  %v6240_v26 = vrot.slane %v6239_v63, 4  ;;  %v10082_v60 = vld [vmem:[#allocation4 + $0x140] sm:$0xff]   ;;  %v12414_v63 = vld [vmem:[#allocation3 + $0x44] sm:$0x1] }
 0x358   : > { %9400 = vmatprep.subr.bf16.mxu1 %v10063_v3 }
 0x359   : > { %v6230_v46 = vrot.slane %v6229_v53, 4  ;;  %v6259_v53 = vsel %vm10890_vm7, %v6254_v38, %v12379_v30 }
 0x35b   : > { %9401 = vmatpush3.bf16.msra.mxu1 %v10063_v3  ;;  %v6221_v3 = vsel %vm10890_vm7, %v6216_v62, %v6220_v19  ;;  %v6235_v27 = vsel %vm10890_vm7, %v6230_v46, %v12370_v24  ;;  %v6332_v24 = vshrl.u32 %v12404_v33, 16  ;;  %v6352_v19 = vshll.u32 %v12411_v2, 16  ;;  %v12434_v46 = vld [vmem:[#allocation3 + $0x64] sm:$0xf] }
 0x35c   : > { %9402 = vmatprep.subr.bf16.mxu1 %v10064_v11  ;;  %v8541_v32 = vcombine.low %v6211_v9, %v6221_v3  ;;  %v10083_v3 = vld [vmem:[#allocation4 + $0x148] sm:$0xff]   ;;  %v6380_v38 = vshrl.u32 %v12434_v46, 16 }
 0x35d   : > { %v6334_v9 = vrot.slane %v6332_v24, 4  ;;  %v12432_v7 = vrot.slane %v6352_v19, 5  ;;  %v10085_v24 = vld [vmem:[#allocation4 + $0x158] sm:$0xff]  }
 0x35e   : > { %9387 = vmatmul.mubr.bf16.gmra.mrb[32].mxu1 %v8516_v10  ;;  %v10076_v10 = vld [vmem:[#allocation4 + $0x120] sm:$0xff]  }
 0x35f   : > { %9403 = vmatpush3.bf16.msra.mxu1 %v10064_v11  ;;  %9406 = vmatprep.mubr.bf16.mxu1 %v10065_v34  ;;  %v6244_v11 = vrot.slane %v6242_v13, 5  ;;  %v6271_v34 = vshrl.u32 %v6183_v37, 16  ;;  %v6328_v13 = vshll.u32 %v12404_v33, 16 }
 0x360   : > { %9404 = vmatprep.subr.bf16.mxu1 %v10066_v57 }
 0x361   : > { %v6245_v42 = vsel %vm10890_vm7, %v6240_v26, %v6244_v11  ;;  %v6314_v11 = vshll.u32 %v12414_v63, 16 }
 0x362   : > { %v8542_v58 = vcombine.low %v6235_v27, %v6245_v42  ;;  %v6195_v42 = vld [vmem:[#allocation3 + $0x60] sm:$0xf]  ;;  %v6376_v27 = vshll.u32 %v12434_v46, 16 }
 0x363   : > { %9405 = vmatpush3.bf16.msra.mxu1 %v10066_v57  ;;  %v12387_v57 = vld [vmem:[#allocation3 + $0x2c] sm:$0x1] }
 0x364   : > { %9422 = vmatprep.subr.bf16.mxu1 %v10068_v16  ;;  %v6266_v55 = vshll.u32 %v12387_v57, 16  ;;  %v6378_v19 = vrot.slane %v6376_v27, 5 }
 0x366   : > { %9407 = vmatmul.mubr.bf16.vlgmr.msra.gmra.mrb[20].mxu1 %v10067_v41  ;;  %v6280_v41 = vshll.u32 %v12381_v49, 16  ;;  %v6268_v40 = vrot.slane %v6266_v55, 5  ;;  %v10084_v55 = vld [vmem:[#allocation4 + $0x150] sm:$0xff]  }
 0x367   : > { %9410 = vmatprep.mubr.bf16.mxu1 %v10069_v20  ;;  %9423 = vmatpush3.bf16.msra.mxu1 %v10068_v16  ;;  %v6274_v16 = vshll.u32 %v6183_v37, 16  ;;  %v6186_v20 = vld [vmem:[#allocation3 + $0x3c] sm:$0xf] }
 0x368   : > { %9424 = vmatprep.subr.bf16.mxu1 %v10070_v1  ;;  %v6295_v43 = vshrl.u32 %v6186_v20, 16  ;;  %v6298_v61 = vshll.u32 %v6186_v20, 16  ;;  %v12400_v22 = vrot.slane %v6280_v41, 5  ;;  %v12428_v20 = vrot.slane %v6328_v13, 5 }
 0x369   : > { %v6276_v23 = vrot.slane %v6274_v16, 5 }
 0x36a   : > { %v6297_v28 = vrot.slane %v6295_v43, 4  ;;  %v6300_v12 = vrot.slane %v6298_v61, 5  ;;  %v6316_v61 = vrot.slane %v6314_v11, 5 }
 0x36b   : > { %9425 = vmatpush3.bf16.msra.mxu1 %v10070_v1  ;;  %v6284_v1 = vshrl.u32 %v12381_v49, 16 }
 0x36c   : > { %9426 = vmatprep.subr.bf16.mxu1 %v10072_v15  ;;  %v6301_v26 = vor.u32 %v6300_v12, %v6297_v28 }
 0x36d   : > { %v6286_v48 = vrot.slane %v6284_v1, 4 }
 0x36e   : > { %9411 = vmatmul.mubr.bf16.gmra.mrb[24].mxu1 %v10071_v5  ;;  %v10079_v5 = vld [vmem:[#allocation3 + $0x60] sm:$0xff]   ;;  %v6302_v43 = vrot.slane %v6301_v26, 4  ;;  %v10086_v26 = vld [vmem:[#allocation4 + $0x160] sm:$0xff]  }
 0x36f   : > { %9414 = vmatprep.mubr.bf16.mxu1 %v10073_v45  ;;  %9427 = vmatpush3.bf16.msra.mxu1 %v10072_v15  ;;  %v6263_v15 = vor.u32 %v6262_v50, %v12379_v30  ;;  %v6273_v45 = vrot.slane %v6271_v34, 4  ;;  %v6287_v62 = vor.u32 %v6286_v48, %v12400_v22  ;;  %v6356_v50 = vshrl.u32 %v12411_v2, 16  ;;  %v12430_v30 = vld [vmem:[#allocation3 + $0x50] sm:$0x1] }
 0x370   : > { %9428 = vmatprep.subr.bf16.mxu1 %v10074_v54  ;;  %v6338_v12 = vshll.u32 %v12430_v30, 16 }
 0x371   : > { %v6264_v8 = vrot.slane %v6263_v15, 4  ;;  %v6288_v1 = vrot.slane %v6287_v62, 4 }
 0x373   : > { %9429 = vmatpush3.bf16.msra.mxu1 %v10074_v54  ;;  %v10081_v54 = vld [vmem:[#allocation4 + $0x138] sm:$0xff]   ;;  %v6269_v37 = vsel %vm10890_vm7, %v6264_v8, %v6268_v40  ;;  %v6293_v48 = vsel %vm10890_vm7, %v6288_v1, %v6292_v35  ;;  %v6335_v8 = vor.u32 %v6334_v9, %v12428_v20  ;;  %v6634_v9 = vrot.slane %v12355_v4, 5 }
 0x374   : > { %9430 = vmatprep.subr.bf16.mxu1 %v10076_v10  ;;  %v8543_v41 = vcombine.low %v6259_v53, %v6269_v37 }
 0x376   : > { %9415 = vmatmul.mubr.bf16.gmra.mrb[28].mxu1 %v10075_v44  ;;  %v6189_v44 = vld [vmem:[#allocation3 + $0x48] sm:$0xf] }
 0x377   : > { %9418 = vmatprep.mubr.bf16.mxu1 %v10077_v56  ;;  %9431 = vmatpush3.bf16.msra.mxu1 %v10076_v10  ;;  %v12402_v10 = vrot.slane %v6304_v52, 5  ;;  %v6192_v56 = vld [vmem:[#allocation3 + $0x54] sm:$0xf]  ;;  %v6319_v29 = vshrl.u32 %v6189_v44, 16 }
 0x378   : > { %9432 = vmatprep.subr.bf16.mxu1 %v10078_v59  ;;  %v6343_v34 = vshrl.u32 %v6192_v56, 16  ;;  %v6346_v16 = vshll.u32 %v6192_v56, 16 }
 0x379   : > { %v6311_v14 = vor.u32 %v6310_v51, %v12402_v10  ;;  %v12439_v51 = vld [vmem:[#allocation3 + $0x5c] sm:$0x1]  ;;  %v6307_v13 = vsel %vm10890_vm7, %v6302_v43, %v12402_v10  ;;  %v6636_v43 = vrot.slane %v6634_v9, 4 }
 0x37b   : > { %9433 = vmatpush3.bf16.msra.mxu1 %v10078_v59  ;;  %v6277_v59 = vor.u32 %v6276_v23, %v6273_v45  ;;  %v6312_v52 = vrot.slane %v6311_v14, 4  ;;  %v6345_v45 = vrot.slane %v6343_v34, 4  ;;  %v6348_v23 = vrot.slane %v6346_v16, 5  ;;  %v12454_v34 = vld [vmem:[#allocation3 + $0x68] sm:$0x1] }
 0x37c   : > { %9434 = vmatprep.subr.bf16.mxu1 %v10080_v25  ;;  %v6336_v14 = vrot.slane %v6335_v8, 4  ;;  %v6641_v8 = vrot.slane %v12359_v6, 5  ;;  %v6601_v6 = vld [vmem:[#allocation3 + $0x18] sm:$0xe] }
 0x37d   : > { %v6278_v15 = vrot.slane %v6277_v59, 4  ;;  %v6370_v59 = vshll.u32 %v6195_v42, 16  ;;  %v6349_v56 = vor.u32 %v6348_v23, %v6345_v45  ;;  %v6600_v45 = vld [vmem:[#allocation3 + $0xc] sm:$0xe]  ;;  %v6637_v23 = vrot.slane %v12365_v21, 5 }
 0x37e   : > { %9419 = vmatmul.mubr.bf16.gmra.mrb[32].mxu1 %v10079_v5  ;;  %v6321_v5 = vrot.slane %v6319_v29, 4  ;;  %v6340_v29 = vrot.slane %v6338_v12, 5  ;;  %v6643_v12 = vrot.slane %v6641_v8, 4 }
 0x37f   : > { %9435 = vmatpush3.bf16.msra.mxu1 %v10080_v25  ;;  %9438 = vmatprep.mubr.bf16.mxu1 %v8541_v32  ;;  %v6322_v25 = vshll.u32 %v6189_v44, 16  ;;  %v6358_v32 = vrot.slane %v6356_v50, 4  ;;  %v6367_v44 = vshrl.u32 %v6195_v42, 16  ;;  %v6382_v50 = vrot.slane %v6380_v38, 4 }
 0x380   : > { %9436 = vmatprep.subr.bf16.mxu1 %v10081_v54  ;;  %v6350_v11 = vrot.slane %v6349_v56, 4  ;;  %v6341_v16 = vsel %vm10890_vm7, %v6336_v14, %v6340_v29  ;;  %v6638_v27 = vsel %vm10690_vm4, %v6636_v43, %v6637_v23  ;;  %v6648_v38 = vrot.slane %v12367_v36, 5  ;;  %v6602_v36 = vld [vmem:[#allocation3 + $0x24] sm:$0xe] }
 0x381   : > { %v6359_v40 = vor.u32 %v6358_v32, %v12432_v7  ;;  %v6386_v32 = vshll.u32 %v12454_v34, 16  ;;  %v6679_v43 = vrot.slane %v12439_v51, 5 }
 0x383   : > { %9437 = vmatpush3.bf16.msra.mxu1 %v10081_v54  ;;  %v6324_v54 = vrot.slane %v6322_v25, 5  ;;  %v6360_v53 = vrot.slane %v6359_v40, 4  ;;  %v6369_v25 = vrot.slane %v6367_v44, 4  ;;  %v10089_v40 = vld [vmem:[#allocation4 + $0x178] sm:$0xff]   ;;  %v6650_v44 = vrot.slane %v6648_v38, 4 }
 0x384   : > { %9454 = vmatprep.subr.bf16.mxu1 %v10082_v60 }
 0x385   : > { %v6325_v28 = vor.u32 %v6324_v54, %v6321_v5  ;;  %v6355_v5 = vsel %vm10890_vm7, %v6350_v11, %v12432_v7  ;;  %v10087_v54 = vld [vmem:[#allocation4 + $0x168] sm:$0xff]   ;;  %v8557_v7 = vrot.slane %v6600_v45, 9  ;;  %v6665_v11 = vrot.slane %v12414_v63, 5 }
 0x386   : > { %9439 = vmatmul.mubr.bf16.vlgmr.msra.gmra.mrb[20].mxu1 %v8542_v58  ;;  %v6283_v58 = vsel %vm10890_vm7, %v6278_v15, %v12400_v22  ;;  %v6362_v22 = vshll.u32 %v12439_v51, 16  ;;  %v6683_v45 = vrot.slane %v12434_v46, 5  ;;  %v10095_v51 = vld [vmem:[#allocation4 + $0x1a8] sm:$0xff]   ;;  %v6686_v46 = vrot.slane %v12454_v34, 5 }
 0x387   : > { %9442 = vmatprep.mubr.bf16.mxu1 %v8543_v41  ;;  %9455 = vmatpush3.bf16.msra.mxu1 %v10082_v60  ;;  %v6317_v60 = vsel %vm10890_vm7, %v6312_v52, %v6316_v61  ;;  %v8544_v62 = vcombine.low %v6283_v58, %v6293_v48  ;;  %v6326_v47 = vrot.slane %v6325_v28, 4  ;;  %v6383_v41 = vor.u32 %v6382_v50, %v6378_v19  ;;  %v10099_v34 = vld [vmem:[#allocation3 + $0x24] sm:$0xff]  }
 0x388   : > { %9456 = vmatprep.subr.bf16.mxu1 %v10083_v3  ;;  %v8545_v37 = vcombine.low %v6307_v13, %v6317_v60  ;;  %v6364_v10 = vrot.slane %v6362_v22, 5  ;;  %v6388_v61 = vrot.slane %v6386_v32, 5  ;;  %v6635_v21 = vsel %vm10690_vm4, %v8557_v7, %v6634_v9  ;;  %v10093_v32 = vld [vmem:[#allocation4 + $0x198] sm:$0xff]  }
 0x389   : > { %v6331_v15 = vsel %vm10890_vm7, %v6326_v47, %v12428_v20  ;;  %v10088_v20 = vld [vmem:[#allocation4 + $0x170] sm:$0xff]   ;;  %v8565_v28 = vcombine.low %v6635_v21, %v6638_v27  ;;  %v6651_v13 = vrot.slane %v12387_v57, 5  ;;  %v6655_v22 = vrot.slane %v12381_v49, 5  ;;  %v6603_v49 = vld [vmem:[#allocation3 + $0x30] sm:$0xe] }
 0x38a   : > { %v6365_v1 = vsel %vm10890_vm7, %v6360_v53, %v6364_v10  ;;  %v8546_v35 = vcombine.low %v6331_v15, %v6341_v16  ;;  %v10091_v53 = vld [vmem:[#allocation4 + $0x188] sm:$0xff]   ;;  %v8560_v10 = vrot.slane %v6603_v49, 9  ;;  %v6676_v15 = vrot.slane %v12411_v2, 5  ;;  %v6606_v2 = vld [vmem:[#allocation3 + $0x54] sm:$0xe] }
 0x38b   : > { %9457 = vmatpush3.bf16.msra.mxu1 %v10083_v3  ;;  %v6372_v3 = vrot.slane %v6370_v59, 5  ;;  %v8547_v42 = vcombine.low %v6355_v5, %v6365_v1  ;;  %v6644_v59 = vrot.slane %v12372_v0, 5  ;;  %v6652_v14 = vsel %vm10690_vm4, %v6650_v44, %v6651_v13  ;;  %v10100_v44 = vld [vmem:[#allocation4 + $0x1c0] sm:$0xff]  }
 0x38c   : > { %9458 = vmatprep.subr.bf16.mxu1 %v10084_v55  ;;  %v6657_v29 = vrot.slane %v6655_v22, 4  ;;  %v6685_v27 = vrot.slane %v6683_v45, 4  ;;  %v7141_v13 = vld [vmem:[#allocation3 + $0x18] sm:$0xf] }
 0x38d   : > { %v6373_v52 = vor.u32 %v6372_v3, %v6369_v25  ;;  %v6645_v56 = vsel %vm10690_vm4, %v6643_v12, %v6644_v59  ;;  %v6658_v3 = vrot.slane %v12409_v31, 5  ;;  %v6656_v31 = vsel %vm10690_vm4, %v8560_v10, %v6655_v22  ;;  %v10098_v12 = vld [vmem:[#allocation4 + $0x1b8] sm:$0xff]   ;;  %v10102_v59 = vld [vmem:[#allocation4 + $0x1c8] sm:$0xff]  }
 0x38e   : > { %9443 = vmatmul.mubr.bf16.gmra.mrb[24].mxu1 %v8544_v62  ;;  %v10090_v62 = vld [vmem:[#allocation4 + $0x180] sm:$0xff]   ;;  %v6687_v21 = vsel %vm10690_vm4, %v6685_v27, %v6686_v46 }
 0x38f   : > { %9446 = vmatprep.mubr.bf16.mxu1 %v8545_v37  ;;  %9459 = vmatpush3.bf16.msra.mxu1 %v10084_v55  ;;  %v6384_v55 = vrot.slane %v6383_v41, 4  ;;  %v6374_v4 = vrot.slane %v6373_v52, 4  ;;  %v8559_v37 = vrot.slane %v6602_v36, 9  ;;  %v6659_v16 = vsel %vm10690_vm4, %v6657_v29, %v6658_v3  ;;  %v10101_v36 = vld [vmem:[#allocation3 + $0x30] sm:$0xff]   ;;  %v10105_v29 = vld [vmem:[#allocation3 + $0x48] sm:$0xff]  }
 0x390   : > { %9460 = vmatprep.subr.bf16.mxu1 %v10085_v24  ;;  %v6669_v41 = vrot.slane %v12404_v33, 5  ;;  %v8568_v52 = vcombine.low %v6656_v31, %v6659_v16  ;;  %v6605_v33 = vld [vmem:[#allocation3 + $0x48] sm:$0xe]  ;;  %v12531_v16 = vld [vmem:[#allocation3 + $0x34] sm:$0xf] }
 0x391   : > { %v6389_v48 = vsel %vm10890_vm7, %v6384_v55, %v6388_v61  ;;  %v6379_v58 = vsel %vm10890_vm7, %v6374_v4, %v6378_v19  ;;  %v6662_v19 = vrot.slane %v12383_v17, 5  ;;  %v6649_v57 = vsel %vm10690_vm4, %v8559_v37, %v6648_v38  ;;  %v6604_v17 = vld [vmem:[#allocation3 + $0x3c] sm:$0xe]  ;;  %v6607_v38 = vld [vmem:[#allocation3 + $0x60] sm:$0xe] }
 0x392   : > { %v8548_v60 = vcombine.low %v6379_v58, %v6389_v48  ;;  %v8567_v47 = vcombine.low %v6649_v57, %v6652_v14  ;;  %v8561_v1 = vrot.slane %v6604_v17, 9  ;;  %v6671_v5 = vrot.slane %v6669_v41, 4  ;;  %v10094_v55 = vld [vmem:[#allocation4 + $0x1a0] sm:$0xff]   ;;  %v10096_v58 = vld [vmem:[#allocation4 + $0x1b0] sm:$0xff]  }
 0x393   : > { %9461 = vmatpush3.bf16.msra.mxu1 %v10085_v24  ;;  %v8558_v24 = vrot.slane %v6601_v6, 9  ;;  %v6664_v25 = vrot.slane %v6662_v19, 4  ;;  %v8562_v4 = vrot.slane %v6605_v33, 9  ;;  %v10097_v6 = vld [vmem:[#allocation3 + $0x18] sm:$0xff]   ;;  %v7166_v37 = vshrl.u32 %v7141_v13, 16 }
 0x394   : > { %9462 = vmatprep.subr.bf16.mxu1 %v10086_v26  ;;  %v6663_v63 = vsel %vm10690_vm4, %v8561_v1, %v6662_v19  ;;  %v7169_v14 = vshll.u32 %v7141_v13, 16  ;;  %v12523_v19 = vld [vmem:[#allocation3 + $0x28] sm:$0xf] }
 0x395   : > { %v6642_v0 = vsel %vm10690_vm4, %v8558_v24, %v6641_v8  ;;  %v6666_v9 = vsel %vm10690_vm4, %v6664_v25, %v6665_v11  ;;  %v6670_v48 = vsel %vm10690_vm4, %v8562_v4, %v6669_v41  ;;  %v10104_v24 = vld [vmem:[#allocation4 + $0x1d0] sm:$0xff]   ;;  %v7199_v49 = vshll.u32 %v12523_v19, 16  ;;  %v10108_v41 = vld [vmem:[#allocation4 + $0x1e0] sm:$0xff]  }
 0x396   : > { %9447 = vmatmul.mubr.bf16.gmra.mrb[28].mxu1 %v8546_v35  ;;  %v8566_v50 = vcombine.low %v6642_v0, %v6645_v56  ;;  %v8569_v35 = vcombine.low %v6663_v63, %v6666_v9  ;;  %v10103_v0 = vld [vmem:[#allocation3 + $0x3c] sm:$0xff]   ;;  %v7203_v25 = vshrl.u32 %v12523_v19, 16  ;;  %v7168_v3 = vrot.slane %v7166_v37, 4  ;;  %v7147_v9 = vld [vmem:[#allocation3 + $0x30] sm:$0xf] }
 0x397   : > { %9450 = vmatprep.mubr.bf16.mxu1 %v8547_v42  ;;  %9463 = vmatpush3.bf16.msra.mxu1 %v10086_v26  ;;  %v10092_v26 = vld [vmem:[#allocation4 + $0x190] sm:$0xff]   ;;  %v6672_v42 = vrot.slane %v12430_v30, 5  ;;  %v7171_v17 = vrot.slane %v7169_v14, 5 }
 0x398   : > { %9464 = vmatprep.subr.bf16.mxu1 %v10087_v54  ;;  %v7205_v31 = vrot.slane %v7203_v25, 4  ;;  %v12539_v4 = vld [vmem:[#allocation3 + $0x2c] sm:$0x1] }
 0x399   : > { %v6673_v61 = vsel %vm10690_vm4, %v6671_v5, %v6672_v42  ;;  %v7217_v42 = vshll.u32 %v7147_v9, 16  ;;  %v7209_v27 = vshll.u32 %v12539_v4, 16 }
 0x39a   : > { %v8570_v30 = vcombine.low %v6670_v48, %v6673_v61  ;;  %v10109_v61 = vld [vmem:[#allocation3 + $0x60] sm:$0xff]  }
 0x39b   : > { %9465 = vmatpush3.bf16.msra.mxu1 %v10087_v54  ;;  %v6678_v54 = vrot.slane %v6676_v15, 4  ;;  %v7219_v46 = vrot.slane %v7217_v42, 5  ;;  %v7211_v14 = vrot.slane %v7209_v27, 5 }
 0x39c   : > { %9466 = vmatprep.subr.bf16.mxu1 %v10088_v20 }
 0x39d   : > { %v6680_v23 = vsel %vm10690_vm4, %v6678_v54, %v6679_v43  ;;  %v7214_v54 = vshrl.u32 %v7147_v9, 16  ;;  %v12568_v9 = vld [vmem:[#allocation3 + $0x58] sm:$0xf] }
 0x39e   : > { %9451 = vmatmul.mubr.bf16.gmra.mrb[32].mxu1 %v8548_v60  ;;  %v8564_v60 = vrot.slane %v6607_v38, 9 }
 0x39f   : > { %9467 = vmatpush3.bf16.msra.mxu1 %v10088_v20  ;;  %9470 = vmatprep.mubr.bf16.mxu1 %v8565_v28  ;;  %v8563_v20 = vrot.slane %v6606_v2, 9  ;;  %v10107_v2 = vld [vmem:[#allocation3 + $0x54] sm:$0xff]   ;;  %v7216_v38 = vrot.slane %v7214_v54, 4 }
 0x3a0   : > { %9468 = vmatprep.subr.bf16.mxu1 %v10089_v40 }
 0x3a1   : > { %v6677_v8 = vsel %vm10690_vm4, %v8563_v20, %v6676_v15  ;;  %v12534_v15 = vrot.slane %v7199_v49, 5  ;;  %v7150_v20 = vld [vmem:[#allocation3 + $0x3c] sm:$0xf] }
 0x3a2   : > { %v8571_v7 = vcombine.low %v6677_v8, %v6680_v23 }
 0x3a3   : > { %9469 = vmatpush3.bf16.msra.mxu1 %v10089_v40  ;;  %v6684_v40 = vsel %vm10690_vm4, %v8564_v60, %v6683_v45  ;;  %v7206_v45 = vor.u32 %v7205_v31, %v12534_v15  ;;  %v10112_v60 = vld [vmem:[#allocation4 + $0x1f0] sm:$0xff]  }
 0x3a4   : > { %9486 = vmatprep.subr.bf16.mxu1 %v10090_v62  ;;  %v8572_v28 = vcombine.low %v6684_v40, %v6687_v21  ;;  %v12551_v40 = vld [vmem:[#allocation3 + $0x38] sm:$0x1] }
 0x3a5   : > { %v7618_v18 = vrot.slane %v12551_v40, 5 }
 0x3a6   : > { %9471 = vmatmul.mubr.bf16.vlgmr.msra.gmra.mrb[20].mxu1 %v8566_v50  ;;  %v10106_v50 = vld [vmem:[#allocation4 + $0x1d8] sm:$0xff]  }
 0x3a7   : > { %9474 = vmatprep.mubr.bf16.mxu1 %v8567_v47  ;;  %9487 = vmatpush3.bf16.msra.mxu1 %v10090_v62  ;;  %v12519_v62 = vld [vmem:[#allocation3 + $0x1c] sm:$0xf]  ;;  %v7144_v47 = vld [vmem:[#allocation3 + $0x24] sm:$0xf] }
 0x3a8   : > { %9488 = vmatprep.subr.bf16.mxu1 %v10091_v53  ;;  %v7175_v56 = vshll.u32 %v12519_v62, 16  ;;  %v7179_v22 = vshrl.u32 %v12519_v62, 16  ;;  %v7190_v11 = vshrl.u32 %v7144_v47, 16  ;;  %v7193_v10 = vshll.u32 %v7144_v47, 16 }
 0x3a9   : > { %v7233_v47 = vshll.u32 %v12551_v40, 16 }
 0x3aa   : > { %v12525_v57 = vrot.slane %v7175_v56, 5  ;;  %v7192_v5 = vrot.slane %v7190_v11, 4  ;;  %v7195_v33 = vrot.slane %v7193_v10, 5 }
 0x3ab   : > { %9489 = vmatpush3.bf16.msra.mxu1 %v10091_v53  ;;  %v7181_v53 = vrot.slane %v7179_v22, 4 }
 0x3ac   : > { %9490 = vmatprep.subr.bf16.mxu1 %v10092_v26 }
 0x3ad   : > { %v7182_v1 = vor.u32 %v7181_v53, %v12525_v57  ;;  %v10113_v53 = vld [vmem:[#allocation4 + $0x1f8] sm:$0xff]  }
 0x3ae   : > { %9475 = vmatmul.mubr.bf16.gmra.mrb[24].mxu1 %v8568_v52  ;;  %v7172_v52 = vor.u32 %v7171_v17, %v7168_v3 }
 0x3af   : > { %9478 = vmatprep.mubr.bf16.mxu1 %v8569_v35  ;;  %9491 = vmatpush3.bf16.msra.mxu1 %v10092_v26  ;;  %v12529_v26 = vld [vmem:[#allocation3 + $0x20] sm:$0x1]  ;;  %v7227_v35 = vshrl.u32 %v12531_v16, 16  ;;  %v7183_v43 = vrot.slane %v7182_v1, 4 }
 0x3b0   : > { %9492 = vmatprep.subr.bf16.mxu1 %v10093_v32  ;;  %v7185_v63 = vshll.u32 %v12529_v26, 16  ;;  %v7173_v23 = vrot.slane %v7172_v52, 4 }
 0x3b1   : > { %v7229_v8 = vrot.slane %v7227_v35, 4 }
 0x3b2   : > { %v7187_v48 = vrot.slane %v7185_v63, 5  ;;  %v12573_v63 = vld [vmem:[#allocation3 + $0x44] sm:$0x1] }
 0x3b3   : > { %9493 = vmatpush3.bf16.msra.mxu1 %v10093_v32  ;;  %v7223_v32 = vshll.u32 %v12531_v16, 16 }
 0x3b4   : > { %9494 = vmatprep.subr.bf16.mxu1 %v10094_v55  ;;  %v7188_v21 = vsel %vm10890_vm7, %v7183_v43, %v7187_v48 }
 0x3b6   : > { %9479 = vmatmul.mubr.bf16.gmra.mrb[28].mxu1 %v8570_v30  ;;  %v12542_v30 = vrot.slane %v7223_v32, 5  ;;  %v12575_v32 = vld [vmem:[#allocation3 + $0x64] sm:$0xf] }
 0x3b7   : > { %9482 = vmatprep.mubr.bf16.mxu1 %v8571_v7  ;;  %9495 = vmatpush3.bf16.msra.mxu1 %v10094_v55  ;;  %v10110_v55 = vld [vmem:[#allocation4 + $0x1e8] sm:$0xff]   ;;  %v7196_v7 = vor.u32 %v7195_v33, %v7192_v5  ;;  %v10114_v5 = vld [vmem:[#allocation4 + $0x200] sm:$0xff]   ;;  %v7235_v33 = vrot.slane %v7233_v47, 5  ;;  %v7162_v47 = vld [vmem:[#allocation3 + $0x6c] sm:$0xf] }
 0x3b8   : > { %9496 = vmatprep.subr.bf16.mxu1 %v10095_v51  ;;  %v7230_v13 = vor.u32 %v7229_v8, %v12542_v30  ;;  %v7319_v8 = vshll.u32 %v12575_v32, 16 }
 0x3b9   : > { %v7197_v37 = vrot.slane %v7196_v7, 4  ;;  %v7323_v7 = vshrl.u32 %v12575_v32, 16 }
 0x3ba   : > { %v7231_v10 = vrot.slane %v7230_v13, 4 }
 0x3bb   : > { %9497 = vmatpush3.bf16.msra.mxu1 %v10095_v51  ;;  %v12544_v51 = vld [vmem:[#allocation3 + $0x40] sm:$0xf]  ;;  %v7202_v31 = vsel %vm10890_vm7, %v7197_v37, %v12534_v15  ;;  %v7299_v15 = vshrl.u32 %v12568_v9, 16  ;;  %v7325_v37 = vrot.slane %v7323_v7, 4 }
 0x3bc   : > { %9498 = vmatprep.subr.bf16.mxu1 %v10096_v58 }
 0x3bd   : > { %v7301_v13 = vrot.slane %v7299_v15, 4  ;;  %v10117_v15 = vld [vmem:[#allocation4 + $0x218] sm:$0xff]  }
 0x3be   : > { %9483 = vmatmul.mubr.bf16.gmra.mrb[32].mxu1 %v8572_v28  ;;  %v7238_v28 = vshrl.u32 %v7150_v20, 16 }
 0x3bf   : > { %9499 = vmatpush3.bf16.msra.mxu1 %v10096_v58  ;;  %9502 = vmatprep.mubr.bf16.mxu1 %v10097_v6  ;;  %v12547_v58 = vld [vmem:[#allocation3 + $0x4c] sm:$0xf]  ;;  %v7241_v6 = vshll.u32 %v7150_v20, 16  ;;  %v7159_v20 = vld [vmem:[#allocation3 + $0x60] sm:$0xf] }
 0x3c0   : > { %9500 = vmatprep.subr.bf16.mxu1 %v10098_v12  ;;  %v7275_v56 = vshrl.u32 %v12547_v58, 16 }
 0x3c1   : > { %v7243_v3 = vrot.slane %v7241_v6, 5  ;;  %v7310_v6 = vshrl.u32 %v7159_v20, 16 }
 0x3c2   : > { %v7277_v1 = vrot.slane %v7275_v56, 4 }
 0x3c3   : > { %9501 = vmatpush3.bf16.msra.mxu1 %v10098_v12  ;;  %v7207_v12 = vrot.slane %v7206_v45, 4  ;;  %v7295_v45 = vshll.u32 %v12568_v9, 16 }
 0x3c4   : > { %9518 = vmatprep.subr.bf16.mxu1 %v10100_v44 }
 0x3c6   : > { %9503 = vmatmul.mubr.bf16.vlgmr.msra.gmra.mrb[20].mxu1 %v10099_v34  ;;  %v7251_v34 = vshrl.u32 %v12544_v51, 16 }
 0x3c7   : > { %9506 = vmatprep.mubr.bf16.mxu1 %v10101_v36  ;;  %9519 = vmatpush3.bf16.msra.mxu1 %v10100_v44  ;;  %v7247_v44 = vshll.u32 %v12544_v51, 16  ;;  %v7178_v36 = vsel %vm10890_vm7, %v7173_v23, %v12525_v57  ;;  %v7212_v57 = vsel %vm10890_vm7, %v7207_v12, %v7211_v14  ;;  %v7236_v23 = vsel %vm10890_vm7, %v7231_v10, %v7235_v33  ;;  %v12598_v14 = vld [vmem:[#allocation3 + $0x70] sm:$0xf] }
 0x3c8   : > { %9520 = vmatprep.subr.bf16.mxu1 %v10102_v59  ;;  %v8597_v22 = vcombine.low %v7178_v36, %v7188_v21  ;;  %v7253_v11 = vrot.slane %v7251_v34, 4  ;;  %v8598_v35 = vcombine.low %v7202_v31, %v7212_v57  ;;  %v10115_v21 = vld [vmem:[#allocation4 + $0x208] sm:$0xff]   ;;  %v12592_v36 = vrot.slane %v7295_v45, 5 }
 0x3c9   : > { %v12564_v17 = vrot.slane %v7247_v44, 5  ;;  %v7313_v44 = vshll.u32 %v7159_v20, 16  ;;  %v7312_v57 = vrot.slane %v7310_v6, 4  ;;  %v7343_v31 = vshll.u32 %v12598_v14, 16  ;;  %v12618_v6 = vld [vmem:[#allocation3 + $0x74] sm:$0x1] }
 0x3ca   : > { %v7302_v10 = vor.u32 %v7301_v13, %v12592_v36  ;;  %v7601_v13 = vrot.slane %v12519_v62, 5 }
 0x3cb   : > { %9521 = vmatpush3.bf16.msra.mxu1 %v10102_v59  ;;  %v7153_v59 = vld [vmem:[#allocation3 + $0x48] sm:$0xf]  ;;  %v7254_v43 = vor.u32 %v7253_v11, %v12564_v17 }
 0x3cc   : > { %9522 = vmatprep.subr.bf16.mxu1 %v10104_v24  ;;  %v7262_v49 = vshrl.u32 %v7153_v59, 16  ;;  %v7265_v25 = vshll.u32 %v7153_v59, 16 }
 0x3cd   : > { %v7255_v59 = vrot.slane %v7254_v43, 4 }
 0x3ce   : > { %9507 = vmatmul.mubr.bf16.gmra.mrb[24].mxu1 %v10103_v0  ;;  %v7220_v0 = vor.u32 %v7219_v46, %v7216_v38  ;;  %v7264_v54 = vrot.slane %v7262_v49, 4  ;;  %v7267_v42 = vrot.slane %v7265_v25, 5  ;;  %v7257_v38 = vshll.u32 %v12573_v63, 16 }
 0x3cf   : > { %9510 = vmatprep.mubr.bf16.mxu1 %v10105_v29  ;;  %9523 = vmatpush3.bf16.msra.mxu1 %v10104_v24  ;;  %v7271_v24 = vshll.u32 %v12547_v58, 16  ;;  %v7240_v29 = vrot.slane %v7238_v28, 4 }
 0x3d0   : > { %9524 = vmatprep.subr.bf16.mxu1 %v10106_v50  ;;  %v7221_v52 = vrot.slane %v7220_v0, 4  ;;  %v7268_v28 = vor.u32 %v7267_v42, %v7264_v54  ;;  %v7259_v0 = vrot.slane %v7257_v38, 5 }
 0x3d2   : > { %v7226_v27 = vsel %vm10890_vm7, %v7221_v52, %v12542_v30  ;;  %v12594_v30 = vld [vmem:[#allocation3 + $0x5c] sm:$0x1]  ;;  %v7269_v49 = vrot.slane %v7268_v28, 4  ;;  %v7260_v11 = vsel %vm10890_vm7, %v7255_v59, %v7259_v0  ;;  %v7347_v52 = vshrl.u32 %v12598_v14, 16 }
 0x3d3   : > { %9525 = vmatpush3.bf16.msra.mxu1 %v10106_v50  ;;  %v10111_v50 = vld [vmem:[#allocation3 + $0x6c] sm:$0xff]   ;;  %v8599_v34 = vcombine.low %v7226_v27, %v7236_v23  ;;  %v7305_v42 = vshll.u32 %v12594_v30, 16  ;;  %v10118_v28 = vld [vmem:[#allocation4 + $0x220] sm:$0xff]  }
 0x3d4   : > { %9526 = vmatprep.subr.bf16.mxu1 %v10108_v41  ;;  %v7349_v7 = vrot.slane %v7347_v52, 4  ;;  %v7615_v52 = vrot.slane %v12531_v16, 5  ;;  %v7569_v16 = vld [vmem:[#allocation3 + $0x30] sm:$0xe] }
 0x3d6   : > { %9511 = vmatmul.mubr.bf16.gmra.mrb[28].mxu1 %v10107_v2  ;;  %v7156_v2 = vld [vmem:[#allocation3 + $0x54] sm:$0xf] }
 0x3d7   : > { %9514 = vmatprep.mubr.bf16.mxu1 %v10109_v61  ;;  %9527 = vmatpush3.bf16.msra.mxu1 %v10108_v41  ;;  %v12566_v41 = vrot.slane %v7271_v24, 5  ;;  %v12578_v61 = vld [vmem:[#allocation3 + $0x50] sm:$0x1]  ;;  %v7286_v46 = vshrl.u32 %v7156_v2, 16 }
 0x3d8   : > { %9528 = vmatprep.subr.bf16.mxu1 %v10110_v55  ;;  %v7281_v12 = vshll.u32 %v12578_v61, 16 }
 0x3d9   : > { %v7278_v48 = vor.u32 %v7277_v1, %v12566_v41  ;;  %v12603_v1 = vld [vmem:[#allocation3 + $0x68] sm:$0x1]  ;;  %v7274_v45 = vsel %vm10890_vm7, %v7269_v49, %v12566_v41  ;;  %v7603_v49 = vrot.slane %v7601_v13, 4 }
 0x3da   : > { %v7283_v25 = vrot.slane %v7281_v12, 5 }
 0x3db   : > { %9529 = vmatpush3.bf16.msra.mxu1 %v10110_v55  ;;  %v7244_v55 = vor.u32 %v7243_v3, %v7240_v29  ;;  %v7279_v56 = vrot.slane %v7278_v48, 4  ;;  %v10116_v29 = vld [vmem:[#allocation4 + $0x210] sm:$0xff]   ;;  %v7315_v3 = vrot.slane %v7313_v44, 5  ;;  %v7303_v48 = vrot.slane %v7302_v10, 4 }
 0x3dc   : > { %9530 = vmatprep.subr.bf16.mxu1 %v10112_v60  ;;  %v7608_v10 = vrot.slane %v12523_v19, 5  ;;  %v7568_v19 = vld [vmem:[#allocation3 + $0x24] sm:$0xe] }
 0x3dd   : > { %v7245_v24 = vrot.slane %v7244_v55, 4  ;;  %v7337_v55 = vshll.u32 %v7162_v47, 16  ;;  %v7316_v20 = vor.u32 %v7315_v3, %v7312_v57  ;;  %v7567_v57 = vld [vmem:[#allocation3 + $0x18] sm:$0xe]  ;;  %v7604_v3 = vrot.slane %v12529_v26, 5 }
 0x3de   : > { %9515 = vmatmul.mubr.bf16.gmra.mrb[32].mxu1 %v10111_v50  ;;  %v7288_v50 = vrot.slane %v7286_v46, 4  ;;  %v7307_v46 = vrot.slane %v7305_v42, 5  ;;  %v7610_v42 = vrot.slane %v7608_v10, 4 }
 0x3df   : > { %9531 = vmatpush3.bf16.msra.mxu1 %v10112_v60  ;;  %9534 = vmatprep.mubr.bf16.mxu1 %v8597_v22  ;;  %v7289_v60 = vshll.u32 %v7156_v2, 16  ;;  %v12596_v22 = vrot.slane %v7319_v8, 5  ;;  %v7334_v2 = vshrl.u32 %v7162_v47, 16  ;;  %v7345_v8 = vrot.slane %v7343_v31, 5 }
 0x3e0   : > { %9532 = vmatprep.subr.bf16.mxu1 %v10113_v53  ;;  %v7317_v12 = vrot.slane %v7316_v20, 4  ;;  %v7308_v44 = vsel %vm10890_vm7, %v7303_v48, %v7307_v46  ;;  %v7605_v31 = vsel %vm10690_vm4, %v7603_v49, %v7604_v3  ;;  %v8615_v20 = vrot.slane %v7569_v16, 9  ;;  %v7571_v46 = vld [vmem:[#allocation3 + $0x48] sm:$0xe] }
 0x3e1   : > { %v7326_v33 = vor.u32 %v7325_v37, %v12596_v22  ;;  %v7353_v37 = vshll.u32 %v12618_v6, 16 }
 0x3e2   : > { %v7616_v40 = vsel %vm10690_vm4, %v8615_v20, %v7615_v52 }
 0x3e3   : > { %9533 = vmatpush3.bf16.msra.mxu1 %v10113_v53  ;;  %v7291_v53 = vrot.slane %v7289_v60, 5  ;;  %v7327_v27 = vrot.slane %v7326_v33, 4  ;;  %v7336_v60 = vrot.slane %v7334_v2, 4  ;;  %v10121_v33 = vld [vmem:[#allocation4 + $0x238] sm:$0xff]   ;;  %v7617_v2 = vrot.slane %v7615_v52, 4 }
 0x3e4   : > { %9550 = vmatprep.subr.bf16.mxu1 %v10114_v5 }
 0x3e5   : > { %v7292_v54 = vor.u32 %v7291_v53, %v7288_v50  ;;  %v7322_v50 = vsel %vm10890_vm7, %v7317_v12, %v12596_v22  ;;  %v10119_v53 = vld [vmem:[#allocation4 + $0x228] sm:$0xff]   ;;  %v8613_v22 = vrot.slane %v7567_v57, 9  ;;  %v8617_v12 = vrot.slane %v7571_v46, 9  ;;  %v7574_v57 = vld [vmem:[#allocation3 + $0x6c] sm:$0xe] }
 0x3e6   : > { %9535 = vmatmul.mubr.bf16.vlgmr.msra.gmra.mrb[20].mxu1 %v8598_v35  ;;  %v7250_v35 = vsel %vm10890_vm7, %v7245_v24, %v12564_v17  ;;  %v7329_v17 = vshll.u32 %v12603_v1, 16 }
 0x3e7   : > { %9538 = vmatprep.mubr.bf16.mxu1 %v8599_v34  ;;  %9551 = vmatpush3.bf16.msra.mxu1 %v10114_v5  ;;  %v7284_v5 = vsel %vm10890_vm7, %v7279_v56, %v7283_v25  ;;  %v8600_v43 = vcombine.low %v7250_v35, %v7260_v11  ;;  %v7293_v38 = vrot.slane %v7292_v54, 4  ;;  %v7350_v34 = vor.u32 %v7349_v7, %v7345_v8 }
 0x3e8   : > { %9552 = vmatprep.subr.bf16.mxu1 %v10115_v21  ;;  %v8601_v23 = vcombine.low %v7274_v45, %v7284_v5  ;;  %v7331_v41 = vrot.slane %v7329_v17, 5  ;;  %v7355_v25 = vrot.slane %v7353_v37, 5  ;;  %v7602_v26 = vsel %vm10690_vm4, %v8613_v22, %v7601_v13  ;;  %v7573_v37 = vld [vmem:[#allocation3 + $0x60] sm:$0xe]  ;;  %v12687_v22 = vld [vmem:[%s12797_s5] ss:$0 sm:$0xff] }
 0x3e9   : > { %v7298_v24 = vsel %vm10890_vm7, %v7293_v38, %v12592_v36  ;;  %v10120_v36 = vld [vmem:[#allocation4 + $0x230] sm:$0xff]   ;;  %v8621_v54 = vcombine.low %v7602_v26, %v7605_v31  ;;  %v7619_v17 = vsel %vm10690_vm4, %v7617_v2, %v7618_v18  ;;  %v12695_v31 = vld [vmem:[%s12798_s6] ss:$0 sm:$0xff] }
 0x3ea   : > { %v7332_v59 = vsel %vm10890_vm7, %v7327_v27, %v7331_v41  ;;  %v8602_v0 = vcombine.low %v7298_v24, %v7308_v44  ;;  %v7570_v27 = vld [vmem:[#allocation3 + $0x3c] sm:$0xe]  ;;  %v7643_v44 = vrot.slane %v12575_v32, 5  ;;  %v7572_v24 = vld [vmem:[#allocation3 + $0x54] sm:$0xe] }
 0x3eb   : > { %9553 = vmatpush3.bf16.msra.mxu1 %v10115_v21  ;;  %v7339_v21 = vrot.slane %v7337_v55, 5  ;;  %v8603_v47 = vcombine.low %v7322_v50, %v7332_v59  ;;  %v7611_v55 = vrot.slane %v12539_v4, 5  ;;  %v8618_v50 = vrot.slane %v7572_v24, 9 }
 0x3ec   : > { %9554 = vmatprep.subr.bf16.mxu1 %v10116_v29 }
 0x3ed   : > { %v7340_v56 = vor.u32 %v7339_v21, %v7336_v60  ;;  %v7612_v45 = vsel %vm10690_vm4, %v7610_v42, %v7611_v55  ;;  %v7632_v60 = vrot.slane %v12578_v61, 5  ;;  %v7870_v55 = vld [vmem:[%s12690_s25 + $0x18] sm:$0xff] }
 0x3ee   : > { %9539 = vmatmul.mubr.bf16.gmra.mrb[24].mxu1 %v8600_v43  ;;  %v8614_v43 = vrot.slane %v7568_v19, 9 }
 0x3ef   : > { %9542 = vmatprep.mubr.bf16.mxu1 %v8601_v23  ;;  %9555 = vmatpush3.bf16.msra.mxu1 %v10116_v29  ;;  %v7351_v29 = vrot.slane %v7350_v34, 4  ;;  %v7341_v62 = vrot.slane %v7340_v56, 4  ;;  %v7629_v23 = vrot.slane %v12547_v58, 5  ;;  %v8616_v58 = vrot.slane %v7570_v27, 9 }
 0x3f0   : > { %9556 = vmatprep.subr.bf16.mxu1 %v10117_v15  ;;  %v7609_v4 = vsel %vm10690_vm4, %v8614_v43, %v7608_v10  ;;  %v7645_v56 = vrot.slane %v7643_v44, 4 }
 0x3f1   : > { %v7356_v11 = vsel %vm10890_vm7, %v7351_v29, %v7355_v25  ;;  %v7346_v35 = vsel %vm10890_vm7, %v7341_v62, %v7345_v8  ;;  %v8622_v48 = vcombine.low %v7609_v4, %v7612_v45  ;;  %v8623_v8 = vcombine.low %v7616_v40, %v7619_v17  ;;  %v7868_v45 = vld [vmem:[%s12690_s25 + $0x8] sm:$0xff] }
 0x3f2   : > { %v8604_v5 = vcombine.low %v7346_v35, %v7356_v11  ;;  %v7631_v38 = vrot.slane %v7629_v23, 4  ;;  %v7869_v35 = vld [vmem:[%s12690_s25 + $0x10] sm:$0xff] }
 0x3f3   : > { %9557 = vmatpush3.bf16.msra.mxu1 %v10117_v15  ;;  %v7622_v15 = vrot.slane %v12544_v51, 5  ;;  %v7625_v51 = vrot.slane %v12573_v63, 5  ;;  %v7630_v63 = vsel %vm10690_vm4, %v8617_v12, %v7629_v23 }
 0x3f4   : > { %9558 = vmatprep.subr.bf16.mxu1 %v10118_v28  ;;  %v7633_v41 = vsel %vm10690_vm4, %v7631_v38, %v7632_v60 }
 0x3f5   : > { %v7624_v7 = vrot.slane %v7622_v15, 4  ;;  %v7623_v34 = vsel %vm10690_vm4, %v8616_v58, %v7622_v15  ;;  %v8625_v61 = vcombine.low %v7630_v63, %v7633_v41 }
 0x3f6   : > { %9543 = vmatmul.mubr.bf16.gmra.mrb[28].mxu1 %v8602_v0  ;;  %v7646_v0 = vrot.slane %v12603_v1, 5 }
 0x3f7   : > { %9546 = vmatprep.mubr.bf16.mxu1 %v8603_v47  ;;  %9559 = vmatpush3.bf16.msra.mxu1 %v10118_v28  ;;  %v7626_v21 = vsel %vm10690_vm4, %v7624_v7, %v7625_v51  ;;  %v7636_v28 = vrot.slane %v12568_v9, 5  ;;  %v7639_v9 = vrot.slane %v12594_v30, 5  ;;  %v8619_v47 = vrot.slane %v7573_v37, 9  ;;  %v7871_v51 = vld [vmem:[%s12690_s25 + $0x20] sm:$0xff] }
 0x3f8   : > { %9560 = vmatprep.subr.bf16.mxu1 %v10119_v53  ;;  %v8624_v59 = vcombine.low %v7623_v34, %v7626_v21  ;;  %v7647_v29 = vsel %vm10690_vm4, %v7645_v56, %v7646_v0  ;;  %v7874_v21 = vld [vmem:[%s12690_s25 + $0x38] sm:$0xff] }
 0x3f9   : > { %v7638_v13 = vrot.slane %v7636_v28, 4  ;;  %v7637_v49 = vsel %vm10690_vm4, %v8618_v50, %v7636_v28  ;;  %v7644_v30 = vsel %vm10690_vm4, %v8619_v47, %v7643_v44  ;;  %v7872_v44 = vld [vmem:[%s12690_s25 + $0x28] sm:$0xff] }
 0x3fa   : > { %v8627_v1 = vcombine.low %v7644_v30, %v7647_v29 }
 0x3fb   : > { %9561 = vmatpush3.bf16.msra.mxu1 %v10119_v53  ;;  %v7640_v32 = vsel %vm10690_vm4, %v7638_v13, %v7639_v9  ;;  %v7650_v53 = vrot.slane %v12598_v14, 5  ;;  %v7653_v14 = vrot.slane %v12618_v6, 5  ;;  %v7877_v9 = vld [vmem:[%s12690_s25 + $0x50] sm:$0xff] }
 0x3fc   : > { %9562 = vmatprep.subr.bf16.mxu1 %v10120_v36  ;;  %v8626_v62 = vcombine.low %v7637_v49, %v7640_v32  ;;  %v7875_v32 = vld [vmem:[%s12690_s25 + $0x40] sm:$0xff]  ;;  %v7878_v49 = vld [vmem:[%s12690_s25 + $0x58] sm:$0xff] }
 0x3fd   : > { %v7652_v25 = vrot.slane %v7650_v53, 4 }
 0x3fe   : > { %9547 = vmatmul.mubr.bf16.gmra.mrb[32].mxu1 %v8604_v5 }
 0x3ff   : > { %9563 = vmatpush3.bf16.msra.mxu1 %v10120_v36  ;;  %9566 = vmatprep.mubr.bf16.mxu1 %v8621_v54  ;;  %v8620_v36 = vrot.slane %v7574_v57, 9  ;;  %v7654_v3 = vsel %vm10690_vm4, %v7652_v25, %v7653_v14  ;;  %v7867_v54 = vld [vmem:[%s12690_s25] sm:$0xff]  ;;  %v7876_v25 = vld [vmem:[%s12690_s25 + $0x48] sm:$0xff] }
 0x400   : > { %9564 = vmatprep.subr.bf16.mxu1 %v10121_v33 }
 0x401   : > { %v7651_v11 = vsel %vm10690_vm4, %v8620_v36, %v7650_v53  ;;  %vm7945_vm4 = vcmask 31744  }
 0x402   : > { %v8628_v10 = vcombine.low %v7651_v11, %v7654_v3 }
 0x403   : > { %9565 = vmatpush3.bf16.msra.mxu1 %v10121_v33 }
 0x406   : > { %9567 = vmatmul.mubr.bf16.vlgmr.msra.gmra.mrb[20].mxu1 %v8622_v48 }
 0x407   : > { %9570 = vmatprep.mubr.bf16.mxu1 %v8623_v8  ;;  %v7873_v8 = vld [vmem:[%s12690_s25 + $0x30] sm:$0xff] }
 0x40e   : > { %9571 = vmatmul.mubr.bf16.gmra.mrb[24].mxu1 %v8624_v59 }
 0x40f   : > { %9574 = vmatprep.mubr.bf16.mxu1 %v8625_v61 }
 0x416   : > { %9575 = vmatmul.mubr.bf16.gmra.mrb[28].mxu1 %v8626_v62 }
 0x417   : > { %9578 = vmatprep.mubr.bf16.mxu1 %v8627_v1 }
 0x41e   : > { %9579 = vmatmul.mubr.bf16.gmra.mrb[32].mxu1 %v8628_v10 }
 0x4d9   : > { %v9568_v6 = vpop.f32.mrb[20].mxu1 }
 0x4da   : > { %v7892_v39 = vmul.f32 %v9568_v6, %v12687_v22  ;;  %v7786_v52 = vpop.f32.mrb[21].mxu1 }
 0x4db   : > { %v7890_v5 = vmul.f32 %v12687_v22, %v7786_v52  ;;  %v9569_v26 = vpop.f32.mrb[22].mxu1 }
 0x4dc   : > { %v7915_v33 = vadd.f32 %v12695_v31, %v7892_v39  ;;  %v7893_v42 = vmul.f32 %v9569_v26, %v12687_v22  ;;  %v7789_v19 = vpop.f32.mrb[23].mxu1  ;;  %v7881_v39 = vld [vmem:[%s12690_s25 + $0x70] sm:$0xff]  ;;  %v7879_v26 = vld [vmem:[%s12690_s25 + $0x60] sm:$0xff] }
 0x4dd   : > { %v7913_v2 = vadd.f32 %v12695_v31, %v7890_v5  ;;  %v7891_v16 = vmul.f32 %v12687_v22, %v7789_v19  ;;  %v7882_v19 = vld [vmem:[%s12690_s25 + $0x78] sm:$0xff] }
 0x4de   : > { %v7931_v18 = vadd.f32 %v7915_v33, %v7869_v35  ;;  %v7916_v43 = vadd.f32 %v12695_v31, %v7893_v42 }
 0x4df   : > { %v7929_v15 = vadd.f32 %v7913_v2, %v7867_v54  ;;  %v7914_v20 = vadd.f32 %v12695_v31, %v7891_v16 }
 0x4e0   : > { %7948 = vst.msk [vmem:[%s10354_s22 + $0x10] sm:$0xff] %vm7945_vm4, %v7931_v18  ;;  %v7932_v17 = vadd.f32 %v7916_v43, %v7870_v55  ;;  %v7880_v18 = vld [vmem:[%s12690_s25 + $0x68] sm:$0xff] }
 0x4e1   : > { %7946 = vst.msk [vmem:[%s10354_s22] sm:$0xff] %vm7945_vm4, %v7929_v15  ;;  %v7930_v23 = vadd.f32 %v7914_v20, %v7868_v45  ;;  %v9572_v4 = vpop.f32.mrb[24].mxu1 }
 0x4e2   : > { %7949 = vst.msk [vmem:[%s10354_s22 + $0x18] sm:$0xff] %vm7945_vm4, %v7932_v17  ;;  %v7896_v48 = vmul.f32 %v9572_v4, %v12687_v22  ;;  %v7802_v40 = vpop.f32.mrb[25].mxu1 }
 0x4e3   : > { %7947 = vst.msk [vmem:[%s10354_s22 + $0x8] sm:$0xff] %vm7945_vm4, %v7930_v23  ;;  %v7894_v7 = vmul.f32 %v12687_v22, %v7802_v40  ;;  %v9573_v27 = vpop.f32.mrb[26].mxu1 }
 0x4e4   : > { %v7919_v38 = vadd.f32 %v12695_v31, %v7896_v48  ;;  %v7897_v46 = vmul.f32 %v9573_v27, %v12687_v22  ;;  %v7805_v60 = vpop.f32.mrb[27].mxu1 }
 0x4e5   : > { %v7917_v58 = vadd.f32 %v12695_v31, %v7894_v7  ;;  %v7895_v28 = vmul.f32 %v12687_v22, %v7805_v60 }
 0x4e6   : > { %v7935_v12 = vadd.f32 %v7919_v38, %v7873_v8  ;;  %v7920_v41 = vadd.f32 %v12695_v31, %v7897_v46 }
 0x4e7   : > { %v7933_v34 = vadd.f32 %v7917_v58, %v7871_v51  ;;  %v7918_v59 = vadd.f32 %v12695_v31, %v7895_v28 }
 0x4e8   : > { %7952 = vst.msk [vmem:[%s10354_s22 + $0x30] sm:$0xff] %vm7945_vm4, %v7935_v12  ;;  %v7936_v63 = vadd.f32 %v7920_v41, %v7874_v21 }
 0x4e9   : > { %7950 = vst.msk [vmem:[%s10354_s22 + $0x20] sm:$0xff] %vm7945_vm4, %v7933_v34  ;;  %v7934_v61 = vadd.f32 %v7918_v59, %v7872_v44  ;;  %v9576_v13 = vpop.f32.mrb[28].mxu1 }
 0x4ea   : > { %7953 = vst.msk [vmem:[%s10354_s22 + $0x38] sm:$0xff] %vm7945_vm4, %v7936_v63  ;;  %v7900_v24 = vmul.f32 %v9576_v13, %v12687_v22  ;;  %v7818_v56 = vpop.f32.mrb[29].mxu1 }
 0x4eb   : > { %7951 = vst.msk [vmem:[%s10354_s22 + $0x28] sm:$0xff] %vm7945_vm4, %v7934_v61  ;;  %v7898_v37 = vmul.f32 %v12687_v22, %v7818_v56  ;;  %v9577_v0 = vpop.f32.mrb[30].mxu1 }
 0x4ec   : > { %v7923_v50 = vadd.f32 %v12695_v31, %v7900_v24  ;;  %v7901_v53 = vmul.f32 %v9577_v0, %v12687_v22  ;;  %v7821_v47 = vpop.f32.mrb[31].mxu1 }
 0x4ed   : > { %v7921_v29 = vadd.f32 %v12695_v31, %v7898_v37  ;;  %v7899_v62 = vmul.f32 %v12687_v22, %v7821_v47 }
 0x4ee   : > { %v7939_v30 = vadd.f32 %v7923_v50, %v7877_v9  ;;  %v7924_v1 = vadd.f32 %v12695_v31, %v7901_v53 }
 0x4ef   : > { %v7937_v57 = vadd.f32 %v7921_v29, %v7875_v32  ;;  %v7922_v14 = vadd.f32 %v12695_v31, %v7899_v62 }
 0x4f0   : > { %7956 = vst.msk [vmem:[%s10354_s22 + $0x50] sm:$0xff] %vm7945_vm4, %v7939_v30  ;;  %v7940_v36 = vadd.f32 %v7924_v1, %v7878_v49 }
 0x4f1   : > { %7954 = vst.msk [vmem:[%s10354_s22 + $0x40] sm:$0xff] %vm7945_vm4, %v7937_v57  ;;  %v7938_v3 = vadd.f32 %v7922_v14, %v7876_v25  ;;  %v9580_v11 = vpop.f32.mrb[32].mxu1 }
 0x4f2   : > { %7957 = vst.msk [vmem:[%s10354_s22 + $0x58] sm:$0xff] %vm7945_vm4, %v7940_v36  ;;  %v7904_v10 = vmul.f32 %v9580_v11, %v12687_v22  ;;  %v7834_v6 = vpop.f32.mrb[33].mxu1 }
 0x4f3   : > { %7955 = vst.msk [vmem:[%s10354_s22 + $0x48] sm:$0xff] %vm7945_vm4, %v7938_v3  ;;  %v7902_v52 = vmul.f32 %v12687_v22, %v7834_v6  ;;  %v9581_v35 = vpop.f32.mrb[34].mxu1 }
 0x4f4   : > { %v7927_v5 = vadd.f32 %v12695_v31, %v7904_v10  ;;  %v7905_v33 = vmul.f32 %v9581_v35, %v12687_v22  ;;  %v7837_v54 = vpop.f32.mrb[35].mxu1 }
 0x4f5   : > { %v7925_v42 = vadd.f32 %v12695_v31, %v7902_v52  ;;  %v7903_v2 = vmul.f32 %v12687_v22, %v7837_v54 }
 0x4f6   : > { %v7943_v55 = vadd.f32 %v7927_v5, %v7881_v39  ;;  %v7928_v16 = vadd.f32 %v12695_v31, %v7905_v33 }
 0x4f7   : > { %v7941_v43 = vadd.f32 %v7925_v42, %v7879_v26  ;;  %v7926_v45 = vadd.f32 %v12695_v31, %v7903_v2 }
 0x4f8   : > { %7960 = vst.msk [vmem:[%s10354_s22 + $0x70] sm:$0xff] %vm7945_vm4, %v7943_v55  ;;  %v7944_v15 = vadd.f32 %v7928_v16, %v7882_v19 }
 0x4f9   : > { %7958 = vst.msk [vmem:[%s10354_s22 + $0x60] sm:$0xff] %vm7945_vm4, %v7941_v43  ;;  %v7942_v20 = vadd.f32 %v7926_v45, %v7880_v18 }
 0x4fa   : > { %7961 = vst.msk [vmem:[%s10354_s22 + $0x78] sm:$0xff] %vm7945_vm4, %v7944_v15 }
 0x4fb   : > { %7959 = vst.msk [vmem:[%s10354_s22 + $0x68] sm:$0xff] %vm7945_vm4, %v7942_v20 }
 0x4fc PF: > { %s18_s28 = sadd.s32 1, %s10216_s28   ;;  %s12910_s24 = smov %s10208_s26 }
 0x4fd   : > { %p15_p11 = scmp.ge.s32.totalorder %s18_s28, 6   ;;  %s12911_s25 = smov %s10212_s27 }
 0x4fe   : > { %s12912_s26 = smov %s12915_s30  ;;  %s12913_s27 = smov %s12919_s8 }
 0x4ff   :  { %17 = sbr.rel (!%p15_p11) target bundleno = 3 (0x3), region = 114 }
 0x506   :  { %7994 = vsyncpa [#allocation5], 1 }
 0x507   :  { %7996 = vsyncpa [#allocation5 + $0x1], 1 }

</bundles_post_ra>
